<compile_context>
chip_gen: v5e
topology: v5e:2x2
jax: 0.10.0
libtpu: 0.0.40
codegen_flags: <defaults>
</compile_context>

<pallas_src>
import jax
import jax.numpy as jnp
from jax import lax
from jax.experimental import pallas as pl
from jax.experimental.pallas import tpu as pltpu

VOCAB     = 27
VOCAB_PAD = 128                 # lane-dense padded vocab for the output projection
EMB_ROWS  = 32                  # padded embedding rows (token part of the one-hot matmul)
NUM_POS   = 20
D_MODEL   = 64
N_LAYERS  = 2
N_HEADS   = 4
HEAD_DIM  = D_MODEL // N_HEADS
D_FF      = 4 * D_MODEL
LN_EPS    = 1e-5
NEG_INF   = -1e30

SMALL_COLS = 256                # lane width of the packed small-params array
SMALL_ROWS_PER_LAYER = 8        # bqkv, bo, ff1_b, ff2_b, ln1_w, ln1_b, ln2_w, ln2_b

# Matmul-operand dtype. jnp.float32 (default) keeps the forward numerically identical
# to the PyTorch module (up to the documented approx-reciprocal softmax denominator).
# Set to jnp.bfloat16 on v6e/v7x to cut MXU f32-emulation passes ~3x and halve weight
# DMA bytes; softmax / LayerNorm / residuals stay f32 (important on v5e: no bf16 VPU/EUP).
MATMUL_DTYPE = jnp.float32


def _layer_norm(x, w, b):
    mu  = jnp.mean(x, axis=-1, keepdims=True)
    var = jnp.mean((x - mu) ** 2, axis=-1, keepdims=True)
    return (x - mu) * lax.rsqrt(var + LN_EPS) * w + b


def _dot(a, b, dims=None):
    a = a.astype(MATMUL_DTYPE)
    b = b.astype(MATMUL_DTYPE)
    if dims is None:
        return jnp.dot(a, b, preferred_element_type=jnp.float32)
    return lax.dot_general(a, b, dims, preferred_element_type=jnp.float32)


def transformer_lm_kernel(idx_ref,                 # (S, 1)   int32
                          emb_pos_ref,             # (EMB_ROWS + NUM_POS, D)
                          wqkv_ref,                # (L, D, 3D)   (scale folded into q cols)
                          wo_ref,                  # (L, D, D)
                          ff1_w_ref,               # (L, D, Dff)
                          ff2_w_ref,               # (L, Dff, D)
                          lin_w_ref,               # (D, VOCAB_PAD)
                          small_ref,               # (L*8 + 1, 256) packed biases / LN / lin_b
                          o_ref):                  # (S, VOCAB_PAD)
    S  = o_ref.shape[0]
    HS = N_HEADS * S

    # ---- fused embedding gather + positional add (one augmented one-hot matmul) ----
    # columns [0, EMB_ROWS) select the token embedding row, columns
    # [EMB_ROWS, EMB_ROWS + NUM_POS) select the positional row -> sum on the MXU.
    EP  = EMB_ROWS + NUM_POS
    col = lax.broadcasted_iota(jnp.int32, (S, EP), 1)
    row = lax.broadcasted_iota(jnp.int32, (S, EP), 0)
    onehot = ((col == idx_ref[...]) | (col == row + EMB_ROWS)).astype(MATMUL_DTYPE)
    x = jnp.dot(onehot, emb_pos_ref[...].astype(MATMUL_DTYPE),
                preferred_element_type=jnp.float32)                    # (S, D)

    # ---- block-diagonal + causal mask for the head-stacked (HS, HS) scores ----
    # (no integer div/mod: head index built from compares, hoisted out of the layer loop)
    rH = lax.broadcasted_iota(jnp.int32, (HS, HS), 0)
    cH = lax.broadcasted_iota(jnp.int32, (HS, HS), 1)

    def head_of(i):
        h = jnp.zeros_like(i)
        for hh in range(1, N_HEADS):
            h = h + (i >= hh * S).astype(jnp.int32)
        return h

    hr, hc = head_of(rH), head_of(cH)
    attn_mask = (hr == hc) & ((cH - hc * S) <= (rH - hr * S))

    for l in range(N_LAYERS):                                          # static unrolled
        base = l * SMALL_ROWS_PER_LAYER
        sp = small_ref[base:base + SMALL_ROWS_PER_LAYER, :]            # (8, 256) aligned load
        bqkv  = sp[0:1, :3 * D_MODEL]
        bo    = sp[1:2, :D_MODEL]
        ff1_b = sp[2:3, :D_FF]
        ff2_b = sp[3:4, :D_MODEL]
        ln1_w = sp[4:5, :D_MODEL]
        ln1_b = sp[5:6, :D_MODEL]
        ln2_w = sp[6:7, :D_MODEL]
        ln2_b = sp[7:8, :D_MODEL]

        # ---- fused Q/K/V projection (attention scale folded into q at pack time) ----
        qkv = _dot(x, wqkv_ref[l]) + bqkv                              # (S, 3D)

        # stack heads along sublanes: (S, 3D) lane blocks -> (H*S, HD)
        q = jnp.concatenate(
            [qkv[:, h * HEAD_DIM:(h + 1) * HEAD_DIM] for h in range(N_HEADS)], axis=0)
        k = jnp.concatenate(
            [qkv[:, D_MODEL + h * HEAD_DIM:D_MODEL + (h + 1) * HEAD_DIM]
             for h in range(N_HEADS)], axis=0)
        v = jnp.concatenate(
            [qkv[:, 2 * D_MODEL + h * HEAD_DIM:2 * D_MODEL + (h + 1) * HEAD_DIM]
             for h in range(N_HEADS)], axis=0)

        # ---- one score matmul, one softmax, one PV matmul for all heads ----
        s = _dot(q, k, (((1,), (1,)), ((), ())))                       # (HS, HS)
        s = jnp.where(attn_mask, s, NEG_INF)                           # cross-head/causal off
        s = s - jnp.max(s, axis=-1, keepdims=True)
        p = jnp.exp(s)                                                 # masked entries -> 0
        p = p * pl.reciprocal(jnp.sum(p, axis=-1, keepdims=True), approx=True)
        hv = _dot(p, v)                                                # (HS, HD)

        # (H, S, HD) -> (S, H*HD) then fused output projection
        hcat = jnp.concatenate([hv[h * S:(h + 1) * S, :] for h in range(N_HEADS)], axis=1)
        attn = _dot(hcat, wo_ref[l]) + bo                              # (S, D)

        # post-norm residual (PyTorch default norm_first=False)
        x = _layer_norm(x + attn, ln1_w, ln1_b)

        # ---- feed-forward (ReLU) ----
        h1 = jnp.maximum(_dot(x, ff1_w_ref[l]) + ff1_b, 0.0)
        h2 = _dot(h1, ff2_w_ref[l]) + ff2_b
        x = _layer_norm(x + h2, ln2_w, ln2_b)

    # ---- final linear (128-lane padded) + log-softmax over vocab ----
    # pad columns of lin_b are -1e30 => exp() of pad columns is 0, LSE unchanged.
    lin_b = small_ref[N_LAYERS * SMALL_ROWS_PER_LAYER:
                      N_LAYERS * SMALL_ROWS_PER_LAYER + 1, :VOCAB_PAD]
    logits = _dot(x, lin_w_ref[...]) + lin_b
    m = jnp.max(logits, axis=-1, keepdims=True)
    lse = jnp.log(jnp.sum(jnp.exp(logits - m), axis=-1, keepdims=True)) + m
    o_ref[...] = logits - lse


# ----------------------------------------------------------------------------- params
def init_params(key):
    """PyTorch-layout parameters (weights stored as (out_features, in_features))."""
    ks = jax.random.split(key, 8)
    sc = 0.05
    f32 = jnp.float32
    return {
        "embed": jax.random.normal(ks[0], (VOCAB, D_MODEL), f32) * sc,
        "pos":   jax.random.normal(ks[1], (NUM_POS, D_MODEL), f32) * sc,
        "in_w":  jax.random.normal(ks[2], (N_LAYERS, 3 * D_MODEL, D_MODEL), f32) * sc,
        "in_b":  jnp.zeros((N_LAYERS, 3 * D_MODEL), f32),
        "out_w": jax.random.normal(ks[3], (N_LAYERS, D_MODEL, D_MODEL), f32) * sc,
        "out_b": jnp.zeros((N_LAYERS, D_MODEL), f32),
        "ff1_w": jax.random.normal(ks[4], (N_LAYERS, D_FF, D_MODEL), f32) * sc,
        "ff1_b": jnp.zeros((N_LAYERS, D_FF), f32),
        "ff2_w": jax.random.normal(ks[5], (N_LAYERS, D_MODEL, D_FF), f32) * sc,
        "ff2_b": jnp.zeros((N_LAYERS, D_MODEL), f32),
        "ln1_w": jnp.ones((N_LAYERS, D_MODEL), f32),
        "ln1_b": jnp.zeros((N_LAYERS, D_MODEL), f32),
        "ln2_w": jnp.ones((N_LAYERS, D_MODEL), f32),
        "ln2_b": jnp.zeros((N_LAYERS, D_MODEL), f32),
        "lin_w": jax.random.normal(ks[6], (VOCAB, D_MODEL), f32) * sc,
        "lin_b": jnp.zeros((VOCAB,), f32),
    }


def pack_params(p, dtype=None):
    """One-time repack of PyTorch-layout params into the kernel layout:
       fused x@W weights, scale folded into q, stacked embedding+pos table,
       lane-dense padded vocab, and all small vectors packed into one array."""
    dtype = MATMUL_DTYPE if dtype is None else dtype
    L, D = N_LAYERS, D_MODEL
    scale = 1.0 / (HEAD_DIM ** 0.5)

    # fused QKV / output-projection weights in x @ W orientation
    wqkv = jnp.swapaxes(p["in_w"], 1, 2)                   # (L, D, 3D), cols = [q | k | v]
    wqkv = wqkv.at[:, :, :D].multiply(scale)               # fold attention scale into q
    wo   = jnp.swapaxes(p["out_w"], 1, 2)                  # (L, D, D)

    # embedding (zero-padded to EMB_ROWS rows) stacked with the positional table
    emb_pos = jnp.concatenate(
        [jnp.pad(p["embed"], ((0, EMB_ROWS - VOCAB), (0, 0))), p["pos"]], axis=0)

    # pack every small vector as one lane-dense row of a (L*8 + 1, 256) f32 array
    def row(vec):
        vec = jnp.asarray(vec, jnp.float32).reshape(-1)
        return jnp.pad(vec, (0, SMALL_COLS - vec.shape[0]))[None, :]

    rows = []
    for l in range(L):
        bqkv = p["in_b"][l].at[:D].multiply(scale)          # scale folded into q bias
        rows += [row(bqkv), row(p["out_b"][l]), row(p["ff1_b"][l]), row(p["ff2_b"][l]),
                 row(p["ln1_w"][l]), row(p["ln1_b"][l]),
                 row(p["ln2_w"][l]), row(p["ln2_b"][l])]
    rows.append(row(jnp.pad(p["lin_b"], (0, VOCAB_PAD - VOCAB), constant_values=NEG_INF)))
    small = jnp.concatenate(rows, axis=0)                   # (17, 256), stays f32

    return {
        "emb_pos": emb_pos.astype(dtype),
        "wqkv":    wqkv.astype(dtype),
        "wo":      wo.astype(dtype),
        "ff1_w":   jnp.swapaxes(p["ff1_w"], 1, 2).astype(dtype),   # (L, D, Dff)
        "ff2_w":   jnp.swapaxes(p["ff2_w"], 1, 2).astype(dtype),   # (L, Dff, D)
        "lin_w":   jnp.pad(p["lin_w"].T, ((0, 0), (0, VOCAB_PAD - VOCAB))).astype(dtype),
        "small":   small,
    }


_KERNEL_ARGS = ["emb_pos", "wqkv", "wo", "ff1_w", "ff2_w", "lin_w", "small"]


@jax.jit
def transformer_lm(indices, kparams):
    S = indices.shape[0]
    assert S <= NUM_POS, "sequence length exceeds the positional-encoding table"
    idx = indices.astype(jnp.int32).reshape(S, 1)
    args = [idx] + [kparams[k] for k in _KERNEL_ARGS]
    vmem = pl.BlockSpec(memory_space=pltpu.MemorySpace.VMEM)
    out_pad = pl.pallas_call(
        transformer_lm_kernel,
        out_shape=jax.ShapeDtypeStruct((S, VOCAB_PAD), jnp.float32),
        in_specs=[vmem] * len(args),
        out_specs=vmem,
    )(*args)
    return out_pad[:, :VOCAB]          # drop lane-padding columns (they hold ~-1e30)


# ----------------------------------------------------------------------- pure-JAX ref
def transformer_lm_ref(indices, params):
    """Pure-JAX reference in the original PyTorch parameter layout."""
    S = indices.shape[0]
    x = params["embed"][indices] + params["pos"][:S]
    causal = jnp.arange(S)[None, :] <= jnp.arange(S)[:, None]
    scale = 1.0 / (HEAD_DIM ** 0.5)
    for l in range(N_LAYERS):
        qkv = x @ params["in_w"][l].T + params["in_b"][l]
        q, k, v = jnp.split(qkv, 3, axis=-1)
        heads = []
        for h in range(N_HEADS):
            sl = slice(h * HEAD_DIM, (h + 1) * HEAD_DIM)
            s = (q[:, sl] * scale) @ k[:, sl].T
            s = jnp.where(causal, s, NEG_INF)
            p = jax.nn.softmax(s, axis=-1)
            heads.append(p @ v[:, sl])
        attn = jnp.concatenate(heads, -1) @ params["out_w"][l].T + params["out_b"][l]
        x = _layer_norm(x + attn, params["ln1_w"][l], params["ln1_b"][l])
        h2 = (jnp.maximum(x @ params["ff1_w"][l].T + params["ff1_b"][l], 0.0)
              @ params["ff2_w"][l].T + params["ff2_b"][l])
        x = _layer_norm(x + h2, params["ln2_w"][l], params["ln2_b"][l])
    logits = x @ params["lin_w"].T + params["lin_b"]
    return jax.nn.log_softmax(logits, axis=1)


if __name__ == "__main__":
    key = jax.random.PRNGKey(0)
    pkey, ikey = jax.random.split(key)
    params = init_params(pkey)
    kparams = pack_params(params)
    indices = jax.random.randint(ikey, (NUM_POS,), 0, VOCAB, dtype=jnp.int32)  # seq len 20

    out = transformer_lm(indices, kparams)
    out = jax.block_until_ready(out)

    ref = transformer_lm_ref(indices, params)
    assert out.shape == (NUM_POS, VOCAB)
    assert bool(jnp.all(jnp.isfinite(out)))
    assert bool(jnp.allclose(out, ref, atol=1e-2, rtol=1e-2))
    # log-softmax rows should sum to ~1 in prob space
    assert bool(jnp.allclose(jnp.exp(out).sum(-1), 1.0, atol=1e-3))
    print("KERNEL_OK")
</pallas_src>

<mosaic_0001>
module attributes {stable_mosaic.version = 11 : i64} {
  func.func @transformer_lm_kernel(%arg0: memref<20x1xi32, #tpu.memory_space<vmem>>, %arg1: memref<52x64xf32, #tpu.memory_space<vmem>>, %arg2: memref<2x64x192xf32, #tpu.memory_space<vmem>>, %arg3: memref<2x64x64xf32, #tpu.memory_space<vmem>>, %arg4: memref<2x64x256xf32, #tpu.memory_space<vmem>>, %arg5: memref<2x256x64xf32, #tpu.memory_space<vmem>>, %arg6: memref<64x128xf32, #tpu.memory_space<vmem>>, %arg7: memref<17x256xf32, #tpu.memory_space<vmem>>, %arg8: memref<20x128xf32, #tpu.memory_space<vmem>>) attributes {dimension_semantics = [], scalar_prefetch = 0 : i64, scratch_operands = 0 : i64, tpu.core_type = #tpu.core_type<tc>} {
    %0 = tpu.iota {dimensions = array<i32: 1>} : vector<20x52xi32>
    %1 = tpu.iota {dimensions = array<i32: 0>} : vector<20x52xi32>
    %c0 = arith.constant 0 : index
    %c0_0 = arith.constant 0 : index
    %2 = vector.load %arg0[%c0, %c0_0] : memref<20x1xi32, #tpu.memory_space<vmem>>, vector<20x1xi32>
    %3 = vector.broadcast %2 : vector<20x1xi32> to vector<20x52xi32>
    %4 = arith.cmpi eq, %0, %3 : vector<20x52xi32>
    %c32_i32 = arith.constant 32 : i32
    %5 = vector.broadcast %c32_i32 : i32 to vector<20x52xi32>
    %6 = arith.addi %1, %5 : vector<20x52xi32>
    %7 = arith.cmpi eq, %0, %6 : vector<20x52xi32>
    %8 = arith.ori %4, %7 : vector<20x52xi1>
    %9 = arith.extui %8 : vector<20x52xi1> to vector<20x52xi32>
    %10 = arith.sitofp %9 : vector<20x52xi32> to vector<20x52xf32>
    %c0_1 = arith.constant 0 : index
    %c0_2 = arith.constant 0 : index
    %11 = vector.load %arg1[%c0_1, %c0_2] : memref<52x64xf32, #tpu.memory_space<vmem>>, vector<52x64xf32>
    %cst = arith.constant dense<0.000000e+00> : vector<20x64xf32>
    %12 = tpu.matmul %10, %11, %cst {dimension_numbers = #tpu.dot_dimension_numbers<[1], [0], [0], [1], [0, 0, 1, 1], [], []>} : vector<20x52xf32>, vector<52x64xf32>, vector<20x64xf32> -> vector<20x64xf32>
    %13 = tpu.iota {dimensions = array<i32: 0>} : vector<80x80xi32>
    %14 = tpu.iota {dimensions = array<i32: 1>} : vector<80x80xi32>
    %c0_i32 = arith.constant 0 : i32
    %15 = vector.broadcast %c0_i32 : i32 to vector<80x80xi32>
    %c20_i32 = arith.constant 20 : i32
    %16 = vector.broadcast %c20_i32 : i32 to vector<80x80xi32>
    %17 = arith.cmpi sge, %13, %16 : vector<80x80xi32>
    %18 = arith.extui %17 : vector<80x80xi1> to vector<80x80xi32>
    %19 = arith.addi %15, %18 : vector<80x80xi32>
    %c40_i32 = arith.constant 40 : i32
    %20 = vector.broadcast %c40_i32 : i32 to vector<80x80xi32>
    %21 = arith.cmpi sge, %13, %20 : vector<80x80xi32>
    %22 = arith.extui %21 : vector<80x80xi1> to vector<80x80xi32>
    %23 = arith.addi %19, %22 : vector<80x80xi32>
    %c60_i32 = arith.constant 60 : i32
    %24 = vector.broadcast %c60_i32 : i32 to vector<80x80xi32>
    %25 = arith.cmpi sge, %13, %24 : vector<80x80xi32>
    %26 = arith.extui %25 : vector<80x80xi1> to vector<80x80xi32>
    %27 = arith.addi %23, %26 : vector<80x80xi32>
    %c0_i32_3 = arith.constant 0 : i32
    %28 = vector.broadcast %c0_i32_3 : i32 to vector<80x80xi32>
    %c20_i32_4 = arith.constant 20 : i32
    %29 = vector.broadcast %c20_i32_4 : i32 to vector<80x80xi32>
    %30 = arith.cmpi sge, %14, %29 : vector<80x80xi32>
    %31 = arith.extui %30 : vector<80x80xi1> to vector<80x80xi32>
    %32 = arith.addi %28, %31 : vector<80x80xi32>
    %c40_i32_5 = arith.constant 40 : i32
    %33 = vector.broadcast %c40_i32_5 : i32 to vector<80x80xi32>
    %34 = arith.cmpi sge, %14, %33 : vector<80x80xi32>
    %35 = arith.extui %34 : vector<80x80xi1> to vector<80x80xi32>
    %36 = arith.addi %32, %35 : vector<80x80xi32>
    %c60_i32_6 = arith.constant 60 : i32
    %37 = vector.broadcast %c60_i32_6 : i32 to vector<80x80xi32>
    %38 = arith.cmpi sge, %14, %37 : vector<80x80xi32>
    %39 = arith.extui %38 : vector<80x80xi1> to vector<80x80xi32>
    %40 = arith.addi %36, %39 : vector<80x80xi32>
    %41 = arith.cmpi eq, %27, %40 : vector<80x80xi32>
    %c20_i32_7 = arith.constant 20 : i32
    %42 = vector.broadcast %c20_i32_7 : i32 to vector<80x80xi32>
    %43 = arith.muli %40, %42 : vector<80x80xi32>
    %44 = arith.subi %14, %43 : vector<80x80xi32>
    %c20_i32_8 = arith.constant 20 : i32
    %45 = vector.broadcast %c20_i32_8 : i32 to vector<80x80xi32>
    %46 = arith.muli %27, %45 : vector<80x80xi32>
    %47 = arith.subi %13, %46 : vector<80x80xi32>
    %48 = arith.cmpi sle, %44, %47 : vector<80x80xi32>
    %49 = arith.andi %41, %48 : vector<80x80xi1>
    %c0_9 = arith.constant 0 : index
    %c0_10 = arith.constant 0 : index
    %50 = vector.load %arg7[%c0_9, %c0_10] : memref<17x256xf32, #tpu.memory_space<vmem>>, vector<8x256xf32>
    %51 = vector.extract_strided_slice %50 {offsets = [0, 0], sizes = [1, 192], strides = [1, 1]} : vector<8x256xf32> to vector<1x192xf32>
    %52 = vector.extract_strided_slice %50 {offsets = [1, 0], sizes = [1, 64], strides = [1, 1]} : vector<8x256xf32> to vector<1x64xf32>
    %53 = vector.extract_strided_slice %50 {offsets = [2, 0], sizes = [1, 256], strides = [1, 1]} : vector<8x256xf32> to vector<1x256xf32>
    %54 = vector.extract_strided_slice %50 {offsets = [3, 0], sizes = [1, 64], strides = [1, 1]} : vector<8x256xf32> to vector<1x64xf32>
    %55 = vector.extract_strided_slice %50 {offsets = [4, 0], sizes = [1, 64], strides = [1, 1]} : vector<8x256xf32> to vector<1x64xf32>
    %56 = vector.extract_strided_slice %50 {offsets = [5, 0], sizes = [1, 64], strides = [1, 1]} : vector<8x256xf32> to vector<1x64xf32>
    %57 = vector.extract_strided_slice %50 {offsets = [6, 0], sizes = [1, 64], strides = [1, 1]} : vector<8x256xf32> to vector<1x64xf32>
    %58 = vector.extract_strided_slice %50 {offsets = [7, 0], sizes = [1, 64], strides = [1, 1]} : vector<8x256xf32> to vector<1x64xf32>
    %c0_11 = arith.constant 0 : index
    %c0_12 = arith.constant 0 : index
    %c0_13 = arith.constant 0 : index
    %59 = vector.load %arg2[%c0_11, %c0_12, %c0_13] : memref<2x64x192xf32, #tpu.memory_space<vmem>>, vector<1x64x192xf32>
    %60 = vector.shape_cast %59 : vector<1x64x192xf32> to vector<64x192xf32>
    %cst_14 = arith.constant dense<0.000000e+00> : vector<20x192xf32>
    %61 = tpu.matmul %12, %60, %cst_14 {dimension_numbers = #tpu.dot_dimension_numbers<[1], [0], [0], [1], [0, 0, 1, 1], [], []>} : vector<20x64xf32>, vector<64x192xf32>, vector<20x192xf32> -> vector<20x192xf32>
    %62 = vector.broadcast %51 : vector<1x192xf32> to vector<20x192xf32>
    %63 = arith.addf %61, %62 : vector<20x192xf32>
    %64 = vector.extract_strided_slice %63 {offsets = [0, 0], sizes = [20, 16], strides = [1, 1]} : vector<20x192xf32> to vector<20x16xf32>
    %65 = vector.extract_strided_slice %63 {offsets = [0, 16], sizes = [20, 16], strides = [1, 1]} : vector<20x192xf32> to vector<20x16xf32>
    %66 = vector.extract_strided_slice %63 {offsets = [0, 32], sizes = [20, 16], strides = [1, 1]} : vector<20x192xf32> to vector<20x16xf32>
    %67 = vector.extract_strided_slice %63 {offsets = [0, 48], sizes = [20, 16], strides = [1, 1]} : vector<20x192xf32> to vector<20x16xf32>
    %68 = tpu.concatenate %64, %65, %66, %67 in 0 : vector<20x16xf32>, vector<20x16xf32>, vector<20x16xf32>, vector<20x16xf32> -> vector<80x16xf32>
    %69 = vector.extract_strided_slice %63 {offsets = [0, 64], sizes = [20, 16], strides = [1, 1]} : vector<20x192xf32> to vector<20x16xf32>
    %70 = vector.extract_strided_slice %63 {offsets = [0, 80], sizes = [20, 16], strides = [1, 1]} : vector<20x192xf32> to vector<20x16xf32>
    %71 = vector.extract_strided_slice %63 {offsets = [0, 96], sizes = [20, 16], strides = [1, 1]} : vector<20x192xf32> to vector<20x16xf32>
    %72 = vector.extract_strided_slice %63 {offsets = [0, 112], sizes = [20, 16], strides = [1, 1]} : vector<20x192xf32> to vector<20x16xf32>
    %73 = tpu.concatenate %69, %70, %71, %72 in 0 : vector<20x16xf32>, vector<20x16xf32>, vector<20x16xf32>, vector<20x16xf32> -> vector<80x16xf32>
    %74 = vector.extract_strided_slice %63 {offsets = [0, 128], sizes = [20, 16], strides = [1, 1]} : vector<20x192xf32> to vector<20x16xf32>
    %75 = vector.extract_strided_slice %63 {offsets = [0, 144], sizes = [20, 16], strides = [1, 1]} : vector<20x192xf32> to vector<20x16xf32>
    %76 = vector.extract_strided_slice %63 {offsets = [0, 160], sizes = [20, 16], strides = [1, 1]} : vector<20x192xf32> to vector<20x16xf32>
    %77 = vector.extract_strided_slice %63 {offsets = [0, 176], sizes = [20, 16], strides = [1, 1]} : vector<20x192xf32> to vector<20x16xf32>
    %78 = tpu.concatenate %74, %75, %76, %77 in 0 : vector<20x16xf32>, vector<20x16xf32>, vector<20x16xf32>, vector<20x16xf32> -> vector<80x16xf32>
    %cst_15 = arith.constant dense<0.000000e+00> : vector<80x80xf32>
    %79 = tpu.matmul %68, %73, %cst_15 {dimension_numbers = #tpu.dot_dimension_numbers<[1], [1], [0], [0], [0, 0, 1, 0], [], []>} : vector<80x16xf32>, vector<80x16xf32>, vector<80x80xf32> -> vector<80x80xf32>
    %cst_16 = arith.constant -1.000000e+30 : f32
    %80 = vector.broadcast %cst_16 : f32 to vector<80x80xf32>
    %81 = arith.select %49, %79, %80 : vector<80x80xi1>, vector<80x80xf32>
    %cst_17 = arith.constant dense<0xFF800000> : vector<80xf32>
    %82 = vector.multi_reduction <maximumf>, %81, %cst_17 [1] : vector<80x80xf32> to vector<80xf32>
    %83 = vector.shape_cast %82 : vector<80xf32> to vector<80x1xf32>
    %84 = vector.broadcast %83 : vector<80x1xf32> to vector<80x80xf32>
    %85 = arith.subf %81, %84 : vector<80x80xf32>
    %86 = math.exp %85 : vector<80x80xf32>
    %cst_18 = arith.constant dense<0.000000e+00> : vector<80xf32>
    %87 = vector.multi_reduction <add>, %86, %cst_18 [1] : vector<80x80xf32> to vector<80xf32>
    %88 = vector.shape_cast %87 : vector<80xf32> to vector<80x1xf32>
    %89 = tpu.reciprocal %88 {approx = true} : vector<80x1xf32> -> vector<80x1xf32>
    %90 = vector.broadcast %89 : vector<80x1xf32> to vector<80x80xf32>
    %91 = arith.mulf %86, %90 : vector<80x80xf32>
    %cst_19 = arith.constant dense<0.000000e+00> : vector<80x16xf32>
    %92 = tpu.matmul %91, %78, %cst_19 {dimension_numbers = #tpu.dot_dimension_numbers<[1], [0], [0], [1], [0, 0, 1, 1], [], []>} : vector<80x80xf32>, vector<80x16xf32>, vector<80x16xf32> -> vector<80x16xf32>
    %93 = vector.extract_strided_slice %92 {offsets = [0, 0], sizes = [20, 16], strides = [1, 1]} : vector<80x16xf32> to vector<20x16xf32>
    %94 = vector.extract_strided_slice %92 {offsets = [20, 0], sizes = [20, 16], strides = [1, 1]} : vector<80x16xf32> to vector<20x16xf32>
    %95 = vector.extract_strided_slice %92 {offsets = [40, 0], sizes = [20, 16], strides = [1, 1]} : vector<80x16xf32> to vector<20x16xf32>
    %96 = vector.extract_strided_slice %92 {offsets = [60, 0], sizes = [20, 16], strides = [1, 1]} : vector<80x16xf32> to vector<20x16xf32>
    %97 = tpu.concatenate %93, %94, %95, %96 in 1 : vector<20x16xf32>, vector<20x16xf32>, vector<20x16xf32>, vector<20x16xf32> -> vector<20x64xf32>
    %c0_20 = arith.constant 0 : index
    %c0_21 = arith.constant 0 : index
    %c0_22 = arith.constant 0 : index
    %98 = vector.load %arg3[%c0_20, %c0_21, %c0_22] : memref<2x64x64xf32, #tpu.memory_space<vmem>>, vector<1x64x64xf32>
    %99 = vector.shape_cast %98 : vector<1x64x64xf32> to vector<64x64xf32>
    %cst_23 = arith.constant dense<0.000000e+00> : vector<20x64xf32>
    %100 = tpu.matmul %97, %99, %cst_23 {dimension_numbers = #tpu.dot_dimension_numbers<[1], [0], [0], [1], [0, 0, 1, 1], [], []>} : vector<20x64xf32>, vector<64x64xf32>, vector<20x64xf32> -> vector<20x64xf32>
    %101 = vector.broadcast %52 : vector<1x64xf32> to vector<20x64xf32>
    %102 = arith.addf %100, %101 : vector<20x64xf32>
    %103 = arith.addf %12, %102 : vector<20x64xf32>
    %cst_24 = arith.constant dense<0.000000e+00> : vector<20xf32>
    %104 = vector.multi_reduction <add>, %103, %cst_24 [1] : vector<20x64xf32> to vector<20xf32>
    %105 = vector.shape_cast %104 : vector<20xf32> to vector<20x1xf32>
    %cst_25 = arith.constant 6.400000e+01 : f32
    %106 = vector.broadcast %cst_25 : f32 to vector<20x1xf32>
    %107 = arith.divf %105, %106 : vector<20x1xf32>
    %108 = vector.broadcast %107 : vector<20x1xf32> to vector<20x64xf32>
    %109 = arith.subf %103, %108 : vector<20x64xf32>
    %110 = arith.mulf %109, %109 : vector<20x64xf32>
    %cst_26 = arith.constant dense<0.000000e+00> : vector<20xf32>
    %111 = vector.multi_reduction <add>, %110, %cst_26 [1] : vector<20x64xf32> to vector<20xf32>
    %112 = vector.shape_cast %111 : vector<20xf32> to vector<20x1xf32>
    %cst_27 = arith.constant 6.400000e+01 : f32
    %113 = vector.broadcast %cst_27 : f32 to vector<20x1xf32>
    %114 = arith.divf %112, %113 : vector<20x1xf32>
    %115 = vector.broadcast %107 : vector<20x1xf32> to vector<20x64xf32>
    %116 = arith.subf %103, %115 : vector<20x64xf32>
    %cst_28 = arith.constant 9.99999974E-6 : f32
    %117 = vector.broadcast %cst_28 : f32 to vector<20x1xf32>
    %118 = arith.addf %114, %117 : vector<20x1xf32>
    %119 = math.rsqrt %118 : vector<20x1xf32>
    %120 = vector.broadcast %119 : vector<20x1xf32> to vector<20x64xf32>
    %121 = arith.mulf %116, %120 : vector<20x64xf32>
    %122 = vector.broadcast %55 : vector<1x64xf32> to vector<20x64xf32>
    %123 = arith.mulf %121, %122 : vector<20x64xf32>
    %124 = vector.broadcast %56 : vector<1x64xf32> to vector<20x64xf32>
    %125 = arith.addf %123, %124 : vector<20x64xf32>
    %c0_29 = arith.constant 0 : index
    %c0_30 = arith.constant 0 : index
    %c0_31 = arith.constant 0 : index
    %126 = vector.load %arg4[%c0_29, %c0_30, %c0_31] : memref<2x64x256xf32, #tpu.memory_space<vmem>>, vector<1x64x256xf32>
    %127 = vector.shape_cast %126 : vector<1x64x256xf32> to vector<64x256xf32>
    %cst_32 = arith.constant dense<0.000000e+00> : vector<20x256xf32>
    %128 = tpu.matmul %125, %127, %cst_32 {dimension_numbers = #tpu.dot_dimension_numbers<[1], [0], [0], [1], [0, 0, 1, 1], [], []>} : vector<20x64xf32>, vector<64x256xf32>, vector<20x256xf32> -> vector<20x256xf32>
    %129 = vector.broadcast %53 : vector<1x256xf32> to vector<20x256xf32>
    %130 = arith.addf %128, %129 : vector<20x256xf32>
    %cst_33 = arith.constant 0.000000e+00 : f32
    %131 = vector.broadcast %cst_33 : f32 to vector<20x256xf32>
    %132 = arith.maximumf %130, %131 : vector<20x256xf32>
    %c0_34 = arith.constant 0 : index
    %c0_35 = arith.constant 0 : index
    %c0_36 = arith.constant 0 : index
    %133 = vector.load %arg5[%c0_34, %c0_35, %c0_36] : memref<2x256x64xf32, #tpu.memory_space<vmem>>, vector<1x256x64xf32>
    %134 = vector.shape_cast %133 : vector<1x256x64xf32> to vector<256x64xf32>
    %cst_37 = arith.constant dense<0.000000e+00> : vector<20x64xf32>
    %135 = tpu.matmul %132, %134, %cst_37 {dimension_numbers = #tpu.dot_dimension_numbers<[1], [0], [0], [1], [0, 0, 1, 1], [], []>} : vector<20x256xf32>, vector<256x64xf32>, vector<20x64xf32> -> vector<20x64xf32>
    %136 = vector.broadcast %54 : vector<1x64xf32> to vector<20x64xf32>
    %137 = arith.addf %135, %136 : vector<20x64xf32>
    %138 = arith.addf %125, %137 : vector<20x64xf32>
    %cst_38 = arith.constant dense<0.000000e+00> : vector<20xf32>
    %139 = vector.multi_reduction <add>, %138, %cst_38 [1] : vector<20x64xf32> to vector<20xf32>
    %140 = vector.shape_cast %139 : vector<20xf32> to vector<20x1xf32>
    %cst_39 = arith.constant 6.400000e+01 : f32
    %141 = vector.broadcast %cst_39 : f32 to vector<20x1xf32>
    %142 = arith.divf %140, %141 : vector<20x1xf32>
    %143 = vector.broadcast %142 : vector<20x1xf32> to vector<20x64xf32>
    %144 = arith.subf %138, %143 : vector<20x64xf32>
    %145 = arith.mulf %144, %144 : vector<20x64xf32>
    %cst_40 = arith.constant dense<0.000000e+00> : vector<20xf32>
    %146 = vector.multi_reduction <add>, %145, %cst_40 [1] : vector<20x64xf32> to vector<20xf32>
    %147 = vector.shape_cast %146 : vector<20xf32> to vector<20x1xf32>
    %cst_41 = arith.constant 6.400000e+01 : f32
    %148 = vector.broadcast %cst_41 : f32 to vector<20x1xf32>
    %149 = arith.divf %147, %148 : vector<20x1xf32>
    %150 = vector.broadcast %142 : vector<20x1xf32> to vector<20x64xf32>
    %151 = arith.subf %138, %150 : vector<20x64xf32>
    %cst_42 = arith.constant 9.99999974E-6 : f32
    %152 = vector.broadcast %cst_42 : f32 to vector<20x1xf32>
    %153 = arith.addf %149, %152 : vector<20x1xf32>
    %154 = math.rsqrt %153 : vector<20x1xf32>
    %155 = vector.broadcast %154 : vector<20x1xf32> to vector<20x64xf32>
    %156 = arith.mulf %151, %155 : vector<20x64xf32>
    %157 = vector.broadcast %57 : vector<1x64xf32> to vector<20x64xf32>
    %158 = arith.mulf %156, %157 : vector<20x64xf32>
    %159 = vector.broadcast %58 : vector<1x64xf32> to vector<20x64xf32>
    %160 = arith.addf %158, %159 : vector<20x64xf32>
    %c8 = arith.constant 8 : index
    %c0_43 = arith.constant 0 : index
    %161 = vector.load %arg7[%c8, %c0_43] : memref<17x256xf32, #tpu.memory_space<vmem>>, vector<8x256xf32>
    %162 = vector.extract_strided_slice %161 {offsets = [0, 0], sizes = [1, 192], strides = [1, 1]} : vector<8x256xf32> to vector<1x192xf32>
    %163 = vector.extract_strided_slice %161 {offsets = [1, 0], sizes = [1, 64], strides = [1, 1]} : vector<8x256xf32> to vector<1x64xf32>
    %164 = vector.extract_strided_slice %161 {offsets = [2, 0], sizes = [1, 256], strides = [1, 1]} : vector<8x256xf32> to vector<1x256xf32>
    %165 = vector.extract_strided_slice %161 {offsets = [3, 0], sizes = [1, 64], strides = [1, 1]} : vector<8x256xf32> to vector<1x64xf32>
    %166 = vector.extract_strided_slice %161 {offsets = [4, 0], sizes = [1, 64], strides = [1, 1]} : vector<8x256xf32> to vector<1x64xf32>
    %167 = vector.extract_strided_slice %161 {offsets = [5, 0], sizes = [1, 64], strides = [1, 1]} : vector<8x256xf32> to vector<1x64xf32>
    %168 = vector.extract_strided_slice %161 {offsets = [6, 0], sizes = [1, 64], strides = [1, 1]} : vector<8x256xf32> to vector<1x64xf32>
    %169 = vector.extract_strided_slice %161 {offsets = [7, 0], sizes = [1, 64], strides = [1, 1]} : vector<8x256xf32> to vector<1x64xf32>
    %c1 = arith.constant 1 : index
    %c0_44 = arith.constant 0 : index
    %c0_45 = arith.constant 0 : index
    %170 = vector.load %arg2[%c1, %c0_44, %c0_45] : memref<2x64x192xf32, #tpu.memory_space<vmem>>, vector<1x64x192xf32>
    %171 = vector.shape_cast %170 : vector<1x64x192xf32> to vector<64x192xf32>
    %cst_46 = arith.constant dense<0.000000e+00> : vector<20x192xf32>
    %172 = tpu.matmul %160, %171, %cst_46 {dimension_numbers = #tpu.dot_dimension_numbers<[1], [0], [0], [1], [0, 0, 1, 1], [], []>} : vector<20x64xf32>, vector<64x192xf32>, vector<20x192xf32> -> vector<20x192xf32>
    %173 = vector.broadcast %162 : vector<1x192xf32> to vector<20x192xf32>
    %174 = arith.addf %172, %173 : vector<20x192xf32>
    %175 = vector.extract_strided_slice %174 {offsets = [0, 0], sizes = [20, 16], strides = [1, 1]} : vector<20x192xf32> to vector<20x16xf32>
    %176 = vector.extract_strided_slice %174 {offsets = [0, 16], sizes = [20, 16], strides = [1, 1]} : vector<20x192xf32> to vector<20x16xf32>
    %177 = vector.extract_strided_slice %174 {offsets = [0, 32], sizes = [20, 16], strides = [1, 1]} : vector<20x192xf32> to vector<20x16xf32>
    %178 = vector.extract_strided_slice %174 {offsets = [0, 48], sizes = [20, 16], strides = [1, 1]} : vector<20x192xf32> to vector<20x16xf32>
    %179 = tpu.concatenate %175, %176, %177, %178 in 0 : vector<20x16xf32>, vector<20x16xf32>, vector<20x16xf32>, vector<20x16xf32> -> vector<80x16xf32>
    %180 = vector.extract_strided_slice %174 {offsets = [0, 64], sizes = [20, 16], strides = [1, 1]} : vector<20x192xf32> to vector<20x16xf32>
    %181 = vector.extract_strided_slice %174 {offsets = [0, 80], sizes = [20, 16], strides = [1, 1]} : vector<20x192xf32> to vector<20x16xf32>
    %182 = vector.extract_strided_slice %174 {offsets = [0, 96], sizes = [20, 16], strides = [1, 1]} : vector<20x192xf32> to vector<20x16xf32>
    %183 = vector.extract_strided_slice %174 {offsets = [0, 112], sizes = [20, 16], strides = [1, 1]} : vector<20x192xf32> to vector<20x16xf32>
    %184 = tpu.concatenate %180, %181, %182, %183 in 0 : vector<20x16xf32>, vector<20x16xf32>, vector<20x16xf32>, vector<20x16xf32> -> vector<80x16xf32>
    %185 = vector.extract_strided_slice %174 {offsets = [0, 128], sizes = [20, 16], strides = [1, 1]} : vector<20x192xf32> to vector<20x16xf32>
    %186 = vector.extract_strided_slice %174 {offsets = [0, 144], sizes = [20, 16], strides = [1, 1]} : vector<20x192xf32> to vector<20x16xf32>
    %187 = vector.extract_strided_slice %174 {offsets = [0, 160], sizes = [20, 16], strides = [1, 1]} : vector<20x192xf32> to vector<20x16xf32>
    %188 = vector.extract_strided_slice %174 {offsets = [0, 176], sizes = [20, 16], strides = [1, 1]} : vector<20x192xf32> to vector<20x16xf32>
    %189 = tpu.concatenate %185, %186, %187, %188 in 0 : vector<20x16xf32>, vector<20x16xf32>, vector<20x16xf32>, vector<20x16xf32> -> vector<80x16xf32>
    %cst_47 = arith.constant dense<0.000000e+00> : vector<80x80xf32>
    %190 = tpu.matmul %179, %184, %cst_47 {dimension_numbers = #tpu.dot_dimension_numbers<[1], [1], [0], [0], [0, 0, 1, 0], [], []>} : vector<80x16xf32>, vector<80x16xf32>, vector<80x80xf32> -> vector<80x80xf32>
    %cst_48 = arith.constant -1.000000e+30 : f32
    %191 = vector.broadcast %cst_48 : f32 to vector<80x80xf32>
    %192 = arith.select %49, %190, %191 : vector<80x80xi1>, vector<80x80xf32>
    %cst_49 = arith.constant dense<0xFF800000> : vector<80xf32>
    %193 = vector.multi_reduction <maximumf>, %192, %cst_49 [1] : vector<80x80xf32> to vector<80xf32>
    %194 = vector.shape_cast %193 : vector<80xf32> to vector<80x1xf32>
    %195 = vector.broadcast %194 : vector<80x1xf32> to vector<80x80xf32>
    %196 = arith.subf %192, %195 : vector<80x80xf32>
    %197 = math.exp %196 : vector<80x80xf32>
    %cst_50 = arith.constant dense<0.000000e+00> : vector<80xf32>
    %198 = vector.multi_reduction <add>, %197, %cst_50 [1] : vector<80x80xf32> to vector<80xf32>
    %199 = vector.shape_cast %198 : vector<80xf32> to vector<80x1xf32>
    %200 = tpu.reciprocal %199 {approx = true} : vector<80x1xf32> -> vector<80x1xf32>
    %201 = vector.broadcast %200 : vector<80x1xf32> to vector<80x80xf32>
    %202 = arith.mulf %197, %201 : vector<80x80xf32>
    %cst_51 = arith.constant dense<0.000000e+00> : vector<80x16xf32>
    %203 = tpu.matmul %202, %189, %cst_51 {dimension_numbers = #tpu.dot_dimension_numbers<[1], [0], [0], [1], [0, 0, 1, 1], [], []>} : vector<80x80xf32>, vector<80x16xf32>, vector<80x16xf32> -> vector<80x16xf32>
    %204 = vector.extract_strided_slice %203 {offsets = [0, 0], sizes = [20, 16], strides = [1, 1]} : vector<80x16xf32> to vector<20x16xf32>
    %205 = vector.extract_strided_slice %203 {offsets = [20, 0], sizes = [20, 16], strides = [1, 1]} : vector<80x16xf32> to vector<20x16xf32>
    %206 = vector.extract_strided_slice %203 {offsets = [40, 0], sizes = [20, 16], strides = [1, 1]} : vector<80x16xf32> to vector<20x16xf32>
    %207 = vector.extract_strided_slice %203 {offsets = [60, 0], sizes = [20, 16], strides = [1, 1]} : vector<80x16xf32> to vector<20x16xf32>
    %208 = tpu.concatenate %204, %205, %206, %207 in 1 : vector<20x16xf32>, vector<20x16xf32>, vector<20x16xf32>, vector<20x16xf32> -> vector<20x64xf32>
    %c1_52 = arith.constant 1 : index
    %c0_53 = arith.constant 0 : index
    %c0_54 = arith.constant 0 : index
    %209 = vector.load %arg3[%c1_52, %c0_53, %c0_54] : memref<2x64x64xf32, #tpu.memory_space<vmem>>, vector<1x64x64xf32>
    %210 = vector.shape_cast %209 : vector<1x64x64xf32> to vector<64x64xf32>
    %cst_55 = arith.constant dense<0.000000e+00> : vector<20x64xf32>
    %211 = tpu.matmul %208, %210, %cst_55 {dimension_numbers = #tpu.dot_dimension_numbers<[1], [0], [0], [1], [0, 0, 1, 1], [], []>} : vector<20x64xf32>, vector<64x64xf32>, vector<20x64xf32> -> vector<20x64xf32>
    %212 = vector.broadcast %163 : vector<1x64xf32> to vector<20x64xf32>
    %213 = arith.addf %211, %212 : vector<20x64xf32>
    %214 = arith.addf %160, %213 : vector<20x64xf32>
    %cst_56 = arith.constant dense<0.000000e+00> : vector<20xf32>
    %215 = vector.multi_reduction <add>, %214, %cst_56 [1] : vector<20x64xf32> to vector<20xf32>
    %216 = vector.shape_cast %215 : vector<20xf32> to vector<20x1xf32>
    %cst_57 = arith.constant 6.400000e+01 : f32
    %217 = vector.broadcast %cst_57 : f32 to vector<20x1xf32>
    %218 = arith.divf %216, %217 : vector<20x1xf32>
    %219 = vector.broadcast %218 : vector<20x1xf32> to vector<20x64xf32>
    %220 = arith.subf %214, %219 : vector<20x64xf32>
    %221 = arith.mulf %220, %220 : vector<20x64xf32>
    %cst_58 = arith.constant dense<0.000000e+00> : vector<20xf32>
    %222 = vector.multi_reduction <add>, %221, %cst_58 [1] : vector<20x64xf32> to vector<20xf32>
    %223 = vector.shape_cast %222 : vector<20xf32> to vector<20x1xf32>
    %cst_59 = arith.constant 6.400000e+01 : f32
    %224 = vector.broadcast %cst_59 : f32 to vector<20x1xf32>
    %225 = arith.divf %223, %224 : vector<20x1xf32>
    %226 = vector.broadcast %218 : vector<20x1xf32> to vector<20x64xf32>
    %227 = arith.subf %214, %226 : vector<20x64xf32>
    %cst_60 = arith.constant 9.99999974E-6 : f32
    %228 = vector.broadcast %cst_60 : f32 to vector<20x1xf32>
    %229 = arith.addf %225, %228 : vector<20x1xf32>
    %230 = math.rsqrt %229 : vector<20x1xf32>
    %231 = vector.broadcast %230 : vector<20x1xf32> to vector<20x64xf32>
    %232 = arith.mulf %227, %231 : vector<20x64xf32>
    %233 = vector.broadcast %166 : vector<1x64xf32> to vector<20x64xf32>
    %234 = arith.mulf %232, %233 : vector<20x64xf32>
    %235 = vector.broadcast %167 : vector<1x64xf32> to vector<20x64xf32>
    %236 = arith.addf %234, %235 : vector<20x64xf32>
    %c1_61 = arith.constant 1 : index
    %c0_62 = arith.constant 0 : index
    %c0_63 = arith.constant 0 : index
    %237 = vector.load %arg4[%c1_61, %c0_62, %c0_63] : memref<2x64x256xf32, #tpu.memory_space<vmem>>, vector<1x64x256xf32>
    %238 = vector.shape_cast %237 : vector<1x64x256xf32> to vector<64x256xf32>
    %cst_64 = arith.constant dense<0.000000e+00> : vector<20x256xf32>
    %239 = tpu.matmul %236, %238, %cst_64 {dimension_numbers = #tpu.dot_dimension_numbers<[1], [0], [0], [1], [0, 0, 1, 1], [], []>} : vector<20x64xf32>, vector<64x256xf32>, vector<20x256xf32> -> vector<20x256xf32>
    %240 = vector.broadcast %164 : vector<1x256xf32> to vector<20x256xf32>
    %241 = arith.addf %239, %240 : vector<20x256xf32>
    %cst_65 = arith.constant 0.000000e+00 : f32
    %242 = vector.broadcast %cst_65 : f32 to vector<20x256xf32>
    %243 = arith.maximumf %241, %242 : vector<20x256xf32>
    %c1_66 = arith.constant 1 : index
    %c0_67 = arith.constant 0 : index
    %c0_68 = arith.constant 0 : index
    %244 = vector.load %arg5[%c1_66, %c0_67, %c0_68] : memref<2x256x64xf32, #tpu.memory_space<vmem>>, vector<1x256x64xf32>
    %245 = vector.shape_cast %244 : vector<1x256x64xf32> to vector<256x64xf32>
    %cst_69 = arith.constant dense<0.000000e+00> : vector<20x64xf32>
    %246 = tpu.matmul %243, %245, %cst_69 {dimension_numbers = #tpu.dot_dimension_numbers<[1], [0], [0], [1], [0, 0, 1, 1], [], []>} : vector<20x256xf32>, vector<256x64xf32>, vector<20x64xf32> -> vector<20x64xf32>
    %247 = vector.broadcast %165 : vector<1x64xf32> to vector<20x64xf32>
    %248 = arith.addf %246, %247 : vector<20x64xf32>
    %249 = arith.addf %236, %248 : vector<20x64xf32>
    %cst_70 = arith.constant dense<0.000000e+00> : vector<20xf32>
    %250 = vector.multi_reduction <add>, %249, %cst_70 [1] : vector<20x64xf32> to vector<20xf32>
    %251 = vector.shape_cast %250 : vector<20xf32> to vector<20x1xf32>
    %cst_71 = arith.constant 6.400000e+01 : f32
    %252 = vector.broadcast %cst_71 : f32 to vector<20x1xf32>
    %253 = arith.divf %251, %252 : vector<20x1xf32>
    %254 = vector.broadcast %253 : vector<20x1xf32> to vector<20x64xf32>
    %255 = arith.subf %249, %254 : vector<20x64xf32>
    %256 = arith.mulf %255, %255 : vector<20x64xf32>
    %cst_72 = arith.constant dense<0.000000e+00> : vector<20xf32>
    %257 = vector.multi_reduction <add>, %256, %cst_72 [1] : vector<20x64xf32> to vector<20xf32>
    %258 = vector.shape_cast %257 : vector<20xf32> to vector<20x1xf32>
    %cst_73 = arith.constant 6.400000e+01 : f32
    %259 = vector.broadcast %cst_73 : f32 to vector<20x1xf32>
    %260 = arith.divf %258, %259 : vector<20x1xf32>
    %261 = vector.broadcast %253 : vector<20x1xf32> to vector<20x64xf32>
    %262 = arith.subf %249, %261 : vector<20x64xf32>
    %cst_74 = arith.constant 9.99999974E-6 : f32
    %263 = vector.broadcast %cst_74 : f32 to vector<20x1xf32>
    %264 = arith.addf %260, %263 : vector<20x1xf32>
    %265 = math.rsqrt %264 : vector<20x1xf32>
    %266 = vector.broadcast %265 : vector<20x1xf32> to vector<20x64xf32>
    %267 = arith.mulf %262, %266 : vector<20x64xf32>
    %268 = vector.broadcast %168 : vector<1x64xf32> to vector<20x64xf32>
    %269 = arith.mulf %267, %268 : vector<20x64xf32>
    %270 = vector.broadcast %169 : vector<1x64xf32> to vector<20x64xf32>
    %271 = arith.addf %269, %270 : vector<20x64xf32>
    %c16 = arith.constant 16 : index
    %c0_75 = arith.constant 0 : index
    %272 = vector.load %arg7[%c16, %c0_75] : memref<17x256xf32, #tpu.memory_space<vmem>>, vector<1x128xf32>
    %c0_76 = arith.constant 0 : index
    %c0_77 = arith.constant 0 : index
    %273 = vector.load %arg6[%c0_76, %c0_77] : memref<64x128xf32, #tpu.memory_space<vmem>>, vector<64x128xf32>
    %cst_78 = arith.constant dense<0.000000e+00> : vector<20x128xf32>
    %274 = tpu.matmul %271, %273, %cst_78 {dimension_numbers = #tpu.dot_dimension_numbers<[1], [0], [0], [1], [0, 0, 1, 1], [], []>} : vector<20x64xf32>, vector<64x128xf32>, vector<20x128xf32> -> vector<20x128xf32>
    %275 = vector.broadcast %272 : vector<1x128xf32> to vector<20x128xf32>
    %276 = arith.addf %274, %275 : vector<20x128xf32>
    %cst_79 = arith.constant dense<0xFF800000> : vector<20xf32>
    %277 = vector.multi_reduction <maximumf>, %276, %cst_79 [1] : vector<20x128xf32> to vector<20xf32>
    %278 = vector.shape_cast %277 : vector<20xf32> to vector<20x1xf32>
    %279 = vector.broadcast %278 : vector<20x1xf32> to vector<20x128xf32>
    %280 = arith.subf %276, %279 : vector<20x128xf32>
    %281 = math.exp %280 : vector<20x128xf32>
    %cst_80 = arith.constant dense<0.000000e+00> : vector<20xf32>
    %282 = vector.multi_reduction <add>, %281, %cst_80 [1] : vector<20x128xf32> to vector<20xf32>
    %283 = vector.shape_cast %282 : vector<20xf32> to vector<20x1xf32>
    %284 = math.log %283 : vector<20x1xf32>
    %285 = arith.addf %284, %278 : vector<20x1xf32>
    %286 = vector.broadcast %285 : vector<20x1xf32> to vector<20x128xf32>
    %287 = arith.subf %276, %286 : vector<20x128xf32>
    %c0_81 = arith.constant 0 : index
    %c0_82 = arith.constant 0 : index
    %288 = vector.load %arg8[%c0_81, %c0_82] : memref<20x128xf32, #tpu.memory_space<vmem>>, vector<20x128xf32>
    tpu.vector_store %arg8[%c0_81, %c0_82], %287 {strides = array<i32>} : memref<20x128xf32, #tpu.memory_space<vmem>>, vector<20x128xf32>,
    return
  }
}

</mosaic_0001>

<bundles_post_ra>
// kernel: transformer_lm.1
= control target key start
LH: loop header
LB: loop body
LE: loop exit
PB: predicated region body
PF: predicated region fallthrough
CT: control target
= control target key end

     0   :  { %13 = vsyncpa [#allocation3], 0  ;;  %s3935_s0 = inlined_call_operand.vmem [shape: s32[20,1], index: 0, kind: input, shape index: {}]   ;;  %s3936_s1 = inlined_call_operand.vmem [shape: f32[52,64], index: 1, kind: input, shape index: {}]   ;;  %s3937_s2 = inlined_call_operand.vmem [shape: f32[2,64,192], index: 2, kind: input, shape index: {}]   ;;  %s3938_s3 = inlined_call_operand.vmem [shape: f32[2,64,64], index: 3, kind: input, shape index: {}]   ;;  %s3939_s4 = inlined_call_operand.vmem [shape: f32[2,64,256], index: 4, kind: input, shape index: {}]   ;;  %s3940_s5 = inlined_call_operand.vmem [shape: f32[2,256,64], index: 5, kind: input, shape index: {}]   ;;  %s3941_s6 = inlined_call_operand.vmem [shape: f32[64,128], index: 6, kind: input, shape index: {}]   ;;  %s3942_s7 = inlined_call_operand.hbm [shape: f32[17,256], index: 7, kind: input, shape index: {}]   ;;  %s3943_s8 = inlined_call_operand.hbm [shape: f32[20,128], index: 8, kind: output, shape index: {}]  }
   0x1   :  { %14 = vsyncpa [#allocation4], 0  ;;  %s33_s29 = sshll.u32 %s3942_s7, 4  ;;  %s2577_s30 = smov [#allocation2]   ;;  %s34_s29 = int_to_ptr.hbm [resolvable:$true] %s33_s29 }
   0x2   :  { %s35_s9 = sshll.u32 %s2577_s30, 4  ;;  %s2578_s10 = smov 256   ;;  %s36_s9 = int_to_ptr.vmem [resolvable:$true] %s35_s9 }
   0x3   :  { %s2579_s11 = smov 16  }
   0x4   :  { %41 = dma.hbm_to_vmem [thread:$0]  %s34_s29, 768, %s36_s9, [#allocation3], %s2578_s10, %s2578_s10, %s2579_s11  }
   0x5   :  { %2573 = dma.done.wait [#allocation3], 768  }
   0x6   :  { %2574 = vsyncadd [#allocation3], 4294966528  ;;  %v2580_v0 = vmov 0   ;;  %vm3947_vm0 = vcmask 1043456   ;;  %v52_v1 = vld [vmem:[%s3935_s0] sm:$0xff]  ;;  %v87_v4 = vld [vmem:[%s3936_s1 + $0x28] sm:$0xff]  ;;  %v46_v11 = vlaneseq }
   0x7   :  { %2372 = vset.pattern.permute.xlu0 %v2580_v0  ;;  %2373 = vset.pattern.permute.xlu1 %v2580_v0  ;;  %v54_v2 = vld [vmem:[%s3935_s0 + $0x10] sm:$0xf]  ;;  %v86_v5 = vld [vmem:[%s3936_s1 + $0x20] sm:$0xff]  ;;  %v85_v6 = vld [vmem:[%s3936_s1 + $0x18] sm:$0xff]  ;;  %vm89_vm3 = vcmask 424960   ;;  %v2581_v31 = vmov 0.0  }
   0x8   :  { %56 = vperm.xlu0 %2372, %v52_v1   ;;  %62 = vperm.xlu1 %2373, %v54_v2   ;;  %v88_v3 = vld [vmem:[%s3936_s1 + $0x30] sm:$0xf]  ;;  %v53_v7 = vld [vmem:[%s3935_s0 + $0x8] sm:$0xff]  ;;  %v82_v10 = vld [vmem:[%s3936_s1] sm:$0xff]  ;;  %v2692_v18 = vshrl.u32 %v46_v11, 7  ;;  %v2706_v23 = vand.u32 127, %v46_v11 }
   0x9   :  { %2150 = vmatpush.msk.msra.mxu0 %vm3947_vm0, %v88_v3  ;;  %v84_v8 = vld [vmem:[%s3936_s1 + $0x10] sm:$0xff]  ;;  %v83_v9 = vld [vmem:[%s3936_s1 + $0x8] sm:$0xff]  ;;  %v292_v13 = vld [vmem:[%s3937_s2 + $0x78] sm:$0xff]  ;;  %vm3944_vm11 = vcmask 523264   ;;  %s2582_s1 = smov 80   ;;  %s2583_s16 = smov 96  }
   0xa   :  { %v291_v12 = vld [vmem:[%s3937_s2 + $0x70] sm:$0xff]  ;;  %v289_v14 = vld [vmem:[%s3937_s2 + $0x60] sm:$0xff]  ;;  %339 = vmatpush.msra.mxu2 %v292_v13  ;;  %v290_v15 = vld [vmem:[%s3937_s2 + $0x68] sm:$0xff]  ;;  %v2709_v24 = vadd.s32 32, %v2692_v18  ;;  %v2726_v29 = vadd.s32 8, %v2692_v18  ;;  %v2731_v34 = vadd.s32 16, %v2692_v18 }
   0xb   :  { %113 = vmatpush.msra.mxu0 %v87_v4  ;;  %313 = vmatpush.msra.mxu1 %v291_v12  ;;  %v287_v16 = vld [vmem:[%s3937_s2 + $0x50] sm:$0xff]  ;;  %v288_v17 = vld [vmem:[%s3937_s2 + $0x58] sm:$0xff]  ;;  %v285_v19 = vld [vmem:[%s3937_s2 + $0x40] sm:$0xff]  ;;  %s2584_s17 = smov 112   ;;  %s2585_s18 = smov 64   ;;  %vm3945_vm12 = vcmask 130048  }
   0xc   :  { %340 = vmatpush.msra.mxu2 %v290_v15  ;;  %v286_v20 = vld [vmem:[%s3937_s2 + $0x48] sm:$0xff]  ;;  %v283_v21 = vld [vmem:[%s3937_s2 + $0x30] sm:$0xff]  ;;  %v284_v22 = vld [vmem:[%s3937_s2 + $0x38] sm:$0xff]  ;;  %vm70_vm1 = vcmp.eq.s32.totalorder %v2706_v23, %v2709_v24  ;;  %v68_v33 = vadd.s32 32, %v2726_v29  ;;  %v69_v35 = vadd.s32 32, %v2731_v34  ;;  %vm215_vm13 = vcmp.ge.s32.totalorder %v2706_v23, 20 }
   0xd   :  { %114 = vmatpush.msra.mxu0 %v86_v5  ;;  %314 = vmatpush.msra.mxu1 %v289_v14  ;;  %v281_v25 = vld [vmem:[%s3937_s2 + $0x20] sm:$0xff]  ;;  %v282_v26 = vld [vmem:[%s3937_s2 + $0x28] sm:$0xff]  ;;  %v279_v27 = vld [vmem:[%s3937_s2 + $0x10] sm:$0xff]  ;;  %vm217_vm14 = vcmp.ge.s32.totalorder %v2706_v23, 40  ;;  %vm220_vm15 = vcmp.ge.s32.totalorder %v2706_v23, 60  ;;  %s2586_s19 = smov 32  }
   0xe   :  { %341 = vmatpush.msra.mxu2 %v288_v17  ;;  %v280_v28 = vld [vmem:[%s3937_s2 + $0x18] sm:$0xff]  ;;  %vm71_vm5 = vcmp.eq.s32.totalorder %v2706_v23, %v68_v33  ;;  %vm72_vm8 = vcmp.eq.s32.totalorder %v2706_v23, %v69_v35  ;;  %v277_v40 = vld [vmem:[%s3937_s2] sm:$0xff]  ;;  %v278_v41 = vld [vmem:[%s3937_s2 + $0x8] sm:$0xff]  ;;  %v216_v35 = vsel %vm215_vm13, 1, %v2580_v0  ;;  %s2587_s20 = smov 48   ;;  %s2134_s0 = sshll.u32 %s3943_s8, 4  ;;  %s2135_s0 = int_to_ptr.hbm [resolvable:$true] %s2134_s0 }
   0xf   :  { %115 = vmatpush.msra.mxu0 %v85_v6  ;;  %315 = vmatpush.msra.mxu1 %v287_v16  ;;  %v2765_v45 = vld [vmem:[#allocation2] sm:$0xff]  ;;  %v276_v55 = vld [vmem:[#allocation2 + $0x8] sm:$0xff]  ;;  %s2590_s9 = smov 128   ;;  %s2591_s10 = smov 8  }
  0x10   :  { %59 = vperm.xlu0 %2372, %v53_v7   ;;  %342 = vmatpush.msra.mxu2 %v286_v20  ;;  %v293_v46 = vperm.slane %v2765_v45, 0  ;;  %v294_v58 = vperm.slane %v276_v55, 0 }
  0x11   :  { %116 = vmatpush.msra.mxu0 %v84_v8  ;;  %316 = vmatpush.msra.mxu1 %v285_v19 }
  0x12   :  { %343 = vmatpush.msra.mxu2 %v284_v22 }
  0x13   :  { %117 = vmatpush.msra.mxu0 %v83_v9  ;;  %317 = vmatpush.msra.mxu1 %v283_v21 }
  0x14   :  { %344 = vmatpush.msra.mxu2 %v282_v26 }
  0x15   :  { %118 = vmatpush.msra.mxu0 %v82_v10  ;;  %318 = vmatpush.msra.mxu1 %v281_v25 }
  0x16   :  { %345 = vmatpush.msra.mxu2 %v280_v28 }
  0x17   :  { %319 = vmatpush.msra.mxu1 %v279_v27 }
  0x18   :  { %346 = vmatpush.msra.mxu2 %v278_v41 }
  0x19   :  { %320 = vmatpush.msra.mxu1 %v277_v40 }
  0x7a   :  { %v57_v30 = vpop.permute.xlu0 %56  ;;  %v63_v37 = vpop.permute.xlu1 %62 }
  0x7b   :  { %vm64_vm2 = vcmp.eq.s32.totalorder %v2706_v23, %v57_v30  ;;  %vm66_vm9 = vcmp.eq.s32.totalorder %v2706_v23, %v63_v37 }
  0x7c   :  { %vm73_vm4 = vmor %vm64_vm2, %vm70_vm1 }
  0x7d   :  { %v2147_v32 = vsel %vm73_vm4, 1.0, %v2581_v31  ;;  %vm75_vm10 = vmor %vm66_vm9, %vm72_vm8 }
  0x7e   :  { %2151 = vmatmul.msk.f32.vlgmr.msra.gmra.mxu0 %vm89_vm3, %v2147_v32  ;;  %v2149_v39 = vsel %vm75_vm10, 1.0, %v2581_v31 }
  0x82   :  { %v60_v36 = vpop.permute.xlu0 %59 }
  0x83   :  { %vm65_vm6 = vcmp.eq.s32.totalorder %v2706_v23, %v60_v36  ;;  %v218_v36 = vsel %vm217_vm14, 1, %v2580_v0 }
  0x84   :  { %vm74_vm7 = vmor %vm65_vm6, %vm71_vm5  ;;  %v219_v37 = vadd.s32 %v218_v36, %v216_v35  ;;  %vm3946_vm5 = vcmask 654336  }
  0x85   :  { %v2148_v38 = vsel %vm74_vm7, 1.0, %v2581_v31 }
  0x86   :  { %2152 = vmatmul.msk.f32.gmra.mxu0 %vm89_vm3, %v2148_v38  ;;  %v221_v38 = vsel %vm220_vm15, 1, %v2580_v0 }
  0x8e   :  { %2153 = vmatmul.msk.f32.gmra.mxu0 %vm89_vm3, %v2149_v39  ;;  %v2845_v39 = vadd.s32 %v221_v38, %v219_v37  ;;  %vm137_vm3 = vcmp.ge.s32.totalorder %v2731_v34, 20  ;;  %v133_v37 = vadd.s32 64, %v2692_v18 }
  0x90   :  { %v233_v40 = vmul.u32 20, %v2845_v39  ;;  %vm2154_vm1 = vcmp.eq.s32.totalorder %v2845_v39, 0  ;;  %vm2156_vm13 = vcmp.eq.s32.totalorder %v2845_v39, 1 }
  0x92   :  { %v2849_v41 = vsub.s32 %v2706_v23, %v233_v40  ;;  %v2166_v40 = vadd.s32 4294967236, %v133_v37 }
  0x94   :  { %vm255_vm2 = vcmp.le.s32.totalorder %v2849_v41, %v2692_v18  ;;  %vm256_vm6 = vcmp.le.s32.totalorder %v2849_v41, %v2726_v29  ;;  %v129_v29 = vadd.s32 24, %v2692_v18 }
  0x95   :  { %vm2855_vm4 = vmand %vm2154_vm1, %vm255_vm2 }
  0x96   :  { %vm2865_vm7 = vmand %vm2154_vm1, %vm256_vm6  ;;  %vm2158_vm1 = vcmp.eq.s32.totalorder %v2845_v39, 2 }
  0xfb   :  { %v2747_v42 = vpop.f32.mrf.mxu0 }
  0xfc   :  { %2168 = vmatmul.msk.f32.vlgmr.msra.gmra.mxu1 %vm3944_vm11, %v2747_v42  ;;  %2171 = vmatmul.msk.f32.vlgmr.msra.gmra.mxu2 %vm3944_vm11, %v2747_v42 }
 0x103   :  { %v2753_v43 = vpop.f32.mrf.mxu0 }
 0x104   :  { %2169 = vmatmul.msk.f32.gmra.mxu1 %vm3944_vm11, %v2753_v43  ;;  %2172 = vmatmul.msk.f32.gmra.mxu2 %vm3944_vm11, %v2753_v43 }
 0x10b   :  { %v2759_v44 = vpop.f32.mrf.mxu0 }
 0x10c   :  { %2170 = vmatmul.msk.f32.gmra.mxu1 %vm3944_vm11, %v2759_v44  ;;  %2173 = vmatmul.msk.f32.gmra.mxu2 %vm3944_vm11, %v2759_v44 }
 0x179   :  { %v322_v47 = vpop.f32.mrf.mxu1 }
 0x17a   :  { %v2768_v48 = vadd.f32 %v322_v47, %v293_v46 }
 0x17c   :  { %v360_v49 = vrot.slane %v2768_v48, 4 }
 0x17e   :  { %379 = vrot.lane.b32.xlu0 %v360_v49, %s2582_s1 }
 0x17f   :  { %v348_v50 = vpop.f32.mrf.mxu2 }
 0x180   :  { %v2779_v62 = vadd.f32 %v348_v50, %v294_v58 }
 0x181   :  { %v325_v51 = vpop.f32.mrf.mxu1 }
 0x182   :  { %v2772_v52 = vadd.f32 %v325_v51, %v293_v46  ;;  %v2789_v4 = vrot.slane %v2779_v62, 4 }
 0x184   :  { %v361_v53 = vrot.slane %v2772_v52, 4 }
 0x186   :  { %v362_v54 = vsel %vm3947_vm0, %v360_v49, %v361_v53 }
 0x187   :  { %v351_v56 = vpop.f32.mrf.mxu2  ;;  %381 = vrot.lane.b32.xlu2 %v362_v54, %s2582_s1 }
 0x188   :  { %v2777_v60 = vadd.f32 %v351_v56, %v294_v58 }
 0x189   :  { %v328_v57 = vpop.f32.mrf.mxu1 }
 0x18a   :  { %v329_v59 = vadd.f32 %v328_v57, %v293_v46  ;;  %v392_v2 = vrot.slane %v2777_v60, 4  ;;  %v2162_v57 = vadd.s32 4294967276, %v129_v29  ;;  %v3483_v46 = vld [vmem:[#allocation2 + $0x18] sm:$0xff] }
 0x18c   :  { %v363_v61 = vrot.slane %v329_v59, 4  ;;  %v393_v6 = vsel %vm3947_vm0, %v2789_v4, %v392_v2  ;;  %vm258_vm14 = vcmp.le.s32.totalorder %v2849_v41, %v2162_v57 }
 0x18d   :  { %vm2890_vm15 = vmand %vm2156_vm13, %vm258_vm14 }
 0x18e   :  { %v364_v63 = vsel %vm3947_vm0, %v361_v53, %v363_v61 }
 0x18f   :  { %v354_v1 = vpop.f32.mrf.mxu2  ;;  %376 = vrot.lane.b32.xlu2 %v329_v59, %s2583_s16  ;;  %369 = vrot.lane.b32.xlu0 %v364_v63, %s2584_s17 }
 0x190   :  { %v2785_v3 = vadd.f32 %v354_v1, %v294_v58  ;;  %383 = vrot.lane.b32.xlu1 %v364_v63, %s2582_s1 }
 0x192   :  { %v394_v5 = vrot.slane %v2785_v3, 4 }
 0x194   :  { %v395_v7 = vsel %vm3947_vm0, %v392_v2, %v394_v5  ;;  %v2379_v5 = vpack.i.bf16 %v2777_v60, %v2785_v3 }
 0x195   :  { %v2795_v8 = vpack.i.bf16 %v393_v6, %v395_v7  ;;  %v130_v6 = vadd.s32 40, %v2692_v18 }
 0x197   :  { %372 = vrot.lane.b32.xlu2 %v2768_v48, %s2583_s16  ;;  %v2164_v7 = vadd.s32 4294967256, %v130_v6 }
 0x198   :  { %374 = vrot.lane.b32.xlu1 %v2772_v52, %s2583_s16 }
 0x199   :  { %vm260_vm2 = vcmp.le.s32.totalorder %v2849_v41, %v2164_v7 }
 0x19f   :  { %365 = vrot.lane.b32.xlu2 %v360_v49, %s2584_s17 }
 0x1a0   :  { %367 = vrot.lane.b32.xlu1 %v362_v54, %s2584_s17 }
 0x1e1   :  { %v382_v9 = vpop.permute.xlu2 %381 }
 0x1e2   :  { %443 = vrot.lane.b32.xlu1 %v382_v9, %s2585_s18 }
 0x1e9   :  { %v377_v10 = vpop.permute.xlu2 %376 }
 0x1f0   :  { %v380_v11 = vpop.permute.xlu0 %379 }
 0x1f1   :  { %v373_v12 = vpop.permute.xlu2 %372  ;;  %v387_v13 = vsel %vm3947_vm0, %v377_v10, %v380_v11 }
 0x1f2   :  { %437 = vrot.lane.b32.xlu1 %v373_v12, %s2585_s18  ;;  %441 = vrot.lane.b32.xlu2 %v387_v13, %s2585_s18 }
 0x1f9   :  { %v366_v14 = vpop.permute.xlu2 %365 }
 0x1fa   :  { %v386_v15 = vsel %vm3947_vm0, %v329_v59, %v366_v14  ;;  %v2163_v14 = vadd.s32 4294967276, %v2709_v24 }
 0x1fb   :  { %431 = vrot.lane.b32.xlu1 %v386_v15, %s2585_s18 }
 0x1fc   :  { %vm259_vm6 = vcmp.le.s32.totalorder %v2849_v41, %v2163_v14 }
 0x201   :  { %v370_v16 = vpop.permute.xlu0 %369 }
 0x202   :  { %v384_v17 = vpop.permute.xlu1 %383  ;;  %435 = vrot.lane.b32.xlu2 %v370_v16, %s2585_s18 }
 0x203   :  { %445 = vrot.lane.b32.xlu0 %v384_v17, %s2585_s18 }
 0x20a   :  { %v375_v19 = vpop.permute.xlu1 %374  ;;  %429 = vrot.lane.b32.xlu2 %v2772_v52, %s2585_s18 }
 0x20b   :  { %439 = vrot.lane.b32.xlu0 %v375_v19, %s2585_s18 }
 0x212   :  { %v368_v20 = vpop.permute.xlu1 %367 }
 0x213   :  { %433 = vrot.lane.b32.xlu0 %v368_v20, %s2585_s18 }
 0x21b   :  { %427 = vrot.lane.b32.xlu0 %v2768_v48, %s2585_s18 }
 0x24c   :  { %v442_v25 = vpop.permute.xlu2 %441 }
 0x254   :  { %v444_v22 = vpop.permute.xlu1 %443 }
 0x25c   :  { %v436_v28 = vpop.permute.xlu2 %435 }
 0x264   :  { %v438_v27 = vpop.permute.xlu1 %437  ;;  %v430_v32 = vpop.permute.xlu2 %429 }
 0x26d   :  { %v432_v31 = vpop.permute.xlu1 %431 }
 0x275   :  { %v446_v21 = vpop.permute.xlu0 %445 }
 0x276   :  { %2174 = vmatpush.xpose.msk.msra.mxu3 %vm3945_vm12, %v446_v21 }
 0x27a   :  { %2175 = vmatpush.xpose.msk.msra.mxu3 %vm3945_vm12, %v444_v22 }
 0x27d   :  { %v440_v26 = vpop.permute.xlu0 %439 }
 0x27e   :  { %2176 = vmatpush.xpose.msk.msra.mxu3 %vm3945_vm12, %v442_v25 }
 0x282   :  { %2177 = vmatpush.xpose.msk.msra.mxu3 %vm3945_vm12, %v440_v26 }
 0x285   :  { %v434_v30 = vpop.permute.xlu0 %433 }
 0x286   :  { %2178 = vmatpush.xpose.msk.msra.mxu3 %vm3945_vm12, %v438_v27 }
 0x28a   :  { %2179 = vmatpush.xpose.msk.msra.mxu3 %vm3945_vm12, %v436_v28  ;;  %v132_v28 = vadd.s32 56, %v2692_v18 }
 0x28c   :  { %vm192_vm14 = vcmp.ge.s32.totalorder %v132_v28, 60 }
 0x28d   :  { %v428_v33 = vpop.permute.xlu0 %427 }
 0x28e   :  { %2180 = vmatpush.xpose.msk.msra.mxu3 %vm3945_vm12, %v434_v30 }
 0x292   :  { %2181 = vmatpush.xpose.msk.msra.mxu3 %vm3945_vm12, %v432_v31 }
 0x296   :  { %2182 = vmatpush.xpose.msk.msra.mxu3 %vm3945_vm12, %v430_v32 }
 0x29a   :  { %2183 = vmatpush.xpose.msk.msra.mxu3 %vm3945_vm12, %v428_v33  ;;  %v202_v33 = vsel %vm192_vm14, 1, %v2580_v0 }
 0x29b   :  { %v212_v38 = vadd.s32 2, %v202_v33 }
 0x29d   :  { %2184 = vmatmul.msk.f32.vlgmr.msra.gmra.mxu3 %vm3945_vm12, %v2768_v48  ;;  %v147_v48 = vsel %vm137_vm3, 1, %v2580_v0  ;;  %vm2908_vm3 = vmand %vm2158_vm1, %vm260_vm2  ;;  %vm263_vm2 = vcmp.le.s32.totalorder %v2849_v41, %v2166_v40  ;;  %v134_v0 = vadd.s32 72, %v2692_v18 }
 0x29e   :  { %v237_v50 = vmul.u32 20, %v147_v48  ;;  %vm225_vm8 = vcmp.eq.s32.totalorder %v147_v48, %v2845_v39  ;;  %v242_v48 = vmul.u32 20, %v212_v38 }
 0x29f   :  { %v2167_v29 = vadd.s32 4294967236, %v134_v0 }
 0x2a1   :  { %vm264_vm11 = vcmp.le.s32.totalorder %v2849_v41, %v2167_v29 }
 0x2a5   :  { %2185 = vmatmul.msk.f32.gmra.mxu3 %vm3945_vm12, %v2772_v52  ;;  %v247_v52 = vsub.s32 %v2731_v34, %v237_v50 }
 0x2a7   :  { %vm257_vm9 = vcmp.le.s32.totalorder %v2849_v41, %v247_v52 }
 0x2a8   :  { %vm2876_vm10 = vmand %vm225_vm8, %vm257_vm9 }
 0x2a9   :  { %vm2924_vm8 = vmand %vm2156_vm13, %vm259_vm6 }
 0x2ad   :  { %2186 = vmatmul.msk.f32.gmra.mxu3 %vm3945_vm12, %v386_v15  ;;  %v3966_v15 = vmov 0 }
 0x2ae   :  { %v3967_v15 = vsel %vm2924_vm8, 4294967295, %v3966_v15 }
 0x2b5   :  { %2187 = vmatmul.msk.f32.gmra.mxu3 %vm3945_vm12, %v368_v20  ;;  %v3968_v20 = vmov 0 }
 0x2bd   :  { %2188 = vmatmul.msk.f32.gmra.mxu3 %vm3945_vm12, %v370_v16  ;;  %v131_v16 = vadd.s32 48, %v2692_v18 }
 0x2c5   :  { %2189 = vmatmul.msk.f32.gmra.mxu3 %vm3945_vm12, %v373_v12 }
 0x2cd   :  { %2190 = vmatmul.msk.f32.gmra.mxu3 %vm3945_vm12, %v375_v19  ;;  %v2165_v19 = vadd.s32 4294967256, %v131_v16 }
 0x2cf   :  { %vm261_vm9 = vcmp.le.s32.totalorder %v2849_v41, %v2165_v19 }
 0x2d0   :  { %vm2940_vm13 = vmand %vm2158_vm1, %vm261_vm9  ;;  %vm2160_vm1 = vcmp.eq.s32.totalorder %v2845_v39, 3  ;;  %vm230_vm9 = vcmp.eq.s32.totalorder %v212_v38, %v2845_v39 }
 0x2d1   :  { %v3969_v20 = vsel %vm2940_vm13, 4294967295, %v3968_v20  ;;  %vm2973_vm6 = vmand %vm2160_vm1, %vm263_vm2 }
 0x2d5   :  { %2191 = vmatmul.msk.f32.gmra.mxu3 %vm3945_vm12, %v387_v13 }
 0x2dd   :  { %2192 = vmatmul.msk.f32.gmra.mxu3 %vm3945_vm12, %v382_v9 }
 0x2e5   :  { %2193 = vmatmul.msk.f32.gmra.mxu3 %vm3945_vm12, %v384_v17  ;;  %vm2997_vm12 = vmand %vm2160_vm1, %vm264_vm11  ;;  %vm3949_vm11 = vcmask 261120   ;;  %vm3948_vm1 = vcmask 392192  }
 0x320   :  { %v505_v47 = vpop.f32.mrf.mxu3 }
 0x321   :  { %v535_v49 = vsel %vm2855_vm4, %v505_v47, -1e+30 }
 0x322   :  { %v546_v23 = vsel %vm3946_vm5, %v535_v49, -inf }
 0x323   :  { %547 = vmax.xlane.f32.xlu1 %v546_v23 }
 0x328   :  { %v508_v53 = vpop.f32.mrf.mxu3 }
 0x329   :  { %v536_v54 = vsel %vm2865_vm7, %v508_v53, -1e+30 }
 0x32a   :  { %v549_v55 = vsel %vm3946_vm5, %v536_v54, -inf }
 0x32b   :  { %550 = vmax.xlane.f32.xlu2 %v549_v55  ;;  %v3970_v55 = vmov 0 }
 0x32c   :  { %v3971_v55 = vsel %vm2973_vm6, 4294967295, %v3970_v55 }
 0x330   :  { %v511_v58 = vpop.f32.mrf.mxu3 }
 0x331   :  { %v2882_v34 = vsel %vm2876_vm10, %v511_v58, -1e+30 }
 0x332   :  { %v552_v59 = vsel %vm3946_vm5, %v2882_v34, -inf }
 0x333   :  { %553 = vmax.xlane.f32.xlu0 %v552_v59 }
 0x338   :  { %v514_v63 = vpop.f32.mrf.mxu3 }
 0x339   :  { %v2896_v1 = vsel %vm2890_vm15, %v514_v63, -1e+30  ;;  %v3972_v63 = vmov 0 }
 0x33a   :  { %v555_v2 = vsel %vm3946_vm5, %v2896_v1, -inf }
 0x33b   :  { %556 = vmax.xlane.f32.xlu2 %v555_v2 }
 0x33c   :  { %2380 = vrot.lane.b32.xlu1 %v2379_v5, %s2583_s16 }
 0x340   :  { %v517_v9 = vpop.f32.mrf.mxu3 }
 0x341   :  { %v2931_v17 = vsel %vm2924_vm8, %v517_v9, -1e+30 }
 0x342   :  { %v558_v24 = vsel %vm3946_vm5, %v2931_v17, -inf }
 0x347   :  { %2375 = vrot.lane.b32.xlu0 %v2795_v8, %s2582_s1 }
 0x348   :  { %v520_v11 = vpop.f32.mrf.mxu3 }
 0x349   :  { %v2916_v12 = vsel %vm2908_vm3, %v520_v11, -1e+30 }
 0x34a   :  { %v561_v13 = vsel %vm3946_vm5, %v2916_v12, -inf }
 0x34b   :  { %562 = vmax.xlane.f32.xlu2 %v561_v13 }
 0x350   :  { %v523_v21 = vpop.f32.mrf.mxu3 }
 0x351   :  { %v2946_v22 = vsel %vm2940_vm13, %v523_v21, -1e+30 }
 0x352   :  { %v564_v25 = vsel %vm3946_vm5, %v2946_v22, -inf }
 0x358   :  { %v526_v35 = vpop.f32.mrf.mxu3 }
 0x360   :  { %v529_v52 = vpop.f32.mrf.mxu3 }
 0x361   :  { %v2981_v18 = vsel %vm2973_vm6, %v529_v52, -1e+30 }
 0x362   :  { %v570_v5 = vsel %vm3946_vm5, %v2981_v18, -inf }
 0x363   :  { %414 = vrot.lane.b32.xlu2 %v2789_v4, %s2582_s1 }
 0x366   :  { %559 = vmax.xlane.f32.xlu1 %v558_v24 }
 0x371   :  { %565 = vmax.xlane.f32.xlu0 %v564_v25 }
 0x37f   :  { %405 = vrot.lane.b32.xlu1 %v2779_v62, %s2583_s16 }
 0x387   :  { %2385 = vrot.lane.b32.xlu1 %v2795_v8, %s2584_s17 }
 0x38f   :  { %396 = vrot.lane.b32.xlu1 %v2789_v4, %s2584_s17 }
 0x396   :  { %v548_v26 = vpop.xlane.xlu1 %547 }
 0x397   :  { %v576_v27 = vsub.f32 %v535_v49, %v548_v26 }
 0x399   :  { %v586_v30 = vmul.f32 1.442695, %v576_v27 }
 0x39b   :  { %2404 = vpow2.f32 %v586_v30 }
 0x39e   :  { %v551_v31 = vpop.xlane.xlu2 %550 }
 0x39f   :  { %v577_v32 = vsub.f32 %v536_v54, %v551_v31  ;;  %v252_v54 = vsub.s32 %v132_v28, %v242_v48 }
 0x3a1   :  { %v2958_v36 = vpop.eup %2404  ;;  %v588_v8 = vmul.f32 1.442695, %v577_v32  ;;  %vm262_vm14 = vcmp.le.s32.totalorder %v2849_v41, %v252_v54  ;;  %v532_v41 = vpop.f32.mrf.mxu3 }
 0x3a2   :  { %v606_v4 = vsel %vm3946_vm5, %v2958_v36, 0.0  ;;  %vm2987_vm2 = vmand %vm230_vm9, %vm262_vm14  ;;  %v3007_v7 = vsel %vm2997_vm12, %v532_v41, -1e+30  ;;  %vm3976_vm9 = vcmask 130048   ;;  %vm3977_vm14 = vcmask 523264  }
 0x3a3   :  { %2406 = vpow2.f32 %v588_v8  ;;  %607 = vadd.xlane.f32.xlu2 %v606_v4  ;;  %v3973_v63 = vsel %vm2987_vm2, 4294967295, %v3972_v63  ;;  %v3003_v6 = vsel %vm2987_vm2, %v526_v35, -1e+30  ;;  %v573_v14 = vsel %vm3946_vm5, %v3007_v7, -inf }
 0x3a4   :  { %v567_v9 = vsel %vm3946_vm5, %v3003_v6, -inf }
 0x3a6   :  { %v554_v47 = vpop.xlane.xlu0 %553 }
 0x3a7   :  { %v578_v49 = vsub.f32 %v2882_v34, %v554_v47 }
 0x3a9   :  { %v2964_v23 = vpop.eup %2406  ;;  %v590_v50 = vmul.f32 1.442695, %v578_v49 }
 0x3aa   :  { %v609_v53 = vsel %vm3946_vm5, %v2964_v23, 0.0 }
 0x3ab   :  { %2408 = vpow2.f32 %v590_v50  ;;  %610 = vadd.xlane.f32.xlu0 %v609_v53 }
 0x3ae   :  { %v557_v57 = vpop.xlane.xlu2 %556  ;;  %v2381_v26 = vpop.permute.xlu1 %2380 }
 0x3af   :  { %v579_v58 = vsub.f32 %v2896_v1, %v557_v57  ;;  %v3974_v1 = vmov 0  ;;  %v2382_v27 = vunpack.i.l.bf16 %v2381_v26  ;;  %v2383_v31 = vunpack.i.h.bf16 %v2381_v26 }
 0x3b0   :  { %v3975_v1 = vsel %vm2997_vm12, 4294967295, %v3974_v1 }
 0x3b1   :  { %v2984_v34 = vpop.eup %2408  ;;  %v592_v59 = vmul.f32 1.442695, %v579_v58 }
 0x3b2   :  { %v612_v2 = vsel %vm3946_vm5, %v2984_v34, 0.0 }
 0x3b3   :  { %2410 = vpow2.f32 %v592_v59  ;;  %613 = vadd.xlane.f32.xlu2 %v612_v2  ;;  %571 = vmax.xlane.f32.xlu0 %v570_v5 }
 0x3b9   :  { %v3011_v11 = vpop.eup %2410  ;;  %v2376_v13 = vpop.permute.xlu0 %2375  ;;  %568 = vmax.xlane.f32.xlu1 %v567_v9 }
 0x3ba   :  { %v615_v39 = vsel %vm3946_vm5, %v3011_v11, 0.0  ;;  %v2377_v16 = vunpack.i.l.bf16 %v2376_v13  ;;  %v2378_v19 = vunpack.i.h.bf16 %v2376_v13 }
 0x3bb   :  { %616 = vadd.xlane.f32.xlu2 %v615_v39  ;;  %574 = vmax.xlane.f32.xlu0 %v573_v14 }
 0x3bc   :  { %692 = vmatpush.msrb.mxu0 %v2377_v16 }
 0x3be   :  { %693 = vmatpush.msrb.mxu0 %v2378_v19  ;;  %v563_v24 = vpop.xlane.xlu2 %562 }
 0x3bf   :  { %v581_v21 = vsub.f32 %v2916_v12, %v563_v24 }
 0x3c1   :  { %v596_v25 = vmul.f32 1.442695, %v581_v21 }
 0x3c3   :  { %2412 = vpow2.f32 %v596_v25 }
 0x3c6   :  { %v415_v28 = vpop.permute.xlu2 %414 }
 0x3c7   :  { %v424_v30 = vsel %vm3947_vm0, %v2382_v27, %v415_v28 }
 0x3c8   :  { %694 = vmatpush.msrb.mxu0 %v424_v30 }
 0x3c9   :  { %v3019_v32 = vpop.eup %2412 }
 0x3ca   :  { %695 = vmatpush.msrb.mxu0 %v2383_v31  ;;  %v621_v33 = vsel %vm3946_vm5, %v3019_v32, 0.0 }
 0x3cb   :  { %622 = vadd.xlane.f32.xlu2 %v621_v33 }
 0x3d9   :  { %v560_v35 = vpop.xlane.xlu1 %559 }
 0x3da   :  { %v580_v37 = vsub.f32 %v2931_v17, %v560_v35 }
 0x3dc   :  { %v594_v12 = vmul.f32 1.442695, %v580_v37 }
 0x3de   :  { %2414 = vpow2.f32 %v594_v12 }
 0x3e4   :  { %v3024_v8 = vpop.eup %2414  ;;  %v566_v4 = vpop.xlane.xlu0 %565 }
 0x3e5   :  { %v582_v38 = vsub.f32 %v2946_v22, %v566_v4  ;;  %v618_v40 = vsel %vm3946_vm5, %v3024_v8, 0.0 }
 0x3e6   :  { %619 = vadd.xlane.f32.xlu0 %v618_v40 }
 0x3e7   :  { %v598_v47 = vmul.f32 1.442695, %v582_v38 }
 0x3e9   :  { %2416 = vpow2.f32 %v598_v47 }
 0x3ef   :  { %v3029_v48 = vpop.eup %2416 }
 0x3f0   :  { %v624_v49 = vsel %vm3946_vm5, %v3029_v48, 0.0 }
 0x3f1   :  { %v406_v0 = vpop.permute.xlu1 %405  ;;  %625 = vadd.xlane.f32.xlu1 %v624_v49 }
 0x3f2   :  { %696 = vmatpush.msrb.mxu0 %v406_v0 }
 0x3f9   :  { %v2386_v17 = vpop.permute.xlu1 %2385 }
 0x3fa   :  { %v2387_v50 = vunpack.i.l.bf16 %v2386_v17  ;;  %v2388_v52 = vunpack.i.h.bf16 %v2386_v17 }
 0x3fc   :  { %697 = vmatpush.msrb.mxu0 %v2387_v50 }
 0x3fe   :  { %698 = vmatpush.msrb.mxu0 %v2388_v52 }
 0x401   :  { %v397_v22 = vpop.permute.xlu1 %396 }
 0x402   :  { %v423_v53 = vsel %vm3947_vm0, %v2785_v3, %v397_v22 }
 0x403   :  { %699 = vmatpush.msrb.mxu0 %v423_v53 }
 0x405   :  { %700 = vmatpush.msrb.mxu0 %v2777_v60 }
 0x407   :  { %701 = vmatpush.msrb.mxu0 %v2779_v62 }
 0x416   :  { %v608_v54 = vpop.xlane.xlu2 %607 }
 0x417   :  { %2418 = vrcp.f32 %v608_v54 }
 0x41d   :  { %v2419_v29 = vpop.eup %2418 }
 0x41e   :  { %v611_v57 = vpop.xlane.xlu0 %610  ;;  %v646_v58 = vmul.f32 %v2419_v29, %v2958_v36 }
 0x41f   :  { %2420 = vrcp.f32 %v611_v57 }
 0x420   :  { %2194 = vmatmul.msk.f32.vlgmr.msrb.gmra.mxu0 %vm3946_vm5, %v646_v58 }
 0x425   :  { %v2421_v59 = vpop.eup %2420 }
 0x426   :  { %v614_v2 = vpop.xlane.xlu2 %613  ;;  %v572_v5 = vpop.xlane.xlu0 %571  ;;  %v647_v41 = vmul.f32 %v2421_v59, %v2964_v23 }
 0x427   :  { %2422 = vrcp.f32 %v614_v2  ;;  %v584_v3 = vsub.f32 %v2981_v18, %v572_v5 }
 0x428   :  { %2195 = vmatmul.msk.f32.gmra.mxu0 %vm3946_vm5, %v647_v41 }
 0x429   :  { %v602_v60 = vmul.f32 1.442695, %v584_v3 }
 0x42b   :  { %2424 = vpow2.f32 %v602_v60 }
 0x42c   :  { %v569_v62 = vpop.xlane.xlu1 %568 }
 0x42d   :  { %v2423_v9 = vpop.eup %2422  ;;  %v583_v13 = vsub.f32 %v3003_v6, %v569_v62 }
 0x42e   :  { %v617_v36 = vpop.xlane.xlu2 %616  ;;  %v575_v39 = vpop.xlane.xlu0 %574  ;;  %v648_v14 = vmul.f32 %v2423_v9, %v2984_v34 }
 0x42f   :  { %v600_v16 = vmul.f32 1.442695, %v583_v13  ;;  %2426 = vrcp.f32 %v617_v36  ;;  %v585_v19 = vsub.f32 %v3007_v7, %v575_v39 }
 0x430   :  { %2196 = vmatmul.msk.f32.gmra.mxu0 %vm3946_vm5, %v648_v14  ;;  %v796_v14 = vld [vmem:[%s3938_s3 + $0x38] sm:$0xff] }
 0x431   :  { %v2425_v23 = vpop.eup %2424  ;;  %2428 = vpow2.f32 %v600_v16  ;;  %v604_v18 = vmul.f32 1.442695, %v585_v19  ;;  %v795_v16 = vld [vmem:[%s3938_s3 + $0x30] sm:$0xff]  ;;  %815 = vmatpush.msrb.mxu1 %v796_v14  ;;  %v794_v19 = vld [vmem:[%s3938_s3 + $0x28] sm:$0xff] }
 0x432   :  { %v630_v24 = vsel %vm3946_vm5, %v2425_v23, 0.0 }
 0x433   :  { %2430 = vpow2.f32 %v604_v18  ;;  %631 = vadd.xlane.f32.xlu2 %v630_v24  ;;  %816 = vmatpush.msrb.mxu1 %v795_v16  ;;  %v792_v18 = vld [vmem:[%s3938_s3 + $0x18] sm:$0xff]  ;;  %v791_v24 = vld [vmem:[%s3938_s3 + $0x10] sm:$0xff] }
 0x435   :  { %v2427_v21 = vpop.eup %2426  ;;  %817 = vmatpush.msrb.mxu1 %v794_v19 }
 0x436   :  { %v649_v6 = vmul.f32 %v2427_v21, %v3011_v11  ;;  %v790_v21 = vld [vmem:[%s3938_s3 + $0x8] sm:$0xff] }
 0x437   :  { %v2429_v25 = vpop.eup %2428 }
 0x438   :  { %2197 = vmatmul.msk.f32.gmra.mxu0 %vm3946_vm5, %v649_v6  ;;  %v627_v34 = vsel %vm3946_vm5, %v2429_v25, 0.0  ;;  %v789_v6 = vld [vmem:[%s3938_s3] sm:$0xff] }
 0x439   :  { %v2431_v26 = vpop.eup %2430  ;;  %628 = vadd.xlane.f32.xlu0 %v627_v34 }
 0x43a   :  { %v633_v7 = vsel %vm3946_vm5, %v2431_v26, 0.0 }
 0x43b   :  { %634 = vadd.xlane.f32.xlu1 %v633_v7 }
 0x43e   :  { %v623_v28 = vpop.xlane.xlu2 %622 }
 0x459   :  { %v620_v27 = vpop.xlane.xlu0 %619 }
 0x45a   :  { %2432 = vrcp.f32 %v620_v27 }
 0x45b   :  { %2434 = vrcp.f32 %v623_v28 }
 0x460   :  { %v2433_v30 = vpop.eup %2432 }
 0x461   :  { %v650_v31 = vmul.f32 %v2433_v30, %v3024_v8  ;;  %v2435_v33 = vpop.eup %2434 }
 0x462   :  { %v651_v35 = vmul.f32 %v2435_v33, %v3019_v32 }
 0x463   :  { %2198 = vmatmul.msk.f32.gmra.mxu0 %vm3946_vm5, %v650_v31 }
 0x464   :  { %v626_v11 = vpop.xlane.xlu1 %625 }
 0x465   :  { %2436 = vrcp.f32 %v626_v11 }
 0x46b   :  { %2199 = vmatmul.msk.f32.gmra.mxu0 %vm3946_vm5, %v651_v35  ;;  %v2437_v37 = vpop.eup %2436 }
 0x46c   :  { %v652_v12 = vmul.f32 %v2437_v37, %v3029_v48 }
 0x473   :  { %2200 = vmatmul.msk.f32.gmra.mxu0 %vm3946_vm5, %v652_v12 }
 0x49d   :  { %v3057_v4 = vpop.f32.mrf.mxu0 }
 0x4a5   :  { %v3059_v38 = vpop.f32.mrf.mxu0 }
 0x4a6   :  { %v632_v47 = vpop.xlane.xlu2 %631 }
 0x4ac   :  { %v629_v40 = vpop.xlane.xlu0 %628 }
 0x4ad   :  { %2438 = vrcp.f32 %v629_v40  ;;  %v3061_v8 = vpop.f32.mrf.mxu0 }
 0x4ae   :  { %2440 = vrcp.f32 %v632_v47  ;;  %v736_v17 = vrot.slane %v3061_v8, 4  ;;  %v635_v48 = vpop.xlane.xlu1 %634 }
 0x4af   :  { %2442 = vrcp.f32 %v635_v48 }
 0x4b3   :  { %v2439_v49 = vpop.eup %2438 }
 0x4b4   :  { %v653_v0 = vmul.f32 %v2439_v49, %v2429_v25  ;;  %v2441_v22 = vpop.eup %2440 }
 0x4b5   :  { %v712_v32 = vpop.f32.mrf.mxu0  ;;  %v654_v53 = vmul.f32 %v2441_v22, %v2425_v23  ;;  %v2443_v54 = vpop.eup %2442  ;;  %v793_v23 = vld [vmem:[%s3938_s3 + $0x20] sm:$0xff] }
 0x4b6   :  { %v737_v50 = vrot.slane %v712_v32, 4  ;;  %2201 = vmatmul.msk.f32.gmra.mxu0 %vm3946_vm5, %v653_v0  ;;  %v655_v29 = vmul.f32 %v2443_v54, %v2431_v26  ;;  %818 = vmatpush.msrb.mxu1 %v793_v23 }
 0x4b8   :  { %v738_v52 = vsel %vm3947_vm0, %v736_v17, %v737_v50  ;;  %819 = vmatpush.msrb.mxu1 %v792_v18 }
 0x4b9   :  { %741 = vrot.lane.b32.xlu0 %v738_v52, %s2579_s11 }
 0x4ba   :  { %820 = vmatpush.msrb.mxu1 %v791_v24 }
 0x4bc   :  { %821 = vmatpush.msrb.mxu1 %v790_v21 }
 0x4be   :  { %2202 = vmatmul.msk.f32.gmra.mxu0 %vm3946_vm5, %v654_v53  ;;  %822 = vmatpush.msrb.mxu1 %v789_v6  ;;  %v932_v6 = vld [vmem:[%s3939_s4 + $0x70] sm:$0xff] }
 0x4bf   :  { %953 = vmatpush.msrb.mxu2 %v932_v6 }
 0x4c6   :  { %2203 = vmatmul.msk.f32.gmra.mxu0 %vm3946_vm5, %v655_v29  ;;  %vm3978_vm5 = vmmov %vm3976_vm9 }
 0x4e0   :  { %v715_v57 = vpop.f32.mrf.mxu0 }
 0x4e1   :  { %v739_v58 = vrot.slane %v715_v57, 4 }
 0x4e3   :  { %v740_v59 = vsel %vm3947_vm0, %v737_v50, %v739_v58 }
 0x4e4   :  { %743 = vrot.lane.b32.xlu0 %v740_v59, %s2579_s11 }
 0x4e8   :  { %v718_v2 = vpop.f32.mrf.mxu0 }
 0x4e9   :  { %753 = vrot.lane.b32.xlu2 %v718_v2, %s2586_s19 }
 0x4f0   :  { %v721_v5 = vpop.f32.mrf.mxu0 }
 0x4f1   :  { %755 = vrot.lane.b32.xlu2 %v721_v5, %s2586_s19 }
 0x52b   :  { %v742_v25 = vpop.permute.xlu0 %741 }
 0x52c   :  { %v778_v26 = vsel %vm3976_vm9, %v3057_v4, %v742_v25  ;;  %vm3980_vm9 = vmmov %vm3978_vm5  ;;  %v933_v25 = vld [vmem:[%s3939_s4 + $0x78] sm:$0xff] }
 0x52d   :  { %979 = vmatpush.msra.mxu1 %v933_v25  ;;  %v1028_v25 = vld [vmem:[%s3940_s5 + $0xc8] sm:$0xff] }
 0x533   :  { %v724_v41 = vpop.f32.mrf.mxu0 }
 0x534   :  { %757 = vrot.lane.b32.xlu2 %v724_v41, %s2586_s19  ;;  %v764_v60 = vrot.slane %v724_v41, 4 }
 0x53b   :  { %v727_v3 = vpop.f32.mrf.mxu0 }
 0x53c   :  { %v765_v62 = vrot.slane %v727_v3, 4 }
 0x53e   :  { %v766_v9 = vsel %vm3947_vm0, %v764_v60, %v765_v62 }
 0x53f   :  { %769 = vrot.lane.b32.xlu1 %v766_v9, %s2587_s20 }
 0x543   :  { %v730_v13 = vpop.f32.mrf.mxu0  ;;  %v754_v34 = vpop.permute.xlu2 %753 }
 0x544   :  { %v767_v36 = vrot.slane %v730_v13, 4  ;;  %v782_v7 = vsel %vm3949_vm11, %v778_v26, %v754_v34  ;;  %v930_v34 = vld [vmem:[%s3939_s4 + $0x60] sm:$0xff]  ;;  %v931_v26 = vld [vmem:[%s3939_s4 + $0x68] sm:$0xff] }
 0x545   :  { %954 = vmatpush.msrb.mxu2 %v930_v34  ;;  %980 = vmatpush.msra.mxu1 %v931_v26  ;;  %v1012_v26 = vld [vmem:[%s3940_s5 + $0x48] sm:$0xff] }
 0x546   :  { %v768_v39 = vsel %vm3947_vm0, %v765_v62, %v767_v36  ;;  %vm3979_vm0 = vmmov %vm3977_vm14 }
 0x547   :  { %745 = vrot.lane.b32.xlu1 %v739_v58, %s2579_s11  ;;  %771 = vrot.lane.b32.xlu0 %v768_v39, %s2587_s20  ;;  %v2588_v58 = vmov 64.0  }
 0x548   :  { %2444 = vrcp.f32 %v2588_v58  ;;  %v1016_v58 = vld [vmem:[%s3940_s5 + $0x68] sm:$0xff] }
 0x54b   :  { %v756_v11 = vpop.permute.xlu2 %755 }
 0x54f   :  { %773 = vrot.lane.b32.xlu0 %v767_v36, %s2587_s20 }
 0x556   :  { %v744_v27 = vpop.permute.xlu0 %743 }
 0x557   :  { %v779_v31 = vsel %vm3978_vm5, %v3059_v38, %v744_v27  ;;  %v797_v38 = vperm.slane %v2765_v45, 1  ;;  %vm3982_vm5 = vmmov %vm3979_vm0  ;;  %v929_v27 = vld [vmem:[%s3939_s4 + $0x58] sm:$0xff] }
 0x558   :  { %v783_v35 = vsel %vm3949_vm11, %v779_v31, %v756_v11  ;;  %981 = vmatpush.msra.mxu1 %v929_v27  ;;  %v924_v31 = vld [vmem:[%s3939_s4 + $0x30] sm:$0xff]  ;;  %v925_v11 = vld [vmem:[%s3939_s4 + $0x38] sm:$0xff]  ;;  %v1027_v27 = vld [vmem:[%s3940_s5 + $0xc0] sm:$0xff] }
 0x58e   :  { %v758_v40 = vpop.permute.xlu2 %757 }
 0x5b1   :  { %v770_v28 = vpop.permute.xlu1 %769 }
 0x5b2   :  { %v786_v30 = vsel %vm3948_vm1, %v782_v7, %v770_v28  ;;  %v928_v7 = vld [vmem:[%s3939_s4 + $0x50] sm:$0xff]  ;;  %v926_v28 = vld [vmem:[%s3939_s4 + $0x40] sm:$0xff] }
 0x5b3   :  { %2204 = vmatmul.msk.f32.vlgmr.msrb.gmra.mxu1 %vm3977_vm14, %v786_v30  ;;  %vm3981_vm14 = vmmov %vm3979_vm0  ;;  %955 = vmatpush.msrb.mxu2 %v928_v7  ;;  %v927_v30 = vld [vmem:[%s3939_s4 + $0x48] sm:$0xff] }
 0x5b4   :  { %982 = vmatpush.msra.mxu1 %v927_v30 }
 0x5b5   :  { %956 = vmatpush.msrb.mxu2 %v926_v28 }
 0x5b6   :  { %983 = vmatpush.msra.mxu1 %v925_v11  ;;  %v1011_v11 = vld [vmem:[%s3940_s5 + $0x40] sm:$0xff] }
 0x5b7   :  { %957 = vmatpush.msrb.mxu2 %v924_v31  ;;  %v1026_v31 = vld [vmem:[%s3940_s5 + $0xb8] sm:$0xff] }
 0x5b9   :  { %v772_v33 = vpop.permute.xlu0 %771  ;;  %v746_v12 = vpop.permute.xlu1 %745 }
 0x5ba   :  { %v787_v37 = vsel %vm3948_vm1, %v783_v35, %v772_v33  ;;  %v780_v4 = vsel %vm3980_vm9, %v3061_v8, %v746_v12  ;;  %vm3950_vm9 = vcmask 519168   ;;  %v922_v33 = vld [vmem:[%s3939_s4 + $0x20] sm:$0xff]  ;;  %v923_v35 = vld [vmem:[%s3939_s4 + $0x28] sm:$0xff]  ;;  %v921_v12 = vld [vmem:[%s3939_s4 + $0x18] sm:$0xff] }
 0x5bb   :  { %2205 = vmatmul.msk.f32.gmra.mxu1 %vm3979_vm0, %v787_v37  ;;  %v784_v49 = vsel %vm3949_vm11, %v780_v4, %v758_v40  ;;  %958 = vmatpush.msrb.mxu2 %v922_v33  ;;  %v920_v37 = vld [vmem:[%s3939_s4 + $0x10] sm:$0xff]  ;;  %v918_v4 = vld [vmem:[%s3939_s4] sm:$0xff]  ;;  %v919_v40 = vld [vmem:[%s3939_s4 + $0x8] sm:$0xff] }
 0x5bc   :  { %984 = vmatpush.msra.mxu1 %v923_v35 }
 0x5bd   :  { %959 = vmatpush.msrb.mxu2 %v920_v37  ;;  %v1025_v37 = vld [vmem:[%s3940_s5 + $0xb0] sm:$0xff] }
 0x5be   :  { %985 = vmatpush.msra.mxu1 %v921_v12  ;;  %v1010_v12 = vld [vmem:[%s3940_s5 + $0x38] sm:$0xff] }
 0x5bf   :  { %960 = vmatpush.msrb.mxu2 %v918_v4 }
 0x5c0   :  { %986 = vmatpush.msra.mxu1 %v919_v40 }
 0x5c1   :  { %v774_v47 = vpop.permute.xlu0 %773 }
 0x5c2   :  { %v788_v0 = vsel %vm3948_vm1, %v784_v49, %v774_v47  ;;  %vm3984_vm1 = vcmask 523264  }
 0x5c3   :  { %2206 = vmatmul.msk.f32.gmra.mxu1 %vm3981_vm14, %v788_v0  ;;  %vm3985_vm11 = vmmov %vm3984_vm1 }
 0x630   :  { %v824_v32 = vpop.f32.mrf.mxu1 }
 0x631   :  { %v825_v17 = vadd.f32 %v824_v32, %v797_v38 }
 0x633   :  { %v833_v50 = vadd.f32 %v825_v17, %v2747_v42  ;;  %v2445_v42 = vpop.eup %2444 }
 0x634   :  { %v847_v59 = vmul.f32 64.0, %v2445_v42  ;;  %vm851_vm14 = vweird.f32 %v2445_v42 }
 0x635   :  { %v836_v48 = vsel %vm3982_vm5, %v833_v50, 0.0  ;;  %vm3983_vm5 = vmmov %vm3979_vm0 }
 0x636   :  { %837 = vadd.xlane.f32.xlu1 %v836_v48  ;;  %v848_v2 = vsub.f32 1.0, %v847_v59  ;;  %v1031_v59 = vld [vmem:[%s3940_s5 + $0xe0] sm:$0xff] }
 0x638   :  { %v827_v52 = vpop.f32.mrf.mxu1  ;;  %v849_v5 = vmul.f32 %v2445_v42, %v848_v2 }
 0x639   :  { %v828_v22 = vadd.f32 %v827_v52, %v797_v38  ;;  %v1034_v52 = vld [vmem:[%s3940_s5 + $0xf8] sm:$0xff] }
 0x63a   :  { %v850_v41 = vadd.f32 %v2445_v42, %v849_v5  ;;  %1062 = vmatpush.msrb.mxu1 %v1034_v52  ;;  %v1015_v5 = vld [vmem:[%s3940_s5 + $0x60] sm:$0xff] }
 0x63b   :  { %v834_v8 = vadd.f32 %v828_v22, %v2753_v43  ;;  %v1033_v22 = vld [vmem:[%s3940_s5 + $0xf0] sm:$0xff] }
 0x63c   :  { %v3126_v43 = vsel %vm851_vm14, %v2445_v42, %v850_v41  ;;  %1063 = vmatpush.msrb.mxu1 %v1033_v22 }
 0x63d   :  { %v839_v53 = vsel %vm3979_vm0, %v834_v8, 0.0 }
 0x63e   :  { %840 = vadd.xlane.f32.xlu2 %v839_v53  ;;  %v1018_v53 = vld [vmem:[%s3940_s5 + $0x78] sm:$0xff] }
 0x63f   :  { %1036 = vmatpush.msra.mxu2 %v1018_v53 }
 0x640   :  { %v830_v54 = vpop.f32.mrf.mxu1 }
 0x641   :  { %v831_v29 = vadd.f32 %v830_v54, %v797_v38  ;;  %v1032_v54 = vld [vmem:[%s3940_s5 + $0xe8] sm:$0xff] }
 0x642   :  { %1064 = vmatpush.msrb.mxu1 %v1032_v54 }
 0x643   :  { %v835_v57 = vadd.f32 %v831_v29, %v2759_v44  ;;  %v1017_v29 = vld [vmem:[%s3940_s5 + $0x70] sm:$0xff] }
 0x644   :  { %1037 = vmatpush.msra.mxu2 %v1017_v29  ;;  %1065 = vmatpush.msrb.mxu1 %v1031_v59  ;;  %v1008_v29 = vld [vmem:[%s3940_s5 + $0x28] sm:$0xff]  ;;  %v1005_v59 = vld [vmem:[%s3940_s5 + $0x10] sm:$0xff] }
 0x645   :  { %v843_v45 = vsel %vm3950_vm9, %v835_v57, 0.0 }
 0x646   :  { %844 = vadd.xlane.f32.xlu0 %v843_v45  ;;  %1038 = vmatpush.msra.mxu2 %v1016_v58  ;;  %v1006_v58 = vld [vmem:[%s3940_s5 + $0x18] sm:$0xff] }
 0x648   :  { %1039 = vmatpush.msra.mxu2 %v1015_v5  ;;  %v1003_v5 = vld [vmem:[%s3940_s5] sm:$0xff] }
 0x6a9   :  { %v838_v3 = vpop.xlane.xlu1 %837 }
 0x6aa   :  { %v853_v60 = vmul.f32 %v3126_v43, %v838_v3 }
 0x6ac   :  { %v3129_v62 = vsub.f32 %v833_v50, %v853_v60  ;;  %v1030_v60 = vld [vmem:[%s3940_s5 + $0xd8] sm:$0xff] }
 0x6ad   :  { %1066 = vmatpush.msrb.mxu1 %v1030_v60 }
 0x6ae   :  { %v859_v44 = vmul.f32 %v3129_v62, %v3129_v62 }
 0x6b0   :  { %v862_v9 = vsel %vm3983_vm5, %v859_v44, 0.0 }
 0x6b1   :  { %863 = vadd.xlane.f32.xlu1 %v862_v9  ;;  %v841_v13 = vpop.xlane.xlu2 %840 }
 0x6b2   :  { %v854_v36 = vmul.f32 %v3126_v43, %v841_v13  ;;  %v1014_v13 = vld [vmem:[%s3940_s5 + $0x58] sm:$0xff] }
 0x6b3   :  { %1040 = vmatpush.msra.mxu2 %v1014_v13 }
 0x6b4   :  { %v3135_v39 = vsub.f32 %v834_v8, %v854_v36  ;;  %v3234_v36 = vld [vmem:[#allocation2] sm:$0xff] }
 0x6b5   :  { %v914_v6 = vperm.slane %v3234_v36, 5  ;;  %v934_v13 = vperm.slane %v3234_v36, 2 }
 0x6b6   :  { %v860_v14 = vmul.f32 %v3135_v39, %v3135_v39 }
 0x6b8   :  { %v865_v16 = vsel %vm3979_vm0, %v860_v14, 0.0  ;;  %v910_v14 = vperm.slane %v3234_v36, 4 }
 0x6b9   :  { %866 = vadd.xlane.f32.xlu2 %v865_v16  ;;  %v845_v19 = vpop.xlane.xlu0 %844  ;;  %v1029_v16 = vld [vmem:[%s3940_s5 + $0xd0] sm:$0xff] }
 0x6ba   :  { %v855_v23 = vmul.f32 %v3126_v43, %v845_v19  ;;  %1067 = vmatpush.msrb.mxu1 %v1029_v16 }
 0x6bc   :  { %v3141_v18 = vsub.f32 %v835_v57, %v855_v23  ;;  %1068 = vmatpush.msrb.mxu1 %v1028_v25 }
 0x6be   :  { %v861_v24 = vmul.f32 %v3141_v18, %v3141_v18  ;;  %1069 = vmatpush.msrb.mxu1 %v1027_v27 }
 0x6c0   :  { %v868_v21 = vsel %vm3950_vm9, %v861_v24, 0.0  ;;  %v1013_v24 = vld [vmem:[%s3940_s5 + $0x50] sm:$0xff]  ;;  %1070 = vmatpush.msrb.mxu1 %v1026_v31 }
 0x6c1   :  { %869 = vadd.xlane.f32.xlu0 %v868_v21  ;;  %1041 = vmatpush.msra.mxu2 %v1013_v24 }
 0x6c2   :  { %1071 = vmatpush.msrb.mxu1 %v1025_v37 }
 0x6c3   :  { %1042 = vmatpush.msra.mxu2 %v1012_v26 }
 0x6c5   :  { %1043 = vmatpush.msra.mxu2 %v1011_v11  ;;  %v1035_v11 = vperm.slane %v3234_v36, 3 }
 0x6c7   :  { %1044 = vmatpush.msra.mxu2 %v1010_v12 }
 0x724   :  { %v864_v47 = vpop.xlane.xlu1 %863 }
 0x725   :  { %v871_v49 = vmul.f32 %v864_v47, %v3126_v43 }
 0x727   :  { %v874_v0 = vadd.f32 1e-05, %v871_v49  ;;  %v1024_v49 = vld [vmem:[%s3940_s5 + $0xa8] sm:$0xff] }
 0x728   :  { %1072 = vmatpush.msrb.mxu1 %v1024_v49 }
 0x729   :  { %2446 = vrsqrt.f32 %v874_v0  ;;  %vm883_vm5 = vweird.f32 %v874_v0 }
 0x72c   :  { %v867_v38 = vpop.xlane.xlu2 %866 }
 0x72d   :  { %v872_v32 = vmul.f32 %v867_v38, %v3126_v43 }
 0x72f   :  { %v2447_v17 = vpop.eup %2446  ;;  %v3196_v50 = vadd.f32 1e-05, %v872_v32 }
 0x730   :  { %v878_v48 = vmul.f32 %v2447_v17, %v874_v0  ;;  %vm884_vm14 = vweird.f32 %v2447_v17  ;;  %v1009_v0 = vld [vmem:[%s3940_s5 + $0x30] sm:$0xff] }
 0x731   :  { %2448 = vrsqrt.f32 %v3196_v50  ;;  %vm885_vm0 = vmor %vm883_vm5, %vm884_vm14  ;;  %vm893_vm5 = vweird.f32 %v3196_v50  ;;  %1045 = vmatpush.msra.mxu2 %v1009_v0 }
 0x732   :  { %v879_v8 = vmul.f32 %v2447_v17, %v878_v48  ;;  %v1022_v48 = vld [vmem:[%s3940_s5 + $0x98] sm:$0xff] }
 0x733   :  { %1046 = vmatpush.msra.mxu2 %v1008_v29 }
 0x734   :  { %v880_v57 = vmul.f32 0.5, %v879_v8  ;;  %v870_v45 = vpop.xlane.xlu0 %869 }
 0x735   :  { %v873_v42 = vmul.f32 %v870_v45, %v3126_v43  ;;  %v1020_v45 = vld [vmem:[%s3940_s5 + $0x88] sm:$0xff] }
 0x736   :  { %v881_v2 = vsub.f32 1.5, %v880_v57  ;;  %v1021_v57 = vld [vmem:[%s3940_s5 + $0x90] sm:$0xff] }
 0x737   :  { %v2449_v41 = vpop.eup %2448  ;;  %v3224_v3 = vadd.f32 1e-05, %v873_v42  ;;  %v1019_v42 = vld [vmem:[%s3940_s5 + $0x80] sm:$0xff] }
 0x738   :  { %v882_v44 = vmul.f32 %v2447_v17, %v881_v2  ;;  %v888_v9 = vmul.f32 %v2449_v41, %v3196_v50  ;;  %vm894_vm14 = vweird.f32 %v2449_v41  ;;  %v1004_v2 = vld [vmem:[%s3940_s5 + $0x8] sm:$0xff] }
 0x739   :  { %2450 = vrsqrt.f32 %v3224_v3 }
 0x73a   :  { %v886_v19 = vsel %vm885_vm0, %v2447_v17, %v882_v44  ;;  %v889_v23 = vmul.f32 %v2449_v41, %v888_v9  ;;  %vm895_vm0 = vmor %vm893_vm5, %vm894_vm14  ;;  %v1023_v17 = vld [vmem:[%s3940_s5 + $0xa0] sm:$0xff]  ;;  %vm3986_vm5 = vcmask 523264  }
 0x73b   :  { %v907_v21 = vmul.f32 %v886_v19, %v3129_v62  ;;  %1073 = vmatpush.msrb.mxu1 %v1023_v17 }
 0x73c   :  { %v890_v34 = vmul.f32 0.5, %v889_v23 }
 0x73d   :  { %v911_v7 = vmul.f32 %v910_v14, %v907_v21  ;;  %1074 = vmatpush.msrb.mxu1 %v1022_v48 }
 0x73e   :  { %v891_v62 = vsub.f32 1.5, %v890_v34 }
 0x73f   :  { %v2451_v28 = vpop.eup %2450  ;;  %v3254_v30 = vadd.f32 %v914_v6, %v911_v7  ;;  %1075 = vmatpush.msrb.mxu1 %v1021_v57 }
 0x740   :  { %v892_v33 = vmul.f32 %v2449_v41, %v891_v62  ;;  %v898_v35 = vmul.f32 %v2451_v28, %v3224_v3 }
 0x741   :  { %2207 = vmatmul.msk.f32.vlgmr.msrb.gmra.mxu2 %vm3984_vm1, %v3254_v30  ;;  %2210 = vmatmul.msk.f32.vlgmr.msra.gmra.mxu1 %vm3985_vm11, %v3254_v30  ;;  %vm904_vm11 = vweird.f32 %v2451_v28  ;;  %vm903_vm1 = vweird.f32 %v3224_v3 }
 0x742   :  { %v896_v4 = vsel %vm895_vm0, %v2449_v41, %v892_v33  ;;  %v899_v40 = vmul.f32 %v2451_v28, %v898_v35  ;;  %vm905_vm14 = vmor %vm903_vm1, %vm904_vm11  ;;  %1076 = vmatpush.msrb.mxu1 %v1020_v45  ;;  %v2523_v41 = vld [vmem:[#allocation2 + $0x8] sm:$0xff]  ;;  %vm3992_vm11 = vcmask 519168  }
 0x743   :  { %v908_v47 = vmul.f32 %v896_v4, %v3135_v39  ;;  %vm3987_vm0 = vmmov %vm3986_vm5  ;;  %v935_v3 = vperm.slane %v2523_v41, 2 }
 0x744   :  { %v900_v38 = vmul.f32 0.5, %v899_v40  ;;  %vm3988_vm9 = vmmov %vm3987_vm0  ;;  %1077 = vmatpush.msrb.mxu1 %v1019_v42 }
 0x745   :  { %v912_v32 = vmul.f32 %v910_v14, %v908_v47  ;;  %vm3989_vm2 = vmmov %vm3987_vm0 }
 0x746   :  { %v901_v50 = vsub.f32 1.5, %v900_v38  ;;  %vm3993_vm1 = vmmov %vm3987_vm0 }
 0x747   :  { %v3284_v39 = vadd.f32 %v914_v6, %v912_v32 }
 0x748   :  { %v902_v52 = vmul.f32 %v2451_v28, %v901_v50 }
 0x749   :  { %2208 = vmatmul.msk.f32.gmra.mxu2 %vm3986_vm5, %v3284_v39  ;;  %2211 = vmatmul.msk.f32.gmra.mxu1 %vm3987_vm0, %v3284_v39  ;;  %vm3995_vm5 = vmmov %vm3992_vm11 }
 0x74a   :  { %v906_v22 = vsel %vm905_vm14, %v2451_v28, %v902_v52  ;;  %vm3994_vm14 = vmmov %vm3987_vm0 }
 0x74b   :  { %v909_v8 = vmul.f32 %v906_v22, %v3141_v18  ;;  %v1007_v18 = vld [vmem:[%s3940_s5 + $0x20] sm:$0xff] }
 0x74c   :  { %1047 = vmatpush.msra.mxu2 %v1007_v18 }
 0x74d   :  { %v913_v53 = vmul.f32 %v910_v14, %v909_v8 }
 0x74e   :  { %1048 = vmatpush.msra.mxu2 %v1006_v58 }
 0x74f   :  { %v3295_v54 = vadd.f32 %v914_v6, %v913_v53 }
 0x750   :  { %1049 = vmatpush.msra.mxu2 %v1005_v59 }
 0x751   :  { %2209 = vmatmul.msk.f32.gmra.mxu2 %vm3988_vm9, %v3295_v54  ;;  %2212 = vmatmul.msk.f32.gmra.mxu1 %vm3989_vm2, %v3295_v54  ;;  %vm3990_vm2 = vmmov %vm3987_vm0 }
 0x752   :  { %1050 = vmatpush.msra.mxu2 %v1004_v2  ;;  %vm3991_vm9 = vmmov %vm3987_vm0 }
 0x754   :  { %1051 = vmatpush.msra.mxu2 %v1003_v5 }
 0x7be   :  { %v988_v60 = vpop.f32.mrf.mxu1 }
 0x7bf   :  { %v989_v44 = vadd.f32 %v988_v60, %v935_v3 }
 0x7c1   :  { %v998_v9 = vmax.f32 %v989_v44, 0.0  ;;  %v2227_v44 = vld [vmem:[%s3937_s2 + $0xf0] sm:$0xff] }
 0x7c2   :  { %1203 = vmatpush.msrb.mxu2 %v2227_v44 }
 0x7c3   :  { %1078 = vmatmul.f32.vlgmr.msrb.gmra.mxu1 %v998_v9  ;;  %v2228_v9 = vld [vmem:[%s3937_s2 + $0xf8] sm:$0xff] }
 0x7c4   :  { %v962_v14 = vpop.f32.mrf.mxu2  ;;  %1229 = vmatpush.msra.mxu0 %v2228_v9 }
 0x7c5   :  { %v963_v16 = vadd.f32 %v962_v14, %v934_v13  ;;  %v2226_v14 = vld [vmem:[%s3937_s2 + $0xe8] sm:$0xff] }
 0x7c6   :  { %v991_v19 = vpop.f32.mrf.mxu1  ;;  %1230 = vmatpush.msra.mxu0 %v2226_v14 }
 0x7c7   :  { %v997_v23 = vmax.f32 %v963_v16, 0.0  ;;  %v992_v24 = vadd.f32 %v991_v19, %v935_v3  ;;  %v2223_v16 = vld [vmem:[%s3937_s2 + $0xd0] sm:$0xff]  ;;  %v2224_v19 = vld [vmem:[%s3937_s2 + $0xd8] sm:$0xff] }
 0x7c8   :  { %1231 = vmatpush.msra.mxu0 %v2224_v19  ;;  %v3428_v19 = vld [vmem:[#allocation2 + $0x10] sm:$0xff] }
 0x7c9   :  { %v1000_v21 = vmax.f32 %v992_v24, 0.0  ;;  %1052 = vmatmul.f32.vlgmr.msra.gmra.mxu2 %v997_v23  ;;  %v2221_v23 = vld [vmem:[%s3937_s2 + $0xc0] sm:$0xff]  ;;  %v2222_v24 = vld [vmem:[%s3937_s2 + $0xc8] sm:$0xff] }
 0x7ca   :  { %1232 = vmatpush.msra.mxu0 %v2222_v24  ;;  %v1184_v24 = vperm.slane %v3428_v19, 0 }
 0x7cb   :  { %1081 = vmatmul.f32.gmra.mxu1 %v1000_v21  ;;  %v2219_v21 = vld [vmem:[%s3937_s2 + $0xb0] sm:$0xff] }
 0x7cc   :  { %v965_v6 = vpop.f32.mrf.mxu2 }
 0x7cd   :  { %v966_v25 = vadd.f32 %v965_v6, %v934_v13  ;;  %v2220_v6 = vld [vmem:[%s3937_s2 + $0xb8] sm:$0xff] }
 0x7ce   :  { %v994_v34 = vpop.f32.mrf.mxu1  ;;  %1233 = vmatpush.msra.mxu0 %v2220_v6 }
 0x7cf   :  { %v999_v26 = vmax.f32 %v966_v25, 0.0  ;;  %v995_v7 = vadd.f32 %v994_v34, %v935_v3  ;;  %v2217_v25 = vld [vmem:[%s3937_s2 + $0xa0] sm:$0xff]  ;;  %v2218_v34 = vld [vmem:[%s3937_s2 + $0xa8] sm:$0xff] }
 0x7d0   :  { %1234 = vmatpush.msra.mxu0 %v2218_v34 }
 0x7d1   :  { %v1002_v27 = vmax.f32 %v995_v7, 0.0  ;;  %1055 = vmatmul.f32.gmra.mxu2 %v999_v26  ;;  %v2215_v26 = vld [vmem:[%s3937_s2 + $0x90] sm:$0xff]  ;;  %v2216_v7 = vld [vmem:[%s3937_s2 + $0x98] sm:$0xff] }
 0x7d2   :  { %1235 = vmatpush.msra.mxu0 %v2216_v7 }
 0x7d3   :  { %1084 = vmatmul.f32.gmra.mxu1 %v1002_v27  ;;  %v2213_v27 = vld [vmem:[%s3937_s2 + $0x80] sm:$0xff] }
 0x7d4   :  { %v968_v62 = vpop.f32.mrf.mxu2 }
 0x7d5   :  { %v969_v28 = vadd.f32 %v968_v62, %v934_v13  ;;  %v2225_v13 = vld [vmem:[%s3937_s2 + $0xe0] sm:$0xff]  ;;  %v2214_v62 = vld [vmem:[%s3937_s2 + $0x88] sm:$0xff] }
 0x7d6   :  { %1204 = vmatpush.msrb.mxu2 %v2225_v13  ;;  %1236 = vmatpush.msra.mxu0 %v2214_v62 }
 0x7d7   :  { %v1001_v31 = vmax.f32 %v969_v28, 0.0 }
 0x7d8   :  { %1205 = vmatpush.msrb.mxu2 %v2223_v16 }
 0x7d9   :  { %1058 = vmatmul.f32.gmra.mxu2 %v1001_v31 }
 0x7da   :  { %1206 = vmatpush.msrb.mxu2 %v2221_v23 }
 0x7dc   :  { %1207 = vmatpush.msrb.mxu2 %v2219_v21 }
 0x7de   :  { %1208 = vmatpush.msrb.mxu2 %v2217_v25 }
 0x7e0   :  { %1209 = vmatpush.msrb.mxu2 %v2215_v26 }
 0x7e2   :  { %1210 = vmatpush.msrb.mxu2 %v2213_v27 }
 0x840   :  { %v1079_v33 = vpop.f32.mrf.mxu1 }
 0x848   :  { %v1082_v47 = vpop.f32.mrf.mxu1 }
 0x84c   :  { %v1053_v35 = vpop.f32.mrf.mxu2 }
 0x84d   :  { %v1054_v37 = vadd.f32 %v1053_v35, %v1035_v11 }
 0x84f   :  { %v1080_v12 = vadd.f32 %v1079_v33, %v1054_v37 }
 0x850   :  { %v1085_v52 = vpop.f32.mrf.mxu1 }
 0x851   :  { %v1088_v4 = vadd.f32 %v1080_v12, %v3254_v30 }
 0x853   :  { %v1091_v40 = vsel %vm3990_vm2, %v1088_v4, 0.0 }
 0x854   :  { %v1056_v49 = vpop.f32.mrf.mxu2  ;;  %1092 = vadd.xlane.f32.xlu1 %v1091_v40 }
 0x855   :  { %v1057_v0 = vadd.f32 %v1056_v49, %v1035_v11 }
 0x857   :  { %v1083_v38 = vadd.f32 %v1082_v47, %v1057_v0 }
 0x859   :  { %v1089_v32 = vadd.f32 %v1083_v38, %v3284_v39 }
 0x85b   :  { %v1094_v17 = vsel %vm3991_vm9, %v1089_v32, 0.0 }
 0x85c   :  { %1095 = vadd.xlane.f32.xlu2 %v1094_v17  ;;  %v1059_v50 = vpop.f32.mrf.mxu2 }
 0x85d   :  { %v1060_v48 = vadd.f32 %v1059_v50, %v1035_v11 }
 0x85f   :  { %v1086_v22 = vadd.f32 %v1085_v52, %v1060_v48  ;;  %v1157_v52 = vperm.slane %v3234_v36, 6 }
 0x861   :  { %v1090_v8 = vadd.f32 %v1086_v22, %v3295_v54 }
 0x863   :  { %v1097_v30 = vsel %vm3992_vm11, %v1090_v8, 0.0 }
 0x864   :  { %1098 = vadd.xlane.f32.xlu0 %v1097_v30 }
 0x8c7   :  { %v1093_v53 = vpop.xlane.xlu1 %1092 }
 0x8c8   :  { %v1100_v29 = vmul.f32 %v1093_v53, %v3126_v43  ;;  %v1161_v53 = vperm.slane %v3234_v36, 7 }
 0x8ca   :  { %v3337_v57 = vsub.f32 %v1088_v4, %v1100_v29 }
 0x8cc   :  { %v1106_v39 = vmul.f32 %v3337_v57, %v3337_v57 }
 0x8ce   :  { %v1109_v18 = vsel %vm3993_vm1, %v1106_v39, 0.0 }
 0x8cf   :  { %v1096_v45 = vpop.xlane.xlu2 %1095  ;;  %1110 = vadd.xlane.f32.xlu1 %v1109_v18 }
 0x8d0   :  { %v1101_v58 = vmul.f32 %v1096_v45, %v3126_v43 }
 0x8d2   :  { %v3343_v42 = vsub.f32 %v1089_v32, %v1101_v58 }
 0x8d4   :  { %v1107_v54 = vmul.f32 %v3343_v42, %v3343_v42 }
 0x8d6   :  { %v1112_v59 = vsel %vm3994_vm14, %v1107_v54, 0.0 }
 0x8d7   :  { %1113 = vadd.xlane.f32.xlu2 %v1112_v59  ;;  %v1099_v2 = vpop.xlane.xlu0 %1098 }
 0x8d8   :  { %v1102_v5 = vmul.f32 %v1099_v2, %v3126_v43 }
 0x8da   :  { %v3349_v41 = vsub.f32 %v1090_v8, %v1102_v5 }
 0x8dc   :  { %v1108_v3 = vmul.f32 %v3349_v41, %v3349_v41 }
 0x8de   :  { %v1115_v60 = vsel %vm3995_vm5, %v1108_v3, 0.0  ;;  %vm3996_vm5 = vcmask 523264  }
 0x8df   :  { %1116 = vadd.xlane.f32.xlu0 %v1115_v60 }
 0x942   :  { %v1111_v28 = vpop.xlane.xlu1 %1110 }
 0x943   :  { %v1118_v31 = vmul.f32 %v1111_v28, %v3126_v43 }
 0x945   :  { %v1121_v11 = vadd.f32 1e-05, %v1118_v31 }
 0x947   :  { %2452 = vrsqrt.f32 %v1121_v11  ;;  %vm1130_vm2 = vweird.f32 %v1121_v11 }
 0x94a   :  { %v1114_v33 = vpop.xlane.xlu2 %1113 }
 0x94b   :  { %v1119_v35 = vmul.f32 %v1114_v33, %v3126_v43 }
 0x94d   :  { %v2453_v37 = vpop.eup %2452  ;;  %v1122_v12 = vadd.f32 1e-05, %v1119_v35 }
 0x94e   :  { %v1125_v4 = vmul.f32 %v2453_v37, %v1121_v11  ;;  %vm1131_vm0 = vweird.f32 %v2453_v37 }
 0x94f   :  { %2454 = vrsqrt.f32 %v1122_v12  ;;  %vm1132_vm9 = vmor %vm1130_vm2, %vm1131_vm0  ;;  %vm1140_vm1 = vweird.f32 %v1122_v12 }
 0x950   :  { %v1126_v40 = vmul.f32 %v2453_v37, %v1125_v4  ;;  %vm3997_vm0 = vmmov %vm3996_vm5 }
 0x952   :  { %v1127_v47 = vmul.f32 0.5, %v1126_v40  ;;  %v1117_v49 = vpop.xlane.xlu0 %1116 }
 0x953   :  { %v1120_v0 = vmul.f32 %v1117_v49, %v3126_v43 }
 0x954   :  { %v1128_v38 = vsub.f32 1.5, %v1127_v47 }
 0x955   :  { %v2455_v32 = vpop.eup %2454  ;;  %v1123_v17 = vadd.f32 1e-05, %v1120_v0 }
 0x956   :  { %v1129_v50 = vmul.f32 %v2453_v37, %v1128_v38  ;;  %v1135_v48 = vmul.f32 %v2455_v32, %v1122_v12  ;;  %vm1141_vm11 = vweird.f32 %v2455_v32 }
 0x957   :  { %2456 = vrsqrt.f32 %v1123_v17  ;;  %vm1142_vm14 = vmor %vm1140_vm1, %vm1141_vm11 }
 0x958   :  { %v1133_v22 = vsel %vm1132_vm9, %v2453_v37, %v1129_v50  ;;  %v1136_v8 = vmul.f32 %v2455_v32, %v1135_v48  ;;  %vm1150_vm9 = vweird.f32 %v1123_v17  ;;  %vm3998_vm11 = vmmov %vm3997_vm0 }
 0x959   :  { %v1154_v30 = vmul.f32 %v1133_v22, %v3337_v57  ;;  %vm3999_vm1 = vmmov %vm3997_vm0 }
 0x95a   :  { %v1137_v29 = vmul.f32 0.5, %v1136_v8 }
 0x95b   :  { %v1158_v39 = vmul.f32 %v1157_v52, %v1154_v30 }
 0x95c   :  { %v1138_v18 = vsub.f32 1.5, %v1137_v29 }
 0x95d   :  { %v2457_v45 = vpop.eup %2456  ;;  %v3408_v58 = vadd.f32 %v1161_v53, %v1158_v39 }
 0x95e   :  { %v1139_v54 = vmul.f32 %v2455_v32, %v1138_v18  ;;  %v1145_v59 = vmul.f32 %v2457_v45, %v1123_v17  ;;  %vm1151_vm2 = vweird.f32 %v2457_v45 }
 0x95f   :  { %2229 = vmatmul.msk.f32.vlgmr.msrb.gmra.mxu2 %vm3996_vm5, %v3408_v58  ;;  %2232 = vmatmul.msk.f32.vlgmr.msra.gmra.mxu0 %vm3997_vm0, %v3408_v58  ;;  %vm1152_vm12 = vmor %vm1150_vm9, %vm1151_vm2 }
 0x960   :  { %v1143_v57 = vsel %vm1142_vm14, %v2455_v32, %v1139_v54  ;;  %v1146_v2 = vmul.f32 %v2457_v45, %v1145_v59  ;;  %vm4000_vm14 = vmmov %vm3997_vm0 }
 0x961   :  { %v1155_v36 = vmul.f32 %v1143_v57, %v3343_v42  ;;  %vm4001_vm5 = vmmov %vm3997_vm0 }
 0x962   :  { %v1147_v5 = vmul.f32 0.5, %v1146_v2 }
 0x963   :  { %v1159_v3 = vmul.f32 %v1157_v52, %v1155_v36 }
 0x964   :  { %v1148_v60 = vsub.f32 1.5, %v1147_v5 }
 0x965   :  { %v3415_v44 = vadd.f32 %v1161_v53, %v1159_v3 }
 0x966   :  { %v1149_v9 = vmul.f32 %v2457_v45, %v1148_v60 }
 0x967   :  { %2230 = vmatmul.msk.f32.gmra.mxu2 %vm3998_vm11, %v3415_v44  ;;  %2233 = vmatmul.msk.f32.gmra.mxu0 %vm3999_vm1, %v3415_v44  ;;  %vm4006_vm11 = vcmask 130048  }
 0x968   :  { %v1153_v13 = vsel %vm1152_vm12, %v2457_v45, %v1149_v9  ;;  %vm4002_vm12 = vcmask 1043456   ;;  %vm4007_vm1 = vmmov %vm4006_vm11 }
 0x969   :  { %v1156_v14 = vmul.f32 %v1153_v13, %v3349_v41  ;;  %vm4003_vm0 = vmmov %vm4002_vm12 }
 0x96a   :  { %vm4004_vm2 = vmmov %vm4003_vm0 }
 0x96b   :  { %v1160_v16 = vmul.f32 %v1157_v52, %v1156_v14  ;;  %vm4005_vm9 = vmmov %vm4003_vm0  ;;  %v1185_v14 = vperm.slane %v3483_v46, 0 }
 0x96d   :  { %v3422_v42 = vadd.f32 %v1161_v53, %v1160_v16 }
 0x96f   :  { %2231 = vmatmul.msk.f32.gmra.mxu2 %vm4000_vm14, %v3422_v42  ;;  %2234 = vmatmul.msk.f32.gmra.mxu0 %vm4001_vm5, %v3422_v42  ;;  %vm4008_vm14 = vmmov %vm4007_vm1 }
 0x970   :  { %vm4009_vm5 = vmmov %vm4007_vm1 }
 0x9dc   :  { %v1238_v45 = vpop.f32.mrf.mxu0 }
 0x9e2   :  { %v1212_v23 = vpop.f32.mrf.mxu2 }
 0x9e3   :  { %v1213_v21 = vadd.f32 %v1212_v23, %v1184_v24 }
 0x9e4   :  { %v1241_v2 = vpop.f32.mrf.mxu0 }
 0x9e5   :  { %v1250_v34 = vrot.slane %v1213_v21, 4  ;;  %v3491_v23 = vadd.f32 %v1241_v2, %v1185_v14 }
 0x9ea   :  { %v1215_v6 = vpop.f32.mrf.mxu2 }
 0x9eb   :  { %v1216_v25 = vadd.f32 %v1215_v6, %v1184_v24  ;;  %v1282_v6 = vrot.slane %v3491_v23, 4 }
 0x9ec   :  { %v1244_v13 = vpop.f32.mrf.mxu0 }
 0x9ed   :  { %v1251_v26 = vrot.slane %v1216_v25, 4  ;;  %v3489_v16 = vadd.f32 %v1244_v13, %v1185_v14 }
 0x9ef   :  { %v1252_v41 = vsel %vm4002_vm12, %v1250_v34, %v1251_v26  ;;  %vm4010_vm12 = vmmov %vm4007_vm1  ;;  %v1284_v61 = vrot.slane %v3489_v16, 4 }
 0x9f0   :  { %1271 = vrot.lane.b32.xlu2 %v1252_v41, %s2582_s1 }
 0x9f2   :  { %v1218_v7 = vpop.f32.mrf.mxu2 }
 0x9f3   :  { %v1219_v27 = vadd.f32 %v1218_v7, %v1184_v24  ;;  %v2394_v24 = vpack.i.bf16 %v3491_v23, %v3489_v16 }
 0x9f5   :  { %v1253_v62 = vrot.slane %v1219_v27, 4  ;;  %1266 = vrot.lane.b32.xlu0 %v1219_v27, %s2583_s16 }
 0x9f7   :  { %v1254_v28 = vsel %vm4003_vm0, %v1251_v26, %v1253_v62  ;;  %vm4011_vm0 = vmmov %vm4007_vm1 }
 0x9f8   :  { %1262 = vrot.lane.b32.xlu2 %v1213_v21, %s2583_s16  ;;  %1273 = vrot.lane.b32.xlu1 %v1254_v28, %s2582_s1  ;;  %vm4019_vm6 = vmmov %vm4011_vm0 }
 0x9f9   :  { %vm4021_vm13 = vmmov %vm4011_vm0 }
 0x9fa   :  { %vm4024_vm8 = vmmov %vm4011_vm0 }
 0x9fd   :  { %1264 = vrot.lane.b32.xlu0 %v1216_v25, %s2583_s16 }
 0xa00   :  { %1255 = vrot.lane.b32.xlu2 %v1250_v34, %s2584_s17  ;;  %1269 = vrot.lane.b32.xlu1 %v1250_v34, %s2582_s1 }
 0xa05   :  { %1257 = vrot.lane.b32.xlu0 %v1252_v41, %s2584_s17 }
 0xa08   :  { %1259 = vrot.lane.b32.xlu1 %v1254_v28, %s2584_s17 }
 0xa4a   :  { %v1272_v31 = vpop.permute.xlu2 %1271 }
 0xa4b   :  { %1333 = vrot.lane.b32.xlu0 %v1272_v31, %s2585_s18 }
 0xa52   :  { %v1263_v11 = vpop.permute.xlu2 %1262 }
 0xa53   :  { %1327 = vrot.lane.b32.xlu0 %v1263_v11, %s2585_s18 }
 0xa5a   :  { %v1256_v33 = vpop.permute.xlu2 %1255 }
 0xa5b   :  { %v1276_v35 = vsel %vm4004_vm2, %v1219_v27, %v1256_v33  ;;  %vm4012_vm2 = vmmov %vm4011_vm0 }
 0xa5c   :  { %1321 = vrot.lane.b32.xlu0 %v1276_v35, %s2585_s18 }
 0xa67   :  { %v1267_v37 = vpop.permute.xlu0 %1266 }
 0xa6a   :  { %v1274_v12 = vpop.permute.xlu1 %1273 }
 0xa6b   :  { %1335 = vrot.lane.b32.xlu1 %v1274_v12, %s2585_s18 }
 0xa6f   :  { %v1265_v4 = vpop.permute.xlu0 %1264 }
 0xa72   :  { %v1270_v40 = vpop.permute.xlu1 %1269 }
 0xa73   :  { %1329 = vrot.lane.b32.xlu1 %v1265_v4, %s2585_s18  ;;  %v1277_v47 = vsel %vm4005_vm9, %v1267_v37, %v1270_v40  ;;  %vm4013_vm9 = vmmov %vm4011_vm0 }
 0xa74   :  { %1331 = vrot.lane.b32.xlu2 %v1277_v47, %s2585_s18 }
 0xa77   :  { %v1258_v49 = vpop.permute.xlu0 %1257 }
 0xa7a   :  { %v1260_v0 = vpop.permute.xlu1 %1259 }
 0xa7b   :  { %1323 = vrot.lane.b32.xlu1 %v1258_v49, %s2585_s18 }
 0xa7c   :  { %1325 = vrot.lane.b32.xlu2 %v1260_v0, %s2585_s18 }
 0xa83   :  { %1317 = vrot.lane.b32.xlu1 %v1213_v21, %s2585_s18 }
 0xa84   :  { %1319 = vrot.lane.b32.xlu2 %v1216_v25, %s2585_s18 }
 0xabd   :  { %v1334_v32 = vpop.permute.xlu0 %1333 }
 0xac5   :  { %v1328_v48 = vpop.permute.xlu0 %1327 }
 0xace   :  { %v1332_v17 = vpop.permute.xlu2 %1331  ;;  %v1322_v8 = vpop.permute.xlu0 %1321 }
 0xad6   :  { %v1326_v52 = vpop.permute.xlu2 %1325 }
 0xadd   :  { %v1336_v38 = vpop.permute.xlu1 %1335 }
 0xade   :  { %2235 = vmatpush.xpose.msk.msrb.mxu3 %vm4006_vm11, %v1336_v38  ;;  %v1320_v30 = vpop.permute.xlu2 %1319  ;;  %vm4014_vm11 = vmmov %vm4011_vm0 }
 0xae2   :  { %2236 = vmatpush.xpose.msk.msrb.mxu3 %vm4007_vm1, %v1334_v32  ;;  %vm4015_vm1 = vmmov %vm4011_vm0 }
 0xae5   :  { %v1330_v50 = vpop.permute.xlu1 %1329 }
 0xae6   :  { %2237 = vmatpush.xpose.msk.msrb.mxu3 %vm4008_vm14, %v1332_v17  ;;  %vm4016_vm14 = vmmov %vm4011_vm0 }
 0xaea   :  { %2238 = vmatpush.xpose.msk.msrb.mxu3 %vm4009_vm5, %v1330_v50  ;;  %vm4017_vm5 = vmmov %vm4011_vm0 }
 0xaed   :  { %v1324_v22 = vpop.permute.xlu1 %1323 }
 0xaee   :  { %2239 = vmatpush.xpose.msk.msrb.mxu3 %vm4010_vm12, %v1328_v48  ;;  %vm4018_vm12 = vmmov %vm4011_vm0 }
 0xaf2   :  { %2240 = vmatpush.xpose.msk.msrb.mxu3 %vm4011_vm0, %v1326_v52 }
 0xaf5   :  { %v1318_v53 = vpop.permute.xlu1 %1317 }
 0xaf6   :  { %2241 = vmatpush.xpose.msk.msrb.mxu3 %vm4012_vm2, %v1324_v22  ;;  %vm4020_vm2 = vmmov %vm4011_vm0 }
 0xafa   :  { %2242 = vmatpush.xpose.msk.msrb.mxu3 %vm4013_vm9, %v1322_v8  ;;  %vm4022_vm9 = vmmov %vm4011_vm0 }
 0xafe   :  { %2243 = vmatpush.xpose.msk.msrb.mxu3 %vm4014_vm11, %v1320_v30  ;;  %vm4023_vm11 = vmmov %vm4011_vm0 }
 0xb02   :  { %2244 = vmatpush.xpose.msk.msrb.mxu3 %vm4015_vm1, %v1318_v53  ;;  %vm4025_vm1 = vcmask 654336  }
 0xb05   :  { %2245 = vmatmul.msk.f32.vlgmr.msrb.gmra.mxu3 %vm4016_vm14, %v1213_v21  ;;  %v3496_v21 = vadd.f32 %v1238_v45, %v1185_v14  ;;  %vm4034_vm14 = vnez %v3969_v20 }
 0xb07   :  { %v1281_v26 = vrot.slane %v3496_v21, 4 }
 0xb0d   :  { %2246 = vmatmul.msk.f32.gmra.mxu3 %vm4017_vm5, %v1216_v25  ;;  %vm4035_vm5 = vmmov %vm4025_vm1 }
 0xb15   :  { %2247 = vmatmul.msk.f32.gmra.mxu3 %vm4018_vm12, %v1276_v35  ;;  %vm4036_vm12 = vmmov %vm4025_vm1 }
 0xb1d   :  { %2248 = vmatmul.msk.f32.gmra.mxu3 %vm4019_vm6, %v1258_v49  ;;  %vm4026_vm6 = vmmov %vm4025_vm1 }
 0xb25   :  { %2249 = vmatmul.msk.f32.gmra.mxu3 %vm4011_vm0, %v1260_v0  ;;  %vm4037_vm0 = vmmov %vm4025_vm1 }
 0xb2d   :  { %2250 = vmatmul.msk.f32.gmra.mxu3 %vm4020_vm2, %v1263_v11  ;;  %vm4038_vm2 = vnez %v3971_v55 }
 0xb35   :  { %2251 = vmatmul.msk.f32.gmra.mxu3 %vm4021_vm13, %v1265_v4  ;;  %vm4032_vm13 = vnez %v3967_v15 }
 0xb3d   :  { %2252 = vmatmul.msk.f32.gmra.mxu3 %vm4022_vm9, %v1277_v47  ;;  %vm4039_vm9 = vmmov %vm4037_vm0 }
 0xb45   :  { %2253 = vmatmul.msk.f32.gmra.mxu3 %vm4023_vm11, %v1272_v31  ;;  %vm4040_vm11 = vmmov %vm4037_vm0 }
 0xb4d   :  { %2254 = vmatmul.msk.f32.gmra.mxu3 %vm4024_vm8, %v1274_v12  ;;  %vm4027_vm8 = vmmov %vm4025_vm1 }
 0xb88   :  { %v1394_v29 = vpop.f32.mrf.mxu3 }
 0xb89   :  { %v1424_v39 = vsel %vm2855_vm4, %v1394_v29, -1e+30  ;;  %vm4028_vm4 = vmmov %vm4025_vm1 }
 0xb8a   :  { %v1434_v18 = vsel %vm4025_vm1, %v1424_v39, -inf }
 0xb8b   :  { %1435 = vmax.xlane.f32.xlu0 %v1434_v18 }
 0xb90   :  { %v1397_v54 = vpop.f32.mrf.mxu3 }
 0xb91   :  { %v1425_v59 = vsel %vm2865_vm7, %v1397_v54, -1e+30  ;;  %vm4029_vm7 = vmmov %vm4025_vm1 }
 0xb92   :  { %v1437_v57 = vsel %vm4026_vm6, %v1425_v59, -inf  ;;  %vm4042_vm6 = vnez %v3973_v63 }
 0xb93   :  { %1438 = vmax.xlane.f32.xlu2 %v1437_v57 }
 0xb98   :  { %v1400_v36 = vpop.f32.mrf.mxu3 }
 0xb99   :  { %v1426_v5 = vsel %vm2876_vm10, %v1400_v36, -1e+30  ;;  %vm4030_vm10 = vcmask 1043456  }
 0xb9a   :  { %v1440_v3 = vsel %vm4027_vm8, %v1426_v5, -inf  ;;  %v1285_v7 = vsel %vm4030_vm10, %v1282_v6, %v1284_v61  ;;  %vm4043_vm8 = vmmov %vm4037_vm0 }
 0xb9b   :  { %1441 = vmax.xlane.f32.xlu1 %v1440_v3 }
 0xba0   :  { %v1403_v60 = vpop.f32.mrf.mxu3 }
 0xba1   :  { %v1427_v9 = vsel %vm2890_vm15, %v1403_v60, -1e+30  ;;  %vm4031_vm15 = vmmov %vm4030_vm10 }
 0xba2   :  { %v1443_v51 = vsel %vm4028_vm4, %v1427_v9, -inf  ;;  %v1283_v27 = vsel %vm4031_vm15, %v1281_v26, %v1282_v6  ;;  %vm4044_vm4 = vmmov %vm4037_vm0 }
 0xba3   :  { %1444 = vmax.xlane.f32.xlu0 %v1443_v51  ;;  %v2389_v62 = vpack.i.bf16 %v1283_v27, %v1285_v7  ;;  %vm4046_vm10 = vmmov %vm4037_vm0 }
 0xba8   :  { %v1406_v56 = vpop.f32.mrf.mxu3 }
 0xba9   :  { %v3510_v28 = vsel %vm4032_vm13, %v1406_v56, -1e+30  ;;  %vm4047_vm13 = vmmov %vm4037_vm0 }
 0xbab   :  { %2395 = vrot.lane.b32.xlu2 %v2394_v24, %s2583_s16 }
 0xbb0   :  { %v1409_v25 = vpop.f32.mrf.mxu3 }
 0xbb1   :  { %v1429_v34 = vsel %vm2908_vm3, %v1409_v25, -1e+30  ;;  %vm4033_vm3 = vmmov %vm4025_vm1  ;;  %vm4041_vm1 = vnez %v3975_v1 }
 0xbb2   :  { %v1449_v41 = vsel %vm4029_vm7, %v1429_v34, -inf  ;;  %v1446_v10 = vsel %vm4033_vm3, %v3510_v28, -inf  ;;  %vm4045_vm7 = vmmov %vm4037_vm0 }
 0xbb3   :  { %1450 = vmax.xlane.f32.xlu1 %v1449_v41  ;;  %vm4048_vm3 = vmmov %vm4031_vm15 }
 0xbb7   :  { %2390 = vrot.lane.b32.xlu0 %v2389_v62, %s2582_s1 }
 0xbb8   :  { %v1412_v31 = vpop.f32.mrf.mxu3 }
 0xbb9   :  { %v3516_v11 = vsel %vm4034_vm14, %v1412_v31, -1e+30  ;;  %vm4049_vm14 = vmmov %vm4037_vm0 }
 0xbba   :  { %v1452_v33 = vsel %vm4035_vm5, %v3516_v11, -inf  ;;  %vm4050_vm5 = vmmov %vm4037_vm0 }
 0xbc0   :  { %v1415_v20 = vpop.f32.mrf.mxu3 }
 0xbc1   :  { %v3550_v54 = vsel %vm4042_vm6, %v1415_v20, -1e+30  ;;  %vm4056_vm6 = vmmov %vm4037_vm0 }
 0xbc2   :  { %v1455_v2 = vsel %vm4045_vm7, %v3550_v54, -inf  ;;  %vm4059_vm7 = vmmov %vm4048_vm3 }
 0xbc8   :  { %v1418_v50 = vpop.f32.mrf.mxu3 }
 0xbc9   :  { %v3534_v22 = vsel %vm4038_vm2, %v1418_v50, -1e+30  ;;  %vm4052_vm2 = vmmov %vm4037_vm0 }
 0xbcc   :  { %1304 = vrot.lane.b32.xlu1 %v1281_v26, %s2582_s1 }
 0xbd0   :  { %v1421_v18 = vpop.f32.mrf.mxu3 }
 0xbd1   :  { %v3544_v45 = vsel %vm4041_vm1, %v1421_v18, -1e+30  ;;  %vm4055_vm1 = vmmov %vm4037_vm0 }
 0xbd2   :  { %v1461_v57 = vsel %vm4044_vm4, %v3544_v45, -inf  ;;  %vm4058_vm4 = vmmov %vm4037_vm0 }
 0xbd4   :  { %1447 = vmax.xlane.f32.xlu2 %v1446_v10 }
 0xbe1   :  { %1453 = vmax.xlane.f32.xlu0 %v1452_v33 }
 0xbec   :  { %1295 = vrot.lane.b32.xlu2 %v3496_v21, %s2583_s16 }
 0xbf4   :  { %2400 = vrot.lane.b32.xlu2 %v2389_v62, %s2584_s17 }
 0xbfc   :  { %1286 = vrot.lane.b32.xlu2 %v1281_v26, %s2584_s17 }
 0xbfe   :  { %v1436_v15 = vpop.xlane.xlu0 %1435 }
 0xbff   :  { %v1464_v35 = vsub.f32 %v1424_v39, %v1436_v15  ;;  %v1458_v39 = vsel %vm4040_vm11, %v3534_v22, -inf  ;;  %vm4054_vm11 = vmmov %vm4037_vm0 }
 0xc01   :  { %v1474_v37 = vmul.f32 1.442695, %v1464_v35 }
 0xc03   :  { %2458 = vpow2.f32 %v1474_v37 }
 0xc06   :  { %v1439_v12 = vpop.xlane.xlu2 %1438 }
 0xc07   :  { %v1465_v4 = vsub.f32 %v1425_v59, %v1439_v12 }
 0xc09   :  { %v3524_v40 = vpop.eup %2458  ;;  %v1476_v47 = vmul.f32 1.442695, %v1465_v4 }
 0xc0a   :  { %v1494_v49 = vsel %vm4036_vm12, %v3524_v40, 0.0  ;;  %vm4051_vm12 = vmmov %vm4037_vm0 }
 0xc0b   :  { %2460 = vpow2.f32 %v1476_v47  ;;  %1495 = vadd.xlane.f32.xlu1 %v1494_v49 }
 0xc0e   :  { %v1442_v0 = vpop.xlane.xlu1 %1441  ;;  %v2396_v51 = vpop.permute.xlu2 %2395 }
 0xc0f   :  { %v1466_v38 = vsub.f32 %v1426_v5, %v1442_v0  ;;  %v2397_v14 = vunpack.i.l.bf16 %v2396_v51  ;;  %v2398_v61 = vunpack.i.h.bf16 %v2396_v51 }
 0xc11   :  { %v3528_v32 = vpop.eup %2460  ;;  %v1478_v17 = vmul.f32 1.442695, %v1466_v38 }
 0xc12   :  { %v1497_v48 = vsel %vm4037_vm0, %v3528_v32, 0.0 }
 0xc13   :  { %2462 = vpow2.f32 %v1478_v17  ;;  %1498 = vadd.xlane.f32.xlu0 %v1497_v48 }
 0xc16   :  { %v1445_v52 = vpop.xlane.xlu0 %1444 }
 0xc17   :  { %v1467_v8 = vsub.f32 %v1427_v9, %v1445_v52 }
 0xc19   :  { %v3536_v30 = vpop.eup %2462  ;;  %v1480_v53 = vmul.f32 1.442695, %v1467_v8 }
 0xc1a   :  { %v1500_v29 = vsel %vm4039_vm9, %v3536_v30, 0.0  ;;  %vm4053_vm9 = vmmov %vm4037_vm0 }
 0xc1b   :  { %2464 = vpow2.f32 %v1480_v53  ;;  %1501 = vadd.xlane.f32.xlu1 %v1500_v29  ;;  %1459 = vmax.xlane.f32.xlu0 %v1458_v39 }
 0xc21   :  { %v3546_v55 = vpop.eup %2464 }
 0xc22   :  { %v1503_v59 = vsel %vm4043_vm8, %v3546_v55, 0.0  ;;  %vm4057_vm8 = vmmov %vm4037_vm0 }
 0xc23   :  { %1504 = vadd.xlane.f32.xlu1 %v1503_v59  ;;  %1462 = vmax.xlane.f32.xlu0 %v1461_v57 }
 0xc25   :  { %1456 = vmax.xlane.f32.xlu2 %v1455_v2 }
 0xc26   :  { %v1451_v1 = vpop.xlane.xlu1 %1450 }
 0xc27   :  { %v1469_v36 = vsub.f32 %v1429_v34, %v1451_v1 }
 0xc29   :  { %v1484_v5 = vmul.f32 1.442695, %v1469_v36  ;;  %v2391_v3 = vpop.permute.xlu0 %2390 }
 0xc2a   :  { %v2392_v60 = vunpack.i.l.bf16 %v2391_v3  ;;  %v2393_v63 = vunpack.i.h.bf16 %v2391_v3 }
 0xc2b   :  { %2466 = vpow2.f32 %v1484_v5 }
 0xc2c   :  { %1580 = vmatpush.msra.mxu1 %v2392_v60 }
 0xc2e   :  { %1581 = vmatpush.msra.mxu1 %v2393_v63 }
 0xc31   :  { %v3558_v9 = vpop.eup %2466 }
 0xc32   :  { %v1509_v13 = vsel %vm4046_vm10, %v3558_v9, 0.0  ;;  %vm4060_vm10 = vmmov %vm4037_vm0 }
 0xc33   :  { %1510 = vadd.xlane.f32.xlu2 %v1509_v13 }
 0xc3e   :  { %v1305_v56 = vpop.permute.xlu1 %1304 }
 0xc3f   :  { %v1314_v24 = vsel %vm4031_vm15, %v2397_v14, %v1305_v56  ;;  %vm4061_vm15 = vmmov %vm4037_vm0 }
 0xc40   :  { %1582 = vmatpush.msra.mxu1 %v1314_v24 }
 0xc42   :  { %1583 = vmatpush.msra.mxu1 %v2398_v61 }
 0xc47   :  { %v1448_v6 = vpop.xlane.xlu2 %1447 }
 0xc48   :  { %v1468_v25 = vsub.f32 %v3510_v28, %v1448_v6 }
 0xc4a   :  { %v1482_v34 = vmul.f32 1.442695, %v1468_v25 }
 0xc4c   :  { %2468 = vpow2.f32 %v1482_v34 }
 0xc4f   :  { %v1296_v26 = vpop.permute.xlu2 %1295 }
 0xc50   :  { %1584 = vmatpush.msra.mxu1 %v1296_v26 }
 0xc52   :  { %v3564_v41 = vpop.eup %2468 }
 0xc53   :  { %v1506_v7 = vsel %vm4047_vm13, %v3564_v41, 0.0  ;;  %vm4062_vm13 = vmmov %vm4037_vm0 }
 0xc54   :  { %v1454_v27 = vpop.xlane.xlu0 %1453  ;;  %1507 = vadd.xlane.f32.xlu0 %v1506_v7 }
 0xc55   :  { %v1470_v62 = vsub.f32 %v3516_v11, %v1454_v27 }
 0xc57   :  { %v1486_v10 = vmul.f32 1.442695, %v1470_v62  ;;  %v2401_v31 = vpop.permute.xlu2 %2400 }
 0xc58   :  { %v2402_v33 = vunpack.i.l.bf16 %v2401_v31  ;;  %v2403_v15 = vunpack.i.h.bf16 %v2401_v31 }
 0xc59   :  { %2470 = vpow2.f32 %v1486_v10 }
 0xc5a   :  { %1585 = vmatpush.msra.mxu1 %v2402_v33 }
 0xc5c   :  { %1586 = vmatpush.msra.mxu1 %v2403_v15 }
 0xc5f   :  { %v2471_v28 = vpop.eup %2470  ;;  %v1287_v35 = vpop.permute.xlu2 %1286 }
 0xc60   :  { %v1313_v37 = vsel %vm4048_vm3, %v3489_v16, %v1287_v35  ;;  %v1512_v12 = vsel %vm4049_vm14, %v2471_v28, 0.0  ;;  %vm4063_vm14 = vmmov %vm4048_vm3 }
 0xc61   :  { %1587 = vmatpush.msra.mxu1 %v1313_v37  ;;  %1513 = vadd.xlane.f32.xlu1 %v1512_v12 }
 0xc63   :  { %1588 = vmatpush.msra.mxu1 %v3491_v23 }
 0xc65   :  { %1589 = vmatpush.msra.mxu1 %v3496_v21 }
 0xc7e   :  { %v1496_v11 = vpop.xlane.xlu1 %1495 }
 0xc7f   :  { %2472 = vrcp.f32 %v1496_v11 }
 0xc85   :  { %v2473_v4 = vpop.eup %2472 }
 0xc86   :  { %v1534_v20 = vmul.f32 %v2473_v4, %v3524_v40  ;;  %v1499_v47 = vpop.xlane.xlu0 %1498 }
 0xc87   :  { %2474 = vrcp.f32 %v1499_v47 }
 0xc88   :  { %2255 = vmatmul.msk.f32.vlgmr.msra.gmra.mxu1 %vm4050_vm5, %v1534_v20  ;;  %vm4064_vm5 = vmmov %vm4048_vm3 }
 0xc8d   :  { %v2475_v49 = vpop.eup %2474 }
 0xc8e   :  { %v1502_v0 = vpop.xlane.xlu1 %1501  ;;  %v1460_v16 = vpop.xlane.xlu0 %1459  ;;  %v1535_v38 = vmul.f32 %v2475_v49, %v3528_v32 }
 0xc8f   :  { %2476 = vrcp.f32 %v1502_v0  ;;  %v1472_v17 = vsub.f32 %v3534_v22, %v1460_v16 }
 0xc90   :  { %2256 = vmatmul.msk.f32.gmra.mxu1 %vm4051_vm12, %v1535_v38  ;;  %v2272_v38 = vld [vmem:[%s3938_s3 + $0x78] sm:$0xff]  ;;  %vm4065_vm12 = vcmask 130048  }
 0xc91   :  { %v1490_v23 = vmul.f32 1.442695, %v1472_v17  ;;  %v2271_v17 = vld [vmem:[%s3938_s3 + $0x70] sm:$0xff]  ;;  %1702 = vmatpush.msra.mxu2 %v2272_v38  ;;  %v2285_v38 = vld [vmem:[%s3939_s4 + $0xc8] sm:$0xff] }
 0xc93   :  { %2478 = vpow2.f32 %v1490_v23  ;;  %v2270_v23 = vld [vmem:[%s3938_s3 + $0x68] sm:$0xff]  ;;  %1703 = vmatpush.msra.mxu2 %v2271_v17  ;;  %v2282_v17 = vld [vmem:[%s3939_s4 + $0xb0] sm:$0xff] }
 0xc95   :  { %v2477_v21 = vpop.eup %2476  ;;  %1704 = vmatpush.msra.mxu2 %v2270_v23  ;;  %v2283_v23 = vld [vmem:[%s3939_s4 + $0xb8] sm:$0xff] }
 0xc96   :  { %v1505_v50 = vpop.xlane.xlu1 %1504  ;;  %v1463_v48 = vpop.xlane.xlu0 %1462  ;;  %v1536_v40 = vmul.f32 %v2477_v21, %v3536_v30  ;;  %v2269_v21 = vld [vmem:[%s3938_s3 + $0x60] sm:$0xff] }
 0xc97   :  { %2480 = vrcp.f32 %v1505_v50  ;;  %v1473_v52 = vsub.f32 %v3544_v45, %v1463_v48  ;;  %v2268_v50 = vld [vmem:[%s3938_s3 + $0x58] sm:$0xff]  ;;  %1705 = vmatpush.msra.mxu2 %v2269_v21  ;;  %v2267_v48 = vld [vmem:[%s3938_s3 + $0x50] sm:$0xff]  ;;  %v2280_v21 = vld [vmem:[%s3939_s4 + $0xa0] sm:$0xff] }
 0xc98   :  { %2257 = vmatmul.msk.f32.gmra.mxu1 %vm4037_vm0, %v1536_v40  ;;  %v1457_v8 = vpop.xlane.xlu2 %1456  ;;  %v2266_v40 = vld [vmem:[%s3938_s3 + $0x48] sm:$0xff]  ;;  %vm4066_vm0 = vcmask 261120  }
 0xc99   :  { %v2479_v53 = vpop.eup %2478  ;;  %v1492_v32 = vmul.f32 1.442695, %v1473_v52  ;;  %v1471_v29 = vsub.f32 %v3550_v54, %v1457_v8  ;;  %1706 = vmatpush.msra.mxu2 %v2268_v50  ;;  %v2265_v52 = vld [vmem:[%s3938_s3 + $0x40] sm:$0xff]  ;;  %v2281_v50 = vld [vmem:[%s3939_s4 + $0xa8] sm:$0xff] }
 0xc9a   :  { %v1518_v22 = vsel %vm4052_vm2, %v2479_v53, 0.0  ;;  %vm4067_vm2 = vcmask 392192  }
 0xc9b   :  { %2482 = vpow2.f32 %v1492_v32  ;;  %v1488_v39 = vmul.f32 1.442695, %v1471_v29  ;;  %1519 = vadd.xlane.f32.xlu2 %v1518_v22  ;;  %1707 = vmatpush.msra.mxu2 %v2267_v48  ;;  %v2278_v48 = vld [vmem:[%s3939_s4 + $0x90] sm:$0xff] }
 0xc9d   :  { %v2481_v18 = vpop.eup %2480  ;;  %2484 = vpow2.f32 %v1488_v39  ;;  %1708 = vmatpush.msra.mxu2 %v2266_v40  ;;  %v2279_v40 = vld [vmem:[%s3939_s4 + $0x98] sm:$0xff] }
 0xc9e   :  { %v1537_v59 = vmul.f32 %v2481_v18, %v3546_v55 }
 0xc9f   :  { %1709 = vmatpush.msra.mxu2 %v2265_v52  ;;  %v2276_v52 = vld [vmem:[%s3939_s4 + $0x80] sm:$0xff] }
 0xca0   :  { %2258 = vmatmul.msk.f32.gmra.mxu1 %vm4053_vm9, %v1537_v59  ;;  %vm4068_vm9 = vcmask 523264  }
 0xca1   :  { %v2483_v30 = vpop.eup %2482 }
 0xca2   :  { %v1521_v45 = vsel %vm4054_vm11, %v2483_v30, 0.0  ;;  %vm4069_vm11 = vmmov %vm4065_vm12 }
 0xca3   :  { %v2485_v57 = vpop.eup %2484  ;;  %1522 = vadd.xlane.f32.xlu1 %v1521_v45 }
 0xca4   :  { %v1515_v2 = vsel %vm4055_vm1, %v2485_v57, 0.0  ;;  %vm4070_vm1 = vmmov %vm4066_vm0 }
 0xca5   :  { %1516 = vadd.xlane.f32.xlu0 %v1515_v2 }
 0xca6   :  { %v1511_v1 = vpop.xlane.xlu2 %1510 }
 0xcc7   :  { %v1508_v54 = vpop.xlane.xlu0 %1507 }
 0xcc8   :  { %2486 = vrcp.f32 %v1508_v54 }
 0xcc9   :  { %2488 = vrcp.f32 %v1511_v1 }
 0xcce   :  { %v2487_v36 = vpop.eup %2486 }
 0xccf   :  { %v1538_v5 = vmul.f32 %v2487_v36, %v3564_v41  ;;  %v2489_v55 = vpop.eup %2488 }
 0xcd0   :  { %v1539_v60 = vmul.f32 %v2489_v55, %v3558_v9 }
 0xcd1   :  { %2259 = vmatmul.msk.f32.gmra.mxu1 %vm4056_vm6, %v1538_v5  ;;  %vm4071_vm6 = vmmov %vm4067_vm2 }
 0xcd4   :  { %v1514_v3 = vpop.xlane.xlu1 %1513 }
 0xcd5   :  { %2490 = vrcp.f32 %v1514_v3 }
 0xcd9   :  { %2260 = vmatmul.msk.f32.gmra.mxu1 %vm4057_vm8, %v1539_v60  ;;  %vm4072_vm8 = vmmov %vm4068_vm9  ;;  %v1684_v60 = vperm.slane %v3428_v19, 1 }
 0xcdb   :  { %v2491_v63 = vpop.eup %2490 }
 0xcdc   :  { %v1540_v13 = vmul.f32 %v2491_v63, %v2471_v28 }
 0xce1   :  { %2261 = vmatmul.msk.f32.gmra.mxu1 %vm4058_vm4, %v1540_v13  ;;  %vm4073_vm4 = vmmov %vm4069_vm11 }
 0xd05   :  { %v3593_v51 = vpop.f32.mrf.mxu1 }
 0xd0d   :  { %v3595_v14 = vpop.f32.mrf.mxu1 }
 0xd0e   :  { %v1520_v61 = vpop.xlane.xlu2 %1519 }
 0xd15   :  { %v3597_v56 = vpop.f32.mrf.mxu1 }
 0xd16   :  { %v1624_v25 = vrot.slane %v3597_v56, 4  ;;  %v1523_v7 = vpop.xlane.xlu1 %1522 }
 0xd18   :  { %v1517_v24 = vpop.xlane.xlu0 %1516 }
 0xd19   :  { %2492 = vrcp.f32 %v1517_v24 }
 0xd1a   :  { %2494 = vrcp.f32 %v1520_v61 }
 0xd1b   :  { %2496 = vrcp.f32 %v1523_v7 }
 0xd1d   :  { %v1600_v6 = vpop.f32.mrf.mxu1 }
 0xd1e   :  { %v1625_v34 = vrot.slane %v1600_v6, 4 }
 0xd1f   :  { %v2493_v9 = vpop.eup %2492 }
 0xd20   :  { %v1626_v26 = vsel %vm4059_vm7, %v1624_v25, %v1625_v34  ;;  %v1541_v41 = vmul.f32 %v2493_v9, %v2485_v57  ;;  %v2495_v27 = vpop.eup %2494  ;;  %vm4074_vm7 = vmmov %vm4066_vm0 }
 0xd21   :  { %1629 = vrot.lane.b32.xlu0 %v1626_v26, %s2579_s11  ;;  %v1542_v62 = vmul.f32 %v2495_v27, %v2479_v53  ;;  %v2497_v10 = vpop.eup %2496 }
 0xd22   :  { %2262 = vmatmul.msk.f32.gmra.mxu1 %vm4060_vm10, %v1541_v41  ;;  %v1543_v31 = vmul.f32 %v2497_v10, %v2483_v30  ;;  %vm4075_vm10 = vmmov %vm4067_vm2 }
 0xd2a   :  { %2263 = vmatmul.msk.f32.gmra.mxu1 %vm4061_vm15, %v1542_v62  ;;  %vm4076_vm15 = vmmov %vm4072_vm8 }
 0xd32   :  { %2264 = vmatmul.msk.f32.gmra.mxu1 %vm4062_vm13, %v1543_v31  ;;  %vm4077_vm13 = vmmov %vm4072_vm8 }
 0xd4e   :  { %v1603_v33 = vpop.f32.mrf.mxu1 }
 0xd4f   :  { %v1627_v15 = vrot.slane %v1603_v33, 4 }
 0xd51   :  { %v1628_v28 = vsel %vm4048_vm3, %v1625_v34, %v1627_v15  ;;  %vm4078_vm3 = vmmov %vm4072_vm8 }
 0xd52   :  { %1631 = vrot.lane.b32.xlu0 %v1628_v28, %s2579_s11 }
 0xd56   :  { %v1606_v35 = vpop.f32.mrf.mxu1 }
 0xd57   :  { %1641 = vrot.lane.b32.xlu2 %v1606_v35, %s2586_s19 }
 0xd5e   :  { %v1609_v37 = vpop.f32.mrf.mxu1 }
 0xd5f   :  { %1643 = vrot.lane.b32.xlu2 %v1609_v37, %s2586_s19 }
 0xd93   :  { %v1630_v8 = vpop.permute.xlu0 %1629 }
 0xd94   :  { %v1666_v32 = vsel %vm4065_vm12, %v3593_v51, %v1630_v8  ;;  %vm4081_vm12 = vmmov %vm4078_vm3  ;;  %v2277_v8 = vld [vmem:[%s3939_s4 + $0x88] sm:$0xff] }
 0xd9f   :  { %v1612_v12 = vpop.f32.mrf.mxu1 }
 0xda0   :  { %1645 = vrot.lane.b32.xlu2 %v1612_v12, %s2586_s19  ;;  %v1652_v4 = vrot.slane %v1612_v12, 4 }
 0xda7   :  { %v1615_v11 = vpop.f32.mrf.mxu1 }
 0xda8   :  { %v1653_v20 = vrot.slane %v1615_v11, 4  ;;  %v2290_v11 = vld [vmem:[%s3939_s4 + $0xf0] sm:$0xff] }
 0xda9   :  { %1833 = vmatpush.msrb.mxu0 %v2290_v11 }
 0xdaa   :  { %v1654_v47 = vsel %vm4063_vm14, %v1652_v4, %v1653_v20  ;;  %vm4079_vm14 = vcmask 519168   ;;  %v2291_v4 = vld [vmem:[%s3939_s4 + $0xf8] sm:$0xff] }
 0xdab   :  { %1657 = vrot.lane.b32.xlu1 %v1654_v47, %s2587_s20  ;;  %1859 = vmatpush.msrb.mxu2 %v2291_v4  ;;  %v2289_v47 = vld [vmem:[%s3939_s4 + $0xe8] sm:$0xff] }
 0xdad   :  { %1860 = vmatpush.msrb.mxu2 %v2289_v47  ;;  %v2321_v47 = vld [vmem:[%s3940_s5 + $0x1b8] sm:$0xff] }
 0xdaf   :  { %v1618_v49 = vpop.f32.mrf.mxu1 }
 0xdb0   :  { %v1655_v0 = vrot.slane %v1618_v49, 4  ;;  %v2286_v49 = vld [vmem:[%s3939_s4 + $0xd0] sm:$0xff] }
 0xdb1   :  { %v1642_v53 = vpop.permute.xlu2 %1641 }
 0xdb2   :  { %v1656_v16 = vsel %vm4064_vm5, %v1653_v20, %v1655_v0  ;;  %v1669_v29 = vsel %vm4066_vm0, %v1666_v32, %v1642_v53  ;;  %vm4080_vm5 = vmmov %vm4078_vm3  ;;  %v2288_v20 = vld [vmem:[%s3939_s4 + $0xe0] sm:$0xff] }
 0xdb3   :  { %1633 = vrot.lane.b32.xlu1 %v1627_v15, %s2579_s11  ;;  %1659 = vrot.lane.b32.xlu0 %v1656_v16, %s2587_s20  ;;  %vm4082_vm0 = vmmov %vm4079_vm14  ;;  %v2284_v16 = vld [vmem:[%s3939_s4 + $0xc0] sm:$0xff] }
 0xdb4   :  { %1834 = vmatpush.msrb.mxu0 %v2288_v20  ;;  %v2304_v20 = vld [vmem:[%s3940_s5 + $0x130] sm:$0xff] }
 0xdb6   :  { %1835 = vmatpush.msrb.mxu0 %v2286_v49 }
 0xdb8   :  { %1836 = vmatpush.msrb.mxu0 %v2284_v16 }
 0xdb9   :  { %v1644_v30 = vpop.permute.xlu2 %1643 }
 0xdba   :  { %1837 = vmatpush.msrb.mxu0 %v2282_v17  ;;  %v2320_v17 = vld [vmem:[%s3940_s5 + $0x1b0] sm:$0xff] }
 0xdbb   :  { %1661 = vrot.lane.b32.xlu0 %v1655_v0, %s2587_s20  ;;  %v2287_v0 = vld [vmem:[%s3939_s4 + $0xd8] sm:$0xff] }
 0xdbc   :  { %1861 = vmatpush.msrb.mxu2 %v2287_v0  ;;  %1838 = vmatpush.msrb.mxu0 %v2280_v21 }
 0xdbe   :  { %1862 = vmatpush.msrb.mxu2 %v2285_v38  ;;  %1839 = vmatpush.msrb.mxu0 %v2278_v48  ;;  %v2303_v38 = vld [vmem:[%s3940_s5 + $0x128] sm:$0xff] }
 0xdc0   :  { %1863 = vmatpush.msrb.mxu2 %v2283_v23  ;;  %1840 = vmatpush.msrb.mxu0 %v2276_v52 }
 0xdc2   :  { %1864 = vmatpush.msrb.mxu2 %v2281_v50  ;;  %v2302_v50 = vld [vmem:[%s3940_s5 + $0x120] sm:$0xff] }
 0xdc4   :  { %v1632_v22 = vpop.permute.xlu0 %1631  ;;  %1865 = vmatpush.msrb.mxu2 %v2279_v40  ;;  %v2301_v40 = vld [vmem:[%s3940_s5 + $0x118] sm:$0xff] }
 0xdc5   :  { %v1667_v59 = vsel %vm4069_vm11, %v3595_v14, %v1632_v22 }
 0xdc6   :  { %v1670_v57 = vsel %vm4070_vm1, %v1667_v59, %v1644_v30  ;;  %1866 = vmatpush.msrb.mxu2 %v2277_v8 }
 0xdfa   :  { %v1646_v36 = vpop.permute.xlu2 %1645 }
 0xe1d   :  { %v1658_v39 = vpop.permute.xlu1 %1657 }
 0xe1e   :  { %v1672_v18 = vsel %vm4067_vm2, %v1669_v29, %v1658_v39 }
 0xe1f   :  { %2273 = vmatmul.msk.f32.vlgmr.msra.gmra.mxu2 %vm4068_vm9, %v1672_v18 }
 0xe25   :  { %v1660_v45 = vpop.permute.xlu0 %1659  ;;  %v1634_v54 = vpop.permute.xlu1 %1633 }
 0xe26   :  { %v1673_v2 = vsel %vm4071_vm6, %v1670_v57, %v1660_v45  ;;  %v1668_v1 = vsel %vm4073_vm4, %v3597_v56, %v1634_v54  ;;  %v2313_v45 = vld [vmem:[%s3940_s5 + $0x178] sm:$0xff]  ;;  %v2312_v57 = vld [vmem:[%s3940_s5 + $0x170] sm:$0xff]  ;;  %vm4083_vm4 = vmmov %vm4078_vm3 }
 0xe27   :  { %2274 = vmatmul.msk.f32.gmra.mxu2 %vm4072_vm8, %v1673_v2  ;;  %v1671_v55 = vsel %vm4074_vm7, %v1668_v1, %v1646_v36  ;;  %1917 = vmatpush.msra.mxu0 %v2313_v45  ;;  %v2329_v54 = vld [vmem:[%s3940_s5 + $0x1f8] sm:$0xff]  ;;  %v2311_v1 = vld [vmem:[%s3940_s5 + $0x168] sm:$0xff]  ;;  %v2328_v36 = vld [vmem:[%s3940_s5 + $0x1f0] sm:$0xff] }
 0xe28   :  { %2333 = vmatpush.msrb.mxu1 %v2313_v45  ;;  %1943 = vmatpush.msra.mxu2 %v2329_v54  ;;  %vm4084_vm7 = vmmov %vm4078_vm3  ;;  %v2316_v45 = vld [vmem:[%s3940_s5 + $0x190] sm:$0xff] }
 0xe29   :  { %1918 = vmatpush.msra.mxu0 %v2312_v57  ;;  %v3866_v54 = vld [vmem:[#allocation2 + $0x10] sm:$0xff] }
 0xe2a   :  { %2334 = vmatpush.msrb.mxu1 %v2312_v57  ;;  %1944 = vmatpush.msra.mxu2 %v2328_v36  ;;  %v2315_v57 = vld [vmem:[%s3940_s5 + $0x188] sm:$0xff] }
 0xe2b   :  { %1919 = vmatpush.msra.mxu0 %v2311_v1 }
 0xe2c   :  { %2335 = vmatpush.msrb.mxu1 %v2311_v1  ;;  %v1814_v1 = vperm.slane %v3866_v54, 2 }
 0xe2d   :  { %v1662_v5 = vpop.permute.xlu0 %1661 }
 0xe2e   :  { %v1674_v3 = vsel %vm4075_vm10, %v1671_v55, %v1662_v5 }
 0xe2f   :  { %2275 = vmatmul.msk.f32.gmra.mxu2 %vm4076_vm15, %v1674_v3  ;;  %v2327_v3 = vld [vmem:[%s3940_s5 + $0x1e8] sm:$0xff] }
 0xe30   :  { %1945 = vmatpush.msra.mxu2 %v2327_v3  ;;  %v1815_v3 = vperm.slane %v3483_v46, 2 }
 0xea2   :  { %v1711_v63 = vpop.f32.mrf.mxu2 }
 0xea3   :  { %v1712_v13 = vadd.f32 %v1711_v63, %v1684_v60  ;;  %v2310_v63 = vld [vmem:[%s3940_s5 + $0x160] sm:$0xff] }
 0xea4   :  { %1920 = vmatpush.msra.mxu0 %v2310_v63  ;;  %2336 = vmatpush.msrb.mxu1 %v2310_v63 }
 0xea5   :  { %v1720_v51 = vadd.f32 %v1712_v13, %v3408_v58 }
 0xea7   :  { %v1723_v14 = vsel %vm4077_vm13, %v1720_v51, 0.0 }
 0xea8   :  { %1724 = vadd.xlane.f32.xlu1 %v1723_v14 }
 0xeaa   :  { %v1714_v24 = vpop.f32.mrf.mxu2 }
 0xeab   :  { %v1715_v61 = vadd.f32 %v1714_v24, %v1684_v60 }
 0xead   :  { %v1721_v56 = vadd.f32 %v1715_v61, %v3415_v44  ;;  %v2309_v61 = vld [vmem:[%s3940_s5 + $0x158] sm:$0xff] }
 0xeae   :  { %1921 = vmatpush.msra.mxu0 %v2309_v61  ;;  %2337 = vmatpush.msrb.mxu1 %v2309_v61 }
 0xeaf   :  { %v1726_v6 = vsel %vm4078_vm3, %v1721_v56, 0.0 }
 0xeb0   :  { %1727 = vadd.xlane.f32.xlu2 %v1726_v6 }
 0xeb2   :  { %v1717_v25 = vpop.f32.mrf.mxu2 }
 0xeb3   :  { %v1718_v34 = vadd.f32 %v1717_v25, %v1684_v60  ;;  %v2325_v25 = vld [vmem:[%s3940_s5 + $0x1d8] sm:$0xff] }
 0xeb5   :  { %v1722_v9 = vadd.f32 %v1718_v34, %v3422_v42  ;;  %v3768_v34 = vperm.slane %v3428_v19, 4 }
 0xeb7   :  { %v1729_v26 = vsel %vm4079_vm14, %v1722_v9, 0.0  ;;  %vm4085_vm14 = vmmov %vm4078_vm3 }
 0xeb8   :  { %1730 = vadd.xlane.f32.xlu0 %v1729_v26 }
 0xf1b   :  { %v1725_v41 = vpop.xlane.xlu1 %1724 }
 0xf1c   :  { %v1732_v58 = vmul.f32 %v1725_v41, %v3126_v43 }
 0xf1e   :  { %v3663_v7 = vsub.f32 %v1720_v51, %v1732_v58  ;;  %v2326_v51 = vld [vmem:[%s3940_s5 + $0x1e0] sm:$0xff]  ;;  %v2324_v58 = vld [vmem:[%s3940_s5 + $0x1d0] sm:$0xff] }
 0xf1f   :  { %1946 = vmatpush.msra.mxu2 %v2326_v51 }
 0xf20   :  { %v1738_v27 = vmul.f32 %v3663_v7, %v3663_v7 }
 0xf21   :  { %1947 = vmatpush.msra.mxu2 %v2325_v25 }
 0xf22   :  { %v1741_v44 = vsel %vm4080_vm5, %v1738_v27, 0.0  ;;  %vm4086_vm5 = vmmov %vm4078_vm3 }
 0xf23   :  { %1742 = vadd.xlane.f32.xlu1 %v1741_v44  ;;  %v1728_v62 = vpop.xlane.xlu2 %1727  ;;  %v1793_v44 = vperm.slane %v3428_v19, 5  ;;  %1948 = vmatpush.msra.mxu2 %v2324_v58 }
 0xf24   :  { %v1733_v10 = vmul.f32 %v1728_v62, %v3126_v43  ;;  %v2307_v62 = vld [vmem:[%s3940_s5 + $0x148] sm:$0xff] }
 0xf26   :  { %v3669_v31 = vsub.f32 %v1721_v56, %v1733_v10 }
 0xf28   :  { %v1739_v42 = vmul.f32 %v3669_v31, %v3669_v31 }
 0xf2a   :  { %v1744_v33 = vsel %vm4081_vm12, %v1739_v42, 0.0  ;;  %v2323_v42 = vld [vmem:[%s3940_s5 + $0x1c8] sm:$0xff]  ;;  %vm4087_vm12 = vmmov %vm4078_vm3 }
 0xf2b   :  { %1745 = vadd.xlane.f32.xlu2 %v1744_v33  ;;  %v1731_v15 = vpop.xlane.xlu0 %1730  ;;  %1949 = vmatpush.msra.mxu2 %v2323_v42 }
 0xf2c   :  { %v1734_v28 = vmul.f32 %v1731_v15, %v3126_v43 }
 0xf2e   :  { %v3675_v35 = vsub.f32 %v1722_v9, %v1734_v28  ;;  %v2308_v9 = vld [vmem:[%s3940_s5 + $0x150] sm:$0xff] }
 0xf2f   :  { %1922 = vmatpush.msra.mxu0 %v2308_v9  ;;  %2338 = vmatpush.msrb.mxu1 %v2308_v9 }
 0xf30   :  { %v1740_v37 = vmul.f32 %v3675_v35, %v3675_v35 }
 0xf31   :  { %1923 = vmatpush.msra.mxu0 %v2307_v62  ;;  %2339 = vmatpush.msrb.mxu1 %v2307_v62 }
 0xf32   :  { %v1747_v12 = vsel %vm4082_vm0, %v1740_v37, 0.0  ;;  %v2305_v37 = vld [vmem:[%s3940_s5 + $0x138] sm:$0xff]  ;;  %vm4088_vm0 = vmmov %vm4078_vm3 }
 0xf33   :  { %1748 = vadd.xlane.f32.xlu0 %v1747_v12  ;;  %v2322_v12 = vld [vmem:[%s3940_s5 + $0x1c0] sm:$0xff] }
 0xf34   :  { %1950 = vmatpush.msra.mxu2 %v2322_v12 }
 0xf36   :  { %1951 = vmatpush.msra.mxu2 %v2321_v47 }
 0xf38   :  { %1952 = vmatpush.msra.mxu2 %v2320_v17 }
 0xf96   :  { %v1743_v53 = vpop.xlane.xlu1 %1742 }
 0xf97   :  { %v1750_v32 = vmul.f32 %v1743_v53, %v3126_v43 }
 0xf99   :  { %v1753_v29 = vadd.f32 1e-05, %v1750_v32 }
 0xf9b   :  { %2498 = vrsqrt.f32 %v1753_v29  ;;  %vm1762_vm9 = vweird.f32 %v1753_v29 }
 0xf9e   :  { %v1746_v22 = vpop.xlane.xlu2 %1745 }
 0xf9f   :  { %v1751_v39 = vmul.f32 %v1746_v22, %v3126_v43  ;;  %v2300_v22 = vld [vmem:[%s3940_s5 + $0x110] sm:$0xff] }
 0xfa1   :  { %v2499_v18 = vpop.eup %2498  ;;  %v3730_v59 = vadd.f32 1e-05, %v1751_v39  ;;  %v2319_v39 = vld [vmem:[%s3940_s5 + $0x1a8] sm:$0xff] }
 0xfa2   :  { %v1757_v30 = vmul.f32 %v2499_v18, %v1753_v29  ;;  %vm1763_vm2 = vweird.f32 %v2499_v18  ;;  %1953 = vmatpush.msra.mxu2 %v2319_v39  ;;  %v2054_v39 = vld [vmem:[%s3941_s6 + $0x38] sm:$0xff] }
 0xfa3   :  { %2500 = vrsqrt.f32 %v3730_v59  ;;  %vm1764_vm11 = vmor %vm1762_vm9, %vm1763_vm2  ;;  %vm1772_vm6 = vweird.f32 %v3730_v59  ;;  %vm4090_vm9 = vcmask 519168  }
 0xfa4   :  { %v1758_v2 = vmul.f32 %v2499_v18, %v1757_v30  ;;  %v2317_v30 = vld [vmem:[%s3940_s5 + $0x198] sm:$0xff]  ;;  %vm4089_vm2 = vmmov %vm4088_vm0 }
 0xfa6   :  { %v1759_v5 = vmul.f32 0.5, %v1758_v2  ;;  %v1749_v55 = vpop.xlane.xlu0 %1748  ;;  %v2314_v2 = vld [vmem:[%s3940_s5 + $0x180] sm:$0xff] }
 0xfa7   :  { %v1752_v60 = vmul.f32 %v1749_v55, %v3126_v43 }
 0xfa8   :  { %v1760_v13 = vsub.f32 1.5, %v1759_v5 }
 0xfa9   :  { %v2501_v14 = vpop.eup %2500  ;;  %v3758_v24 = vadd.f32 1e-05, %v1752_v60 }
 0xfaa   :  { %v1761_v56 = vmul.f32 %v2499_v18, %v1760_v13  ;;  %v1767_v6 = vmul.f32 %v2501_v14, %v3730_v59  ;;  %vm1773_vm1 = vweird.f32 %v2501_v14  ;;  %v2298_v59 = vld [vmem:[%s3940_s5 + $0x100] sm:$0xff] }
 0xfab   :  { %2502 = vrsqrt.f32 %v3758_v24  ;;  %vm1774_vm8 = vmor %vm1772_vm6, %vm1773_vm1  ;;  %vm1782_vm15 = vweird.f32 %v3758_v24 }
 0xfac   :  { %v1765_v26 = vsel %vm1764_vm11, %v2499_v18, %v1761_v56  ;;  %v1768_v41 = vmul.f32 %v2501_v14, %v1767_v6  ;;  %v2318_v18 = vld [vmem:[%s3940_s5 + $0x1a0] sm:$0xff]  ;;  %vm4091_vm11 = vmmov %vm4088_vm0 }
 0xfad   :  { %v1786_v27 = vmul.f32 %v1765_v26, %v3663_v7  ;;  %v2306_v7 = vld [vmem:[%s3940_s5 + $0x140] sm:$0xff]  ;;  %1954 = vmatpush.msra.mxu2 %v2318_v18  ;;  %vm4092_vm1 = vmmov %vm4088_vm0  ;;  %v2052_v18 = vld [vmem:[%s3941_s6 + $0x28] sm:$0xff] }
 0xfae   :  { %v1769_v10 = vmul.f32 0.5, %v1768_v41  ;;  %1924 = vmatpush.msra.mxu0 %v2306_v7  ;;  %2340 = vmatpush.msrb.mxu1 %v2306_v7  ;;  %vm4093_vm6 = vmmov %vm4090_vm9 }
 0xfaf   :  { %v1790_v33 = vmul.f32 %v3768_v34, %v1786_v27  ;;  %1955 = vmatpush.msra.mxu2 %v2317_v30  ;;  %v1916_v27 = vperm.slane %v3866_v54, 3  ;;  %v2050_v30 = vld [vmem:[%s3941_s6 + $0x18] sm:$0xff] }
 0xfb0   :  { %v1770_v19 = vsub.f32 1.5, %v1769_v10  ;;  %1925 = vmatpush.msra.mxu0 %v2305_v37  ;;  %2341 = vmatpush.msrb.mxu1 %v2305_v37 }
 0xfb1   :  { %v2503_v15 = vpop.eup %2502  ;;  %v3790_v28 = vadd.f32 %v1793_v44, %v1790_v33  ;;  %1956 = vmatpush.msra.mxu2 %v2316_v45  ;;  %v2049_v45 = vld [vmem:[%s3941_s6 + $0x10] sm:$0xff] }
 0xfb2   :  { %v1771_v11 = vmul.f32 %v2501_v14, %v1770_v19  ;;  %v1777_v4 = vmul.f32 %v2503_v15, %v3758_v24  ;;  %1926 = vmatpush.msra.mxu0 %v2304_v20  ;;  %2342 = vmatpush.msrb.mxu1 %v2304_v20  ;;  %vm1783_vm10 = vweird.f32 %v2503_v15 }
 0xfb3   :  { %2292 = vmatmul.msk.f32.vlgmr.msrb.gmra.mxu0 %vm4083_vm4, %v3790_v28  ;;  %2295 = vmatmul.msk.f32.vlgmr.msrb.gmra.mxu2 %vm4084_vm7, %v3790_v28  ;;  %vm1784_vm13 = vmor %vm1782_vm15, %vm1783_vm10 }
 0xfb4   :  { %v1775_v49 = vsel %vm1774_vm8, %v2501_v14, %v1771_v11  ;;  %v1778_v0 = vmul.f32 %v2503_v15, %v1777_v4  ;;  %1927 = vmatpush.msra.mxu0 %v2303_v38  ;;  %2343 = vmatpush.msrb.mxu1 %v2303_v38 }
 0xfb5   :  { %v1787_v16 = vmul.f32 %v1775_v49, %v3669_v31  ;;  %1957 = vmatpush.msra.mxu2 %v2315_v57  ;;  %v2048_v57 = vld [vmem:[%s3941_s6 + $0x8] sm:$0xff] }
 0xfb6   :  { %v1779_v23 = vmul.f32 0.5, %v1778_v0  ;;  %1928 = vmatpush.msra.mxu0 %v2302_v50  ;;  %2344 = vmatpush.msrb.mxu1 %v2302_v50 }
 0xfb7   :  { %v1791_v21 = vmul.f32 %v3768_v34, %v1787_v16  ;;  %1958 = vmatpush.msra.mxu2 %v2314_v2  ;;  %v2047_v2 = vld [vmem:[%s3941_s6] sm:$0xff] }
 0xfb8   :  { %v1780_v31 = vsub.f32 1.5, %v1779_v23  ;;  %1929 = vmatpush.msra.mxu0 %v2301_v40  ;;  %2345 = vmatpush.msrb.mxu1 %v2301_v40 }
 0xfb9   :  { %v3821_v48 = vadd.f32 %v1793_v44, %v1791_v21  ;;  %2349 = vmatpush.msrb.mxu2 %v2054_v39 }
 0xfba   :  { %v1781_v52 = vmul.f32 %v2503_v15, %v1780_v31  ;;  %1930 = vmatpush.msra.mxu0 %v2300_v22  ;;  %2346 = vmatpush.msrb.mxu1 %v2300_v22 }
 0xfbb   :  { %2293 = vmatmul.msk.f32.gmra.mxu0 %vm4078_vm3, %v3821_v48  ;;  %2296 = vmatmul.msk.f32.gmra.mxu2 %vm4085_vm14, %v3821_v48  ;;  %vm4094_vm3 = vmmov %vm4088_vm0 }
 0xfbc   :  { %v1785_v8 = vsel %vm1784_vm13, %v2503_v15, %v1781_v52 }
 0xfbd   :  { %v1788_v53 = vmul.f32 %v1785_v8, %v3675_v35  ;;  %v2299_v35 = vld [vmem:[%s3940_s5 + $0x108] sm:$0xff] }
 0xfbe   :  { %1931 = vmatpush.msra.mxu0 %v2299_v35  ;;  %2347 = vmatpush.msrb.mxu1 %v2299_v35  ;;  %v2053_v35 = vld [vmem:[%s3941_s6 + $0x30] sm:$0xff] }
 0xfbf   :  { %v1792_v32 = vmul.f32 %v3768_v34, %v1788_v53  ;;  %2350 = vmatpush.msrb.mxu2 %v2053_v35 }
 0xfc0   :  { %1932 = vmatpush.msra.mxu0 %v2298_v59  ;;  %2348 = vmatpush.msrb.mxu1 %v2298_v59  ;;  %v2051_v59 = vld [vmem:[%s3941_s6 + $0x20] sm:$0xff]  ;;  %s2589_s6 = smov [#allocation5]  }
 0xfc1   :  { %v3833_v29 = vadd.f32 %v1793_v44, %v1792_v32  ;;  %2351 = vmatpush.msrb.mxu2 %v2052_v18  ;;  %s2132_s3 = sshll.u32 %s2589_s6, 4  ;;  %s2133_s3 = int_to_ptr.vmem [resolvable:$true] %s2132_s3 }
 0xfc2   :  { %2072 = vmatpush.msrb.mxu0 %v2054_v39 }
 0xfc3   :  { %2294 = vmatmul.msk.f32.gmra.mxu0 %vm4086_vm5, %v3833_v29  ;;  %2297 = vmatmul.msk.f32.gmra.mxu2 %vm4087_vm12, %v3833_v29 }
 0xfc4   :  { %2073 = vmatpush.msrb.mxu0 %v2053_v35  ;;  %2352 = vmatpush.msrb.mxu2 %v2051_v59 }
 0xfc6   :  { %2074 = vmatpush.msrb.mxu0 %v2052_v18  ;;  %2353 = vmatpush.msrb.mxu2 %v2050_v30 }
 0xfc8   :  { %2075 = vmatpush.msrb.mxu0 %v2051_v59  ;;  %2354 = vmatpush.msrb.mxu2 %v2049_v45 }
 0xfca   :  { %2076 = vmatpush.msrb.mxu0 %v2050_v30  ;;  %2355 = vmatpush.msrb.mxu2 %v2048_v57 }
 0xfcc   :  { %2077 = vmatpush.msrb.mxu0 %v2049_v45  ;;  %2356 = vmatpush.msrb.mxu2 %v2047_v2 }
 0xfce   :  { %2078 = vmatpush.msrb.mxu0 %v2048_v57 }
 0xfd0   :  { %2079 = vmatpush.msrb.mxu0 %v2047_v2 }
0x1030   :  { %v1842_v36 = vpop.f32.mrf.mxu0 }
0x1031   :  { %v1843_v5 = vadd.f32 %v1842_v36, %v1814_v1 }
0x1033   :  { %v1877_v55 = vmax.f32 %v1843_v5, 0.0 }
0x1035   :  { %1933 = vmatmul.f32.vlgmr.msra.gmra.mxu0 %v1877_v55 }
0x1036   :  { %v1868_v60 = vpop.f32.mrf.mxu2 }
0x1037   :  { %v1869_v63 = vadd.f32 %v1868_v60, %v1815_v3 }
0x1038   :  { %v1845_v13 = vpop.f32.mrf.mxu0 }
0x1039   :  { %v1878_v51 = vmax.f32 %v1869_v63, 0.0  ;;  %v1846_v14 = vadd.f32 %v1845_v13, %v1814_v1 }
0x103b   :  { %v1879_v24 = vmax.f32 %v1846_v14, 0.0  ;;  %1959 = vmatmul.f32.vlgmr.msra.gmra.mxu2 %v1878_v51 }
0x103d   :  { %1936 = vmatmul.f32.gmra.mxu0 %v1879_v24 }
0x103e   :  { %v1871_v61 = vpop.f32.mrf.mxu2 }
0x103f   :  { %v1872_v56 = vadd.f32 %v1871_v61, %v1815_v3 }
0x1040   :  { %v1848_v6 = vpop.f32.mrf.mxu0 }
0x1041   :  { %v1880_v25 = vmax.f32 %v1872_v56, 0.0  ;;  %v1849_v34 = vadd.f32 %v1848_v6, %v1814_v1 }
0x1043   :  { %v1881_v9 = vmax.f32 %v1849_v34, 0.0  ;;  %1962 = vmatmul.f32.gmra.mxu2 %v1880_v25 }
0x1045   :  { %1939 = vmatmul.f32.vlgmr.msrb.gmra.mxu1 %v1881_v9 }
0x1046   :  { %v1874_v26 = vpop.f32.mrf.mxu2 }
0x1047   :  { %v1875_v41 = vadd.f32 %v1874_v26, %v1815_v3  ;;  %v2038_v26 = vperm.slane %v3866_v54, 6 }
0x1049   :  { %v1882_v46 = vmax.f32 %v1875_v41, 0.0 }
0x104b   :  { %1965 = vmatmul.f32.gmra.mxu2 %v1882_v46 }
0x10b2   :  { %v1934_v58 = vpop.f32.mrf.mxu0 }
0x10b3   :  { %v1935_v44 = vadd.f32 %v1934_v58, %v1916_v27 }
0x10ba   :  { %v1937_v33 = vpop.f32.mrf.mxu0 }
0x10bb   :  { %v1938_v19 = vadd.f32 %v1937_v33, %v1916_v27 }
0x10be   :  { %v1960_v62 = vpop.f32.mrf.mxu2 }
0x10bf   :  { %v1961_v10 = vadd.f32 %v1960_v62, %v1935_v44 }
0x10c1   :  { %v1969_v42 = vadd.f32 %v1961_v10, %v3790_v28 }
0x10c2   :  { %v1940_v11 = vpop.f32.mrf.mxu1 }
0x10c3   :  { %v1972_v7 = vsel %vm4088_vm0, %v1969_v42, 0.0  ;;  %v1941_v20 = vadd.f32 %v1940_v11, %v1916_v27  ;;  %v2042_v27 = vperm.slane %v3866_v54, 7 }
0x10c4   :  { %1973 = vadd.xlane.f32.xlu1 %v1972_v7 }
0x10c6   :  { %v1963_v15 = vpop.f32.mrf.mxu2 }
0x10c7   :  { %v1964_v37 = vadd.f32 %v1963_v15, %v1938_v19 }
0x10c9   :  { %v1970_v12 = vadd.f32 %v1964_v37, %v3821_v48 }
0x10cb   :  { %v1975_v4 = vsel %vm4089_vm2, %v1970_v12, 0.0  ;;  %vm4095_vm2 = vmmov %vm4088_vm0 }
0x10cc   :  { %1976 = vadd.xlane.f32.xlu0 %v1975_v4 }
0x10ce   :  { %v1966_v47 = vpop.f32.mrf.mxu2 }
0x10cf   :  { %v1967_v49 = vadd.f32 %v1966_v47, %v1941_v20 }
0x10d1   :  { %v1971_v0 = vadd.f32 %v1967_v49, %v3833_v29 }
0x10d3   :  { %v1978_v28 = vsel %vm4090_vm9, %v1971_v0, 0.0  ;;  %vm4096_vm9 = vcmask 1043456  }
0x10d4   :  { %1979 = vadd.xlane.f32.xlu2 %v1978_v28 }
0x1137   :  { %v1974_v16 = vpop.xlane.xlu1 %1973 }
0x1138   :  { %v1981_v38 = vmul.f32 %v1974_v16, %v3126_v43  ;;  %v2046_v16 = vld [vmem:[#allocation2 + $0x20] ss:$0 sm:$0xff] }
0x113a   :  { %v3878_v17 = vsub.f32 %v1969_v42, %v1981_v38 }
0x113c   :  { %v1987_v23 = vmul.f32 %v3878_v17, %v3878_v17 }
0x113e   :  { %v1990_v21 = vsel %vm4091_vm11, %v1987_v23, 0.0  ;;  %vm4097_vm11 = vmmov %vm4096_vm9 }
0x113f   :  { %v1977_v50 = vpop.xlane.xlu0 %1976  ;;  %1991 = vadd.xlane.f32.xlu1 %v1990_v21 }
0x1140   :  { %v1982_v31 = vmul.f32 %v1977_v50, %v3126_v43 }
0x1142   :  { %v3884_v48 = vsub.f32 %v1970_v12, %v1982_v31 }
0x1144   :  { %v1988_v40 = vmul.f32 %v3884_v48, %v3884_v48 }
0x1146   :  { %v1993_v52 = vsel %vm4092_vm1, %v1988_v40, 0.0 }
0x1147   :  { %1994 = vadd.xlane.f32.xlu0 %v1993_v52  ;;  %v1980_v8 = vpop.xlane.xlu2 %1979 }
0x1148   :  { %v1983_v53 = vmul.f32 %v1980_v8, %v3126_v43 }
0x114a   :  { %v3890_v32 = vsub.f32 %v1971_v0, %v1983_v53 }
0x114c   :  { %v1989_v29 = vmul.f32 %v3890_v32, %v3890_v32 }
0x114e   :  { %v1996_v22 = vsel %vm4093_vm6, %v1989_v29, 0.0 }
0x114f   :  { %1997 = vadd.xlane.f32.xlu2 %v1996_v22 }
0x11b2   :  { %v1992_v1 = vpop.xlane.xlu1 %1991 }
0x11b3   :  { %v1999_v36 = vmul.f32 %v1992_v1, %v3126_v43 }
0x11b5   :  { %v2002_v5 = vadd.f32 1e-05, %v1999_v36 }
0x11b7   :  { %2504 = vrsqrt.f32 %v2002_v5  ;;  %vm2011_vm4 = vweird.f32 %v2002_v5 }
0x11ba   :  { %v1995_v55 = vpop.xlane.xlu0 %1994 }
0x11bb   :  { %v2000_v3 = vmul.f32 %v1995_v55, %v3126_v43 }
0x11bd   :  { %v2505_v60 = vpop.eup %2504  ;;  %v2003_v63 = vadd.f32 1e-05, %v2000_v3 }
0x11be   :  { %v2006_v13 = vmul.f32 %v2505_v60, %v2002_v5  ;;  %vm2012_vm8 = vweird.f32 %v2505_v60 }
0x11bf   :  { %2506 = vrsqrt.f32 %v2003_v63  ;;  %vm2013_vm7 = vmor %vm2011_vm4, %vm2012_vm8  ;;  %vm2021_vm15 = vweird.f32 %v2003_v63 }
0x11c0   :  { %v2007_v51 = vmul.f32 %v2505_v60, %v2006_v13 }
0x11c2   :  { %v2008_v14 = vmul.f32 0.5, %v2007_v51  ;;  %v1998_v24 = vpop.xlane.xlu2 %1997 }
0x11c3   :  { %v2001_v61 = vmul.f32 %v1998_v24, %v3126_v43 }
0x11c4   :  { %v2009_v56 = vsub.f32 1.5, %v2008_v14 }
0x11c5   :  { %v2507_v6 = vpop.eup %2506  ;;  %v2004_v25 = vadd.f32 1e-05, %v2001_v61 }
0x11c6   :  { %v2010_v34 = vmul.f32 %v2505_v60, %v2009_v56  ;;  %v2016_v9 = vmul.f32 %v2507_v6, %v2003_v63  ;;  %vm2022_vm10 = vweird.f32 %v2507_v6 }
0x11c7   :  { %2508 = vrsqrt.f32 %v2004_v25  ;;  %vm2023_vm13 = vmor %vm2021_vm15, %vm2022_vm10  ;;  %vm2031_vm5 = vweird.f32 %v2004_v25 }
0x11c8   :  { %v2014_v41 = vsel %vm2013_vm7, %v2505_v60, %v2010_v34  ;;  %v2017_v46 = vmul.f32 %v2507_v6, %v2016_v9 }
0x11c9   :  { %v2035_v58 = vmul.f32 %v2014_v41, %v3878_v17 }
0x11ca   :  { %v2018_v44 = vmul.f32 0.5, %v2017_v46 }
0x11cb   :  { %v2039_v62 = vmul.f32 %v2038_v26, %v2035_v58 }
0x11cc   :  { %v2019_v43 = vsub.f32 1.5, %v2018_v44 }
0x11cd   :  { %v2509_v10 = vpop.eup %2508  ;;  %v2043_v42 = vadd.f32 %v2042_v27, %v2039_v62 }
0x11ce   :  { %v2020_v33 = vmul.f32 %v2507_v6, %v2019_v43  ;;  %v2026_v7 = vmul.f32 %v2509_v10, %v2004_v25  ;;  %vm2032_vm14 = vweird.f32 %v2509_v10 }
0x11cf   :  { %2330 = vmatmul.msk.f32.vlgmr.msrb.gmra.mxu0 %vm4094_vm3, %v2043_v42  ;;  %vm2033_vm12 = vmor %vm2031_vm5, %vm2032_vm14 }
0x11d0   :  { %v2024_v19 = vsel %vm2023_vm13, %v2507_v6, %v2020_v33  ;;  %v2027_v15 = vmul.f32 %v2509_v10, %v2026_v7 }
0x11d1   :  { %v2036_v37 = vmul.f32 %v2024_v19, %v3884_v48 }
0x11d2   :  { %v2028_v12 = vmul.f32 0.5, %v2027_v15 }
0x11d3   :  { %v2040_v11 = vmul.f32 %v2038_v26, %v2036_v37 }
0x11d4   :  { %v2029_v4 = vsub.f32 1.5, %v2028_v12 }
0x11d5   :  { %v2044_v54 = vadd.f32 %v2042_v27, %v2040_v11 }
0x11d6   :  { %v2030_v20 = vmul.f32 %v2509_v10, %v2029_v4 }
0x11d7   :  { %2331 = vmatmul.msk.f32.gmra.mxu0 %vm4088_vm0, %v2044_v54 }
0x11d8   :  { %v2034_v47 = vsel %vm2033_vm12, %v2509_v10, %v2030_v20 }
0x11d9   :  { %v2037_v49 = vmul.f32 %v2034_v47, %v3890_v32 }
0x11db   :  { %v2041_v0 = vmul.f32 %v2038_v26, %v2037_v49 }
0x11dd   :  { %v2045_v28 = vadd.f32 %v2042_v27, %v2041_v0 }
0x11df   :  { %2332 = vmatmul.msk.f32.vlgmr.msrb.gmra.mxu2 %vm4095_vm2, %v2045_v28 }
0x124c   :  { %v2081_v38 = vpop.f32.mrf.mxu0 }
0x124d   :  { %v2082_v17 = vadd.f32 %v2081_v38, %v2046_v16 }
0x124f   :  { %2090 = vmax.xlane.f32.xlu2 %v2082_v17 }
0x1254   :  { %v2084_v23 = vpop.f32.mrf.mxu0 }
0x1255   :  { %v2085_v21 = vadd.f32 %v2084_v23, %v2046_v16 }
0x1257   :  { %2092 = vmax.xlane.f32.xlu0 %v2085_v21 }
0x1262   :  { %v2087_v50 = vpop.f32.mrf.mxu2 }
0x1263   :  { %v2088_v31 = vadd.f32 %v2087_v50, %v2046_v16 }
0x1265   :  { %v2094_v48 = vsel %vm4096_vm9, %v2088_v31, -inf }
0x1266   :  { %2095 = vmax.xlane.f32.xlu1 %v2094_v48 }
0x12c2   :  { %v2091_v40 = vpop.xlane.xlu2 %2090 }
0x12c3   :  { %v2097_v52 = vsub.f32 %v2082_v17, %v2091_v40 }
0x12c5   :  { %v2100_v8 = vmul.f32 1.442695, %v2097_v52 }
0x12c7   :  { %2510 = vpow2.f32 %v2100_v8 }
0x12ca   :  { %v2093_v53 = vpop.xlane.xlu0 %2092 }
0x12cb   :  { %v2098_v32 = vsub.f32 %v2085_v21, %v2093_v53 }
0x12cd   :  { %v2511_v29 = vpop.eup %2510  ;;  %v2102_v22 = vmul.f32 1.442695, %v2098_v32 }
0x12ce   :  { %2106 = vadd.xlane.f32.xlu1 %v2511_v29 }
0x12cf   :  { %2512 = vpow2.f32 %v2102_v22 }
0x12d5   :  { %v2513_v39 = vpop.eup %2512 }
0x12d6   :  { %2108 = vadd.xlane.f32.xlu2 %v2513_v39 }
0x12d9   :  { %v2096_v35 = vpop.xlane.xlu1 %2095 }
0x12da   :  { %v2099_v18 = vsub.f32 %v2088_v31, %v2096_v35 }
0x12dc   :  { %v2104_v59 = vmul.f32 1.442695, %v2099_v18 }
0x12de   :  { %2514 = vpow2.f32 %v2104_v59 }
0x12e4   :  { %v2515_v30 = vpop.eup %2514 }
0x12e5   :  { %v2110_v45 = vsel %vm4097_vm11, %v2515_v30, 0.0 }
0x12e6   :  { %2111 = vadd.xlane.f32.xlu0 %v2110_v45 }
0x1341   :  { %v2107_v57 = vpop.xlane.xlu1 %2106 }
0x1342   :  { %2516 = vlog2.f32 %v2107_v57 }
0x1348   :  { %v2517_v2 = vpop.eup %2516 }
0x1349   :  { %v2114_v1 = vmul.f32 0.6931472, %v2517_v2  ;;  %v2109_v36 = vpop.xlane.xlu2 %2108 }
0x134a   :  { %2518 = vlog2.f32 %v2109_v36 }
0x134b   :  { %v2119_v5 = vadd.f32 %v2114_v1, %v2091_v40 }
0x134d   :  { %v2122_v55 = vsub.f32 %v2082_v17, %v2119_v5 }
0x134f   :  { %2125 = vst [vmem:[#allocation5] sm:$0xff] %v2122_v55 }
0x1350   :  { %v2519_v3 = vpop.eup %2518 }
0x1351   :  { %v2116_v60 = vmul.f32 0.6931472, %v2519_v3 }
0x1353   :  { %v2120_v63 = vadd.f32 %v2116_v60, %v2093_v53 }
0x1355   :  { %v2123_v13 = vsub.f32 %v2085_v21, %v2120_v63 }
0x1357   :  { %2126 = vst [vmem:[#allocation5 + $0x8] sm:$0xff] %v2123_v13 }
0x1359   :  { %v2112_v51 = vpop.xlane.xlu0 %2111 }
0x135a   :  { %2520 = vlog2.f32 %v2112_v51 }
0x1360   :  { %v2521_v14 = vpop.eup %2520 }
0x1361   :  { %v2118_v24 = vmul.f32 0.6931472, %v2521_v14 }
0x1363   :  { %v2121_v61 = vadd.f32 %v2118_v24, %v2096_v35 }
0x1365   :  { %v2124_v56 = vsub.f32 %v2088_v31, %v2121_v61 }
0x1367   :  { %2127 = vst [vmem:[#allocation5 + $0x10] sm:$0xf] %v2124_v56 }
0x1368   :  { %2140 = dma.vmem_to_hbm [thread:$0]  %s2133_s3, 384, %s2135_s0, [#allocation4], %s2590_s9, %s2590_s9, %s2591_s10  }
0x1369   :  { %2575 = dma.done.wait [#allocation4], 384  }
0x136a   :  { %2576 = vsyncadd [#allocation4], 4294966912 }
0x136b   :  { %2145 = vsyncpa [#allocation3], 1 }
0x136c   :  { %2146 = vsyncpa [#allocation4], 1 }

</bundles_post_ra>
